<compile_context>
chip_gen: v6e
topology: v6e:2x2x1
jax: 0.10.0
libtpu: 0.0.40
codegen_flags: <defaults>
</compile_context>

<pallas_src>
import functools

import numpy as np
import jax
import jax.numpy as jnp
from jax import lax
from jax.experimental import pallas as pl
from jax.experimental.pallas import tpu as pltpu


# ------------------------------ small helpers -------------------------------

def _round_up(x, m):
    return (x + m - 1) // m * m


def _pad_to(a, shape):
    pads = [(0, s - d) for d, s in zip(a.shape, shape)]
    return jnp.pad(a, pads)


def _nbytes(shape, dtype):
    n = 1
    for d in shape:
        n *= int(d)
    return n * np.dtype(dtype).itemsize


def _vmem_limit_bytes(block_specs, scratch_specs):
    """Compute an honest VMEM budget: 2x (double-buffered) pipeline blocks +
    scratch + margin, floored at the 32 MiB default and capped at 48 MiB so a
    v7x TensorCore (64 MiB physical) keeps headroom for Mosaic scratch."""
    blocks = sum(_nbytes(s, d) for s, d in block_specs)
    scratch = sum(_nbytes(s, d) for s, d in scratch_specs)
    need = 2 * blocks + scratch + (8 << 20)
    return int(min(max(need, 32 << 20), 48 << 20))


def _im2col_3x3(x_nhwc, stride):
    """Host-side conv1 im2col, used only for the strided/downsample case.

    Columns are tap*Cin + channel, matching the (9*Cin, Cout) weight layout,
    so conv1 stays a single merged-K matmul in the kernel. For stride 2 the
    HBM amplification is only ~2.25x (each tap keeps 1/4 of the pixels).
    """
    n, h, w, c = x_nhwc.shape
    ho = (h + 2 - 3) // stride + 1
    wo = (w + 2 - 3) // stride + 1
    xp = jnp.pad(x_nhwc, ((0, 0), (1, 1), (1, 1), (0, 0)))
    taps = []
    for kh in range(3):
        for kw in range(3):
            taps.append(xp[:, kh:kh + stride * (ho - 1) + 1:stride,
                              kw:kw + stride * (wo - 1) + 1:stride, :])
    t = jnp.stack(taps, axis=3)                  # (N, Ho, Wo, 9, Cin)
    return t.reshape(n, ho * wo, 9 * c)


# --------------------------- in-kernel tap building --------------------------

def _spatial_masks(rows_p, ho, wo):
    """3 row masks (dy) and 3 column masks (dx), computed ONCE per kernel.

    Row/column indices of each flattened output pixel are derived with f32
    arithmetic (plain VPU ops; exact for these magnitudes). The dy masks also
    kill the rows_p > rows pad rows (r >= ho there), which is load-bearing:
    staged y1 pad rows hold ReLU(b1) != 0.
    """
    i_f = lax.broadcasted_iota(jnp.int32, (rows_p, 1), 0).astype(jnp.float32)
    rr = jnp.floor((i_f + 0.5) * (1.0 / wo))
    cc = i_f - rr * wo
    row_m = {dy: (rr + dy >= 0.0) & (rr + dy < ho) for dy in (-1, 0, 1)}
    col_m = {dx: (cc + dx >= 0.0) & (cc + dx < wo) for dx in (-1, 0, 1)}
    return row_m, col_m


def _build_taps(halo_ref, taps_ref, row_m, col_m, pad_off, wo):
    """Fill taps_ref (rows_p, 9*C) bf16 from shifted slices of the haloed
    activation scratch. No memset needed: every halo / pad-row / horizontal
    wrap read is zeroed by the masks before it reaches the MXU."""
    rows_p, kc = taps_ref.shape
    c = kc // 9
    for t in range(9):                           # static unroll, layout only
        dy, dx = t // 3 - 1, t % 3 - 1
        off = pad_off + dy * wo + dx
        tap = halo_ref[off:off + rows_p, :]
        valid = row_m[dy] & col_m[dx]
        taps_ref[:, t * c:(t + 1) * c] = jnp.where(valid, tap,
                                                   jnp.zeros_like(tap))


# ------------------------------ fused kernels --------------------------------

def _identity_block_kernel(x_ref, w1_ref, s1_ref, b1_ref,
                           w2_ref, s2_ref, b2_ref,
                           o_ref, halo_ref, taps_ref, *, ho, wo, pad_off):
    """stride=1, cin==cout: conv1+BN1+ReLU -> conv2+BN2 -> (+x) -> ReLU.

    x_ref: (1, rows_p, C) f32 (single DMA of the raw input tile)
    w1/w2: (9*C, C) bf16   s*/b*: (1, C) f32   o_ref: (1, rows_p, C) f32
    halo_ref: (r_halo, C) bf16 scratch (x, then y1)
    taps_ref: (rows_p, 9*C) bf16 scratch (conv1 taps, then conv2 taps)
    """
    rows_p = taps_ref.shape[0]

    # Stage the input once as bf16; conv1 im2col is built in VMEM.
    halo_ref[pad_off:pad_off + rows_p, :] = x_ref[0].astype(halo_ref.dtype)

    row_m, col_m = _spatial_masks(rows_p, ho, wo)
    _build_taps(halo_ref, taps_ref, row_m, col_m, pad_off, wo)

    # conv1: ONE merged-K matmul (bf16 x bf16 -> f32) + BN1 + ReLU.
    acc1 = jnp.dot(taps_ref[...], w1_ref[...],
                   preferred_element_type=jnp.float32)
    y1 = jnp.maximum(acc1 * s1_ref[...] + b1_ref[...], 0.0)

    # Re-stage y1 (bf16, one cast) and rebuild the taps for conv2.
    halo_ref[pad_off:pad_off + rows_p, :] = y1.astype(halo_ref.dtype)
    _build_taps(halo_ref, taps_ref, row_m, col_m, pad_off, wo)

    # conv2: ONE merged-K matmul + BN2.
    acc2 = jnp.dot(taps_ref[...], w2_ref[...],
                   preferred_element_type=jnp.float32)
    y2 = acc2 * s2_ref[...] + b2_ref[...]

    # Identity shortcut: the f32 input block already resident in VMEM
    # (no extra HBM read, residual stays f32).
    o_ref[0] = jnp.maximum(y2 + x_ref[0], 0.0).astype(o_ref.dtype)


def _downsample_block_kernel(taps1_ref, ident_ref, w1_ref, s1_ref, b1_ref,
                             w2_ref, s2_ref, b2_ref, wd_ref, sd_ref, bd_ref,
                             o_ref, halo_ref, taps_ref, *, ho, wo, pad_off):
    """stride!=1 or cin!=cout: conv1 taps come pre-built (strided im2col),
    shortcut is a 1x1 conv + BN of the strided input."""
    rows_p = taps_ref.shape[0]

    # conv1: ONE merged-K matmul (K = 9*Cin) + BN1 + ReLU.
    acc1 = jnp.dot(taps1_ref[0], w1_ref[...],
                   preferred_element_type=jnp.float32)
    y1 = jnp.maximum(acc1 * s1_ref[...] + b1_ref[...], 0.0)
    halo_ref[pad_off:pad_off + rows_p, :] = y1.astype(halo_ref.dtype)

    row_m, col_m = _spatial_masks(rows_p, ho, wo)
    _build_taps(halo_ref, taps_ref, row_m, col_m, pad_off, wo)

    # conv2: ONE merged-K matmul (K = 9*Cout) + BN2.
    acc2 = jnp.dot(taps_ref[...], w2_ref[...],
                   preferred_element_type=jnp.float32)
    y2 = acc2 * s2_ref[...] + b2_ref[...]

    # Downsample shortcut: 1x1 conv (matmul) + BN.
    idn = jnp.dot(ident_ref[0], wd_ref[...],
                  preferred_element_type=jnp.float32)
    idn = idn * sd_ref[...] + bd_ref[...]

    o_ref[0] = jnp.maximum(y2 + idn, 0.0).astype(o_ref.dtype)


# ------------------------------ pallas_call wrappers -------------------------

def _resident(shape):
    # Weights / BN params: constant block index across the grid.
    return pl.BlockSpec(shape, lambda i: (0,) * len(shape))


def _call_identity_block(x_flat, w1, s1, b1, w2, s2, b2,
                         *, ho, wo, pad_off, r_halo):
    n, rows_p, c_p = x_flat.shape
    kernel = functools.partial(_identity_block_kernel, ho=ho, wo=wo,
                               pad_off=pad_off)

    scratch_specs = [((r_halo, c_p), jnp.bfloat16),
                     ((rows_p, 9 * c_p), jnp.bfloat16)]
    block_specs = [((rows_p, c_p), jnp.float32),           # x block
                   ((9 * c_p, c_p), jnp.bfloat16),         # w1
                   ((1, c_p), jnp.float32), ((1, c_p), jnp.float32),
                   ((9 * c_p, c_p), jnp.bfloat16),         # w2
                   ((1, c_p), jnp.float32), ((1, c_p), jnp.float32),
                   ((rows_p, c_p), jnp.float32)]           # out block

    return pl.pallas_call(
        kernel,
        out_shape=jax.ShapeDtypeStruct((n, rows_p, c_p), jnp.float32),
        grid=(n,),
        in_specs=[
            pl.BlockSpec((1, rows_p, c_p), lambda i: (i, 0, 0)),
            _resident((9 * c_p, c_p)),
            _resident((1, c_p)), _resident((1, c_p)),
            _resident((9 * c_p, c_p)),
            _resident((1, c_p)), _resident((1, c_p)),
        ],
        out_specs=pl.BlockSpec((1, rows_p, c_p), lambda i: (i, 0, 0)),
        scratch_shapes=[pltpu.VMEM(s, d) for s, d in scratch_specs],
        compiler_params=pltpu.CompilerParams(
            dimension_semantics=("parallel",),
            vmem_limit_bytes=_vmem_limit_bytes(block_specs, scratch_specs)),
    )(x_flat, w1, s1, b1, w2, s2, b2)


def _call_downsample_block(taps1, ident, w1, s1, b1, w2, s2, b2, wd, sd, bd,
                           *, ho, wo, pad_off, r_halo):
    n, rows_p, k1_p = taps1.shape
    cid_p = ident.shape[-1]
    cout_p = w1.shape[-1]
    kernel = functools.partial(_downsample_block_kernel, ho=ho, wo=wo,
                               pad_off=pad_off)

    scratch_specs = [((r_halo, cout_p), jnp.bfloat16),
                     ((rows_p, 9 * cout_p), jnp.bfloat16)]
    block_specs = [((rows_p, k1_p), jnp.bfloat16),
                   ((rows_p, cid_p), jnp.bfloat16),
                   ((k1_p, cout_p), jnp.bfloat16),
                   ((1, cout_p), jnp.float32), ((1, cout_p), jnp.float32),
                   ((9 * cout_p, cout_p), jnp.bfloat16),
                   ((1, cout_p), jnp.float32), ((1, cout_p), jnp.float32),
                   ((cid_p, cout_p), jnp.bfloat16),
                   ((1, cout_p), jnp.float32), ((1, cout_p), jnp.float32),
                   ((rows_p, cout_p), jnp.float32)]

    return pl.pallas_call(
        kernel,
        out_shape=jax.ShapeDtypeStruct((n, rows_p, cout_p), jnp.float32),
        grid=(n,),
        in_specs=[
            pl.BlockSpec((1, rows_p, k1_p), lambda i: (i, 0, 0)),
            pl.BlockSpec((1, rows_p, cid_p), lambda i: (i, 0, 0)),
            _resident((k1_p, cout_p)),
            _resident((1, cout_p)), _resident((1, cout_p)),
            _resident((9 * cout_p, cout_p)),
            _resident((1, cout_p)), _resident((1, cout_p)),
            _resident((cid_p, cout_p)),
            _resident((1, cout_p)), _resident((1, cout_p)),
        ],
        out_specs=pl.BlockSpec((1, rows_p, cout_p), lambda i: (i, 0, 0)),
        scratch_shapes=[pltpu.VMEM(s, d) for s, d in scratch_specs],
        compiler_params=pltpu.CompilerParams(
            dimension_semantics=("parallel",),
            vmem_limit_bytes=_vmem_limit_bytes(block_specs, scratch_specs)),
    )(taps1, ident, w1, s1, b1, w2, s2, b2, wd, sd, bd)


# ------------------------------ BasicBlock fwd -------------------------------

def basic_block_forward(x_nchw, params, *, stride):
    """Forward pass of BasicBlock. Input/output are NCHW (PyTorch convention).
    (For a memory-bound chain of blocks, keep NHWC / bf16 between blocks and
    skip the transposes; done here only to match the PyTorch interface.)"""
    x = jnp.transpose(x_nchw, (0, 2, 3, 1)).astype(jnp.float32)    # -> NHWC
    n, h, w, cin = x.shape
    cout = params["w1"].shape[-1]
    ho = (h + 2 - 3) // stride + 1
    wo = (w + 2 - 3) // stride + 1
    rows = ho * wo
    downsample = (stride != 1) or (cin != cout)

    # lane-dense / sublane-aligned padded sizes
    rows_p = _round_up(rows, 8)
    cout_p = _round_up(cout, 128)
    pad_off = _round_up(wo + 1, 8)
    r_halo = _round_up(pad_off + wo + 1 + rows_p, 8)

    # NOTE: per-tap 128-lane padding multiplies padding waste by 9 when
    # cout < 128 (toy shapes here); real ResNet stages (64..512 ch) waste at
    # most 2x, and the aligned 128-wide tap columns keep all stores unmasked.
    w2 = _pad_to(params["w2"], (9, cout_p, cout_p))
    w2 = w2.reshape(9 * cout_p, cout_p).astype(jnp.bfloat16)
    s1 = _pad_to(params["s1"], (1, cout_p))
    b1 = _pad_to(params["b1"], (1, cout_p))
    s2 = _pad_to(params["s2"], (1, cout_p))
    b2 = _pad_to(params["b2"], (1, cout_p))

    if not downsample:
        # Common ResNet case: one f32 DMA of the raw input tile; conv1 im2col
        # and the identity residual both come from it inside the kernel.
        c_p = cout_p
        x_flat = _pad_to(x.reshape(n, rows, cin), (n, rows_p, c_p))
        w1 = _pad_to(params["w1"], (9, c_p, c_p))
        w1 = w1.reshape(9 * c_p, c_p).astype(jnp.bfloat16)
        out = _call_identity_block(x_flat, w1, s1, b1, w2, s2, b2,
                                   ho=ho, wo=wo, pad_off=pad_off,
                                   r_halo=r_halo)
    else:
        k1_p = _round_up(9 * cin, 128)
        cid_p = _round_up(cin, 128)
        taps1 = _pad_to(_im2col_3x3(x, stride),
                        (n, rows_p, k1_p)).astype(jnp.bfloat16)
        ident = x[:, ::stride, ::stride, :][:, :ho, :wo, :].reshape(n, rows, cin)
        ident = _pad_to(ident, (n, rows_p, cid_p)).astype(jnp.bfloat16)
        w1 = _pad_to(params["w1"].reshape(9 * cin, cout),
                     (k1_p, cout_p)).astype(jnp.bfloat16)
        wd = _pad_to(params["wd"], (cid_p, cout_p)).astype(jnp.bfloat16)
        sd = _pad_to(params["sd"], (1, cout_p))
        bd = _pad_to(params["bd"], (1, cout_p))
        out = _call_downsample_block(taps1, ident, w1, s1, b1, w2, s2, b2,
                                     wd, sd, bd, ho=ho, wo=wo,
                                     pad_off=pad_off, r_halo=r_halo)

    out = out[:, :rows, :cout].reshape(n, ho, wo, cout)
    return jnp.transpose(out, (0, 3, 1, 2))                        # -> NCHW


# --------------------------- parameters / reference --------------------------

def init_params(key, cin, cout, eps=1e-5):
    k1, k2, k3 = jax.random.split(key, 3)
    w1 = jax.random.normal(k1, (3, 3, cin, cout), jnp.float32) * 0.1   # HWIO
    w2 = jax.random.normal(k2, (3, 3, cout, cout), jnp.float32) * 0.1
    wd = jax.random.normal(k3, (1, 1, cin, cout), jnp.float32) * 0.1

    def bn(i):
        idx = jnp.arange(cout, dtype=jnp.float32)
        gamma = 1.0 + 0.10 * idx / cout + 0.01 * i
        beta = 0.05 * idx - 0.02 * i
        mean = 0.02 * idx
        var = 1.0 + 0.10 * idx
        scale = gamma / jnp.sqrt(var + eps)
        bias = beta - mean * scale
        return scale.reshape(1, cout), bias.reshape(1, cout)

    s1, b1 = bn(0)
    s2, b2 = bn(1)
    sd, bd = bn(2)
    return dict(
        w1_hwio=w1, w2_hwio=w2, wd_hwio=wd,
        w1=w1.reshape(9, cin, cout), w2=w2.reshape(9, cout, cout),
        wd=wd.reshape(cin, cout),
        s1=s1, b1=b1, s2=s2, b2=b2, sd=sd, bd=bd)


def reference_forward(x_nchw, p, stride):
    """Pure-JAX reference mirroring the PyTorch module (eval-mode BN)."""
    dn = ("NHWC", "HWIO", "NHWC")
    x = jnp.transpose(x_nchw, (0, 2, 3, 1)).astype(jnp.float32)
    cin = x.shape[-1]
    cout = p["w1_hwio"].shape[-1]

    y = lax.conv_general_dilated(x, p["w1_hwio"], (stride, stride),
                                 ((1, 1), (1, 1)), dimension_numbers=dn)
    y = jnp.maximum(y * p["s1"].reshape(1, 1, 1, -1)
                    + p["b1"].reshape(1, 1, 1, -1), 0.0)
    y = lax.conv_general_dilated(y, p["w2_hwio"], (1, 1),
                                 ((1, 1), (1, 1)), dimension_numbers=dn)
    y = y * p["s2"].reshape(1, 1, 1, -1) + p["b2"].reshape(1, 1, 1, -1)

    if stride != 1 or cin != cout:
        idn = lax.conv_general_dilated(x, p["wd_hwio"], (stride, stride),
                                       ((0, 0), (0, 0)), dimension_numbers=dn)
        idn = idn * p["sd"].reshape(1, 1, 1, -1) + p["bd"].reshape(1, 1, 1, -1)
    else:
        idn = x
    out = jnp.maximum(y + idn, 0.0)
    return jnp.transpose(out, (0, 3, 1, 2))


# ----------------------------------- main ------------------------------------

if __name__ == "__main__":
    key = jax.random.PRNGKey(0)
    kx1, kp1, kx2, kp2 = jax.random.split(key, 4)

    # Tolerance relaxed vs. a pure-f32 version: matmul operands are bf16 with
    # f32 accumulation; typical element error ~1e-2.
    ATOL = RTOL = 5e-2

    # Case 1: stride-2, channel-expanding block -> downsample shortcut active.
    N, CIN, H, W, COUT, STRIDE = 2, 4, 16, 16, 8, 2
    x1 = jax.random.normal(kx1, (N, CIN, H, W), jnp.float32)       # NCHW
    p1 = init_params(kp1, CIN, COUT)
    out1 = jax.block_until_ready(basic_block_forward(x1, p1, stride=STRIDE))
    ref1 = reference_forward(x1, p1, STRIDE)
    assert out1.shape == ref1.shape == (N, COUT, H // STRIDE, W // STRIDE)
    err1 = float(jnp.max(jnp.abs(out1 - ref1)))
    assert jnp.allclose(out1, ref1, atol=ATOL, rtol=RTOL), f"max_err={err1}"

    # Case 2: stride-1, same channels -> identity shortcut (in-kernel im2col,
    # f32 residual, no ident DMA).
    x2 = jax.random.normal(kx2, (N, COUT, H, W), jnp.float32)
    p2 = init_params(kp2, COUT, COUT)
    out2 = jax.block_until_ready(basic_block_forward(x2, p2, stride=1))
    ref2 = reference_forward(x2, p2, 1)
    assert out2.shape == ref2.shape == (N, COUT, H, W)
    err2 = float(jnp.max(jnp.abs(out2 - ref2)))
    assert jnp.allclose(out2, ref2, atol=ATOL, rtol=RTOL), f"max_err={err2}"

    print("KERNEL_OK")
</pallas_src>

<mosaic_0001>
module attributes {stable_mosaic.version = 11 : i64} {
  func.func @_downsample_block_kernel(%arg0: i32, %arg1: memref<1x64x128xbf16, #tpu.memory_space<vmem>>, %arg2: memref<1x64x128xbf16, #tpu.memory_space<vmem>>, %arg3: memref<128x128xbf16, #tpu.memory_space<vmem>>, %arg4: memref<1x128xf32, #tpu.memory_space<vmem>>, %arg5: memref<1x128xf32, #tpu.memory_space<vmem>>, %arg6: memref<1152x128xbf16, #tpu.memory_space<vmem>>, %arg7: memref<1x128xf32, #tpu.memory_space<vmem>>, %arg8: memref<1x128xf32, #tpu.memory_space<vmem>>, %arg9: memref<128x128xbf16, #tpu.memory_space<vmem>>, %arg10: memref<1x128xf32, #tpu.memory_space<vmem>>, %arg11: memref<1x128xf32, #tpu.memory_space<vmem>>, %arg12: memref<1x64x128xf32, #tpu.memory_space<vmem>>, %arg13: memref<96x128xbf16, #tpu.memory_space<vmem>>, %arg14: memref<64x1152xbf16, #tpu.memory_space<vmem>>) attributes {dimension_semantics = [#tpu.dimension_semantics<parallel>], iteration_bounds = array<i64: 2>, scalar_prefetch = 0 : i64, scratch_operands = 2 : i64, tpu.core_type = #tpu.core_type<tc>, window_params = [{transform_indices = @transform_0, window_bounds = array<i64: 1, 64, 128>}, {transform_indices = @transform_1, window_bounds = array<i64: 1, 64, 128>}, {pipeline_mode = #tpu.pipeline_mode<synchronous>, transform_indices = @transform_2, window_bounds = array<i64: 128, 128>}, {pipeline_mode = #tpu.pipeline_mode<synchronous>, transform_indices = @transform_3, window_bounds = array<i64: 1, 128>}, {pipeline_mode = #tpu.pipeline_mode<synchronous>, transform_indices = @transform_4, window_bounds = array<i64: 1, 128>}, {pipeline_mode = #tpu.pipeline_mode<synchronous>, transform_indices = @transform_5, window_bounds = array<i64: 1152, 128>}, {pipeline_mode = #tpu.pipeline_mode<synchronous>, transform_indices = @transform_6, window_bounds = array<i64: 1, 128>}, {pipeline_mode = #tpu.pipeline_mode<synchronous>, transform_indices = @transform_7, window_bounds = array<i64: 1, 128>}, {pipeline_mode = #tpu.pipeline_mode<synchronous>, transform_indices = @transform_8, window_bounds = array<i64: 128, 128>}, {pipeline_mode = #tpu.pipeline_mode<synchronous>, transform_indices = @transform_9, window_bounds = array<i64: 1, 128>}, {pipeline_mode = #tpu.pipeline_mode<synchronous>, transform_indices = @transform_10, window_bounds = array<i64: 1, 128>}, {transform_indices = @transform_11, window_bounds = array<i64: 1, 64, 128>}]} {
    %c0 = arith.constant 0 : index
    %c0_0 = arith.constant 0 : index
    %c0_1 = arith.constant 0 : index
    %0 = vector.load %arg1[%c0, %c0_0, %c0_1] : memref<1x64x128xbf16, #tpu.memory_space<vmem>>, vector<1x64x128xbf16>
    %1 = vector.shape_cast %0 : vector<1x64x128xbf16> to vector<64x128xbf16>
    %c0_2 = arith.constant 0 : index
    %c0_3 = arith.constant 0 : index
    %2 = vector.load %arg3[%c0_2, %c0_3] : memref<128x128xbf16, #tpu.memory_space<vmem>>, vector<128x128xbf16>
    %cst = arith.constant dense<0.000000e+00> : vector<64x128xf32>
    %3 = tpu.matmul %1, %2, %cst {dimension_numbers = #tpu.dot_dimension_numbers<[1], [0], [0], [1], [0, 0, 1, 1], [], []>} : vector<64x128xbf16>, vector<128x128xbf16>, vector<64x128xf32> -> vector<64x128xf32>
    %c0_4 = arith.constant 0 : index
    %c0_5 = arith.constant 0 : index
    %4 = vector.load %arg4[%c0_4, %c0_5] : memref<1x128xf32, #tpu.memory_space<vmem>>, vector<1x128xf32>
    %5 = vector.broadcast %4 : vector<1x128xf32> to vector<64x128xf32>
    %6 = arith.mulf %3, %5 : vector<64x128xf32>
    %c0_6 = arith.constant 0 : index
    %c0_7 = arith.constant 0 : index
    %7 = vector.load %arg5[%c0_6, %c0_7] : memref<1x128xf32, #tpu.memory_space<vmem>>, vector<1x128xf32>
    %8 = vector.broadcast %7 : vector<1x128xf32> to vector<64x128xf32>
    %9 = arith.addf %6, %8 : vector<64x128xf32>
    %cst_8 = arith.constant 0.000000e+00 : f32
    %10 = vector.broadcast %cst_8 : f32 to vector<64x128xf32>
    %11 = arith.maximumf %9, %10 : vector<64x128xf32>
    %12 = arith.truncf %11 : vector<64x128xf32> to vector<64x128xbf16>
    %c16 = arith.constant 16 : index
    %c0_9 = arith.constant 0 : index
    %13 = vector.load %arg13[%c16, %c0_9] : memref<96x128xbf16, #tpu.memory_space<vmem>>, vector<64x128xbf16>
    tpu.vector_store %arg13[%c16, %c0_9], %12 {strides = array<i32>} : memref<96x128xbf16, #tpu.memory_space<vmem>>, vector<64x128xbf16>,
    %14 = tpu.iota {dimensions = array<i32: 0>} : vector<64x1xi32>
    %15 = arith.sitofp %14 : vector<64x1xi32> to vector<64x1xf32>
    %cst_10 = arith.constant 5.000000e-01 : f32
    %16 = vector.broadcast %cst_10 : f32 to vector<64x1xf32>
    %17 = arith.addf %15, %16 : vector<64x1xf32>
    %cst_11 = arith.constant 1.250000e-01 : f32
    %18 = vector.broadcast %cst_11 : f32 to vector<64x1xf32>
    %19 = arith.mulf %17, %18 : vector<64x1xf32>
    %20 = math.floor %19 : vector<64x1xf32>
    %cst_12 = arith.constant 8.000000e+00 : f32
    %21 = vector.broadcast %cst_12 : f32 to vector<64x1xf32>
    %22 = arith.mulf %20, %21 : vector<64x1xf32>
    %23 = arith.subf %15, %22 : vector<64x1xf32>
    %cst_13 = arith.constant -1.000000e+00 : f32
    %24 = vector.broadcast %cst_13 : f32 to vector<64x1xf32>
    %25 = arith.addf %20, %24 : vector<64x1xf32>
    %cst_14 = arith.constant 0.000000e+00 : f32
    %26 = vector.broadcast %cst_14 : f32 to vector<64x1xf32>
    %27 = arith.cmpf oge, %25, %26 : vector<64x1xf32>
    %cst_15 = arith.constant -1.000000e+00 : f32
    %28 = vector.broadcast %cst_15 : f32 to vector<64x1xf32>
    %29 = arith.addf %20, %28 : vector<64x1xf32>
    %cst_16 = arith.constant 8.000000e+00 : f32
    %30 = vector.broadcast %cst_16 : f32 to vector<64x1xf32>
    %31 = arith.cmpf olt, %29, %30 : vector<64x1xf32>
    %32 = arith.andi %27, %31 : vector<64x1xi1>
    %cst_17 = arith.constant 0.000000e+00 : f32
    %33 = vector.broadcast %cst_17 : f32 to vector<64x1xf32>
    %34 = arith.addf %20, %33 : vector<64x1xf32>
    %cst_18 = arith.constant 0.000000e+00 : f32
    %35 = vector.broadcast %cst_18 : f32 to vector<64x1xf32>
    %36 = arith.cmpf oge, %34, %35 : vector<64x1xf32>
    %cst_19 = arith.constant 0.000000e+00 : f32
    %37 = vector.broadcast %cst_19 : f32 to vector<64x1xf32>
    %38 = arith.addf %20, %37 : vector<64x1xf32>
    %cst_20 = arith.constant 8.000000e+00 : f32
    %39 = vector.broadcast %cst_20 : f32 to vector<64x1xf32>
    %40 = arith.cmpf olt, %38, %39 : vector<64x1xf32>
    %41 = arith.andi %36, %40 : vector<64x1xi1>
    %cst_21 = arith.constant 1.000000e+00 : f32
    %42 = vector.broadcast %cst_21 : f32 to vector<64x1xf32>
    %43 = arith.addf %20, %42 : vector<64x1xf32>
    %cst_22 = arith.constant 0.000000e+00 : f32
    %44 = vector.broadcast %cst_22 : f32 to vector<64x1xf32>
    %45 = arith.cmpf oge, %43, %44 : vector<64x1xf32>
    %cst_23 = arith.constant 1.000000e+00 : f32
    %46 = vector.broadcast %cst_23 : f32 to vector<64x1xf32>
    %47 = arith.addf %20, %46 : vector<64x1xf32>
    %cst_24 = arith.constant 8.000000e+00 : f32
    %48 = vector.broadcast %cst_24 : f32 to vector<64x1xf32>
    %49 = arith.cmpf olt, %47, %48 : vector<64x1xf32>
    %50 = arith.andi %45, %49 : vector<64x1xi1>
    %cst_25 = arith.constant -1.000000e+00 : f32
    %51 = vector.broadcast %cst_25 : f32 to vector<64x1xf32>
    %52 = arith.addf %23, %51 : vector<64x1xf32>
    %cst_26 = arith.constant 0.000000e+00 : f32
    %53 = vector.broadcast %cst_26 : f32 to vector<64x1xf32>
    %54 = arith.cmpf oge, %52, %53 : vector<64x1xf32>
    %cst_27 = arith.constant -1.000000e+00 : f32
    %55 = vector.broadcast %cst_27 : f32 to vector<64x1xf32>
    %56 = arith.addf %23, %55 : vector<64x1xf32>
    %cst_28 = arith.constant 8.000000e+00 : f32
    %57 = vector.broadcast %cst_28 : f32 to vector<64x1xf32>
    %58 = arith.cmpf olt, %56, %57 : vector<64x1xf32>
    %59 = arith.andi %54, %58 : vector<64x1xi1>
    %cst_29 = arith.constant 0.000000e+00 : f32
    %60 = vector.broadcast %cst_29 : f32 to vector<64x1xf32>
    %61 = arith.addf %23, %60 : vector<64x1xf32>
    %cst_30 = arith.constant 0.000000e+00 : f32
    %62 = vector.broadcast %cst_30 : f32 to vector<64x1xf32>
    %63 = arith.cmpf oge, %61, %62 : vector<64x1xf32>
    %cst_31 = arith.constant 0.000000e+00 : f32
    %64 = vector.broadcast %cst_31 : f32 to vector<64x1xf32>
    %65 = arith.addf %23, %64 : vector<64x1xf32>
    %cst_32 = arith.constant 8.000000e+00 : f32
    %66 = vector.broadcast %cst_32 : f32 to vector<64x1xf32>
    %67 = arith.cmpf olt, %65, %66 : vector<64x1xf32>
    %68 = arith.andi %63, %67 : vector<64x1xi1>
    %cst_33 = arith.constant 1.000000e+00 : f32
    %69 = vector.broadcast %cst_33 : f32 to vector<64x1xf32>
    %70 = arith.addf %23, %69 : vector<64x1xf32>
    %cst_34 = arith.constant 0.000000e+00 : f32
    %71 = vector.broadcast %cst_34 : f32 to vector<64x1xf32>
    %72 = arith.cmpf oge, %70, %71 : vector<64x1xf32>
    %cst_35 = arith.constant 1.000000e+00 : f32
    %73 = vector.broadcast %cst_35 : f32 to vector<64x1xf32>
    %74 = arith.addf %23, %73 : vector<64x1xf32>
    %cst_36 = arith.constant 8.000000e+00 : f32
    %75 = vector.broadcast %cst_36 : f32 to vector<64x1xf32>
    %76 = arith.cmpf olt, %74, %75 : vector<64x1xf32>
    %77 = arith.andi %72, %76 : vector<64x1xi1>
    %c7 = arith.constant 7 : index
    %c0_37 = arith.constant 0 : index
    %78 = vector.load %arg13[%c7, %c0_37] : memref<96x128xbf16, #tpu.memory_space<vmem>>, vector<64x128xbf16>
    %79 = arith.andi %32, %59 : vector<64x1xi1>
    %cst_38 = arith.constant 0.000000e+00 : bf16
    %80 = vector.broadcast %cst_38 : bf16 to vector<64x128xbf16>
    %81 = vector.shape_cast %79 : vector<64x1xi1> to vector<64x1xi1>
    %82 = vector.broadcast %81 : vector<64x1xi1> to vector<64x128xi1>
    %83 = arith.select %82, %78, %80 : vector<64x128xi1>, vector<64x128xbf16>
    %c0_39 = arith.constant 0 : index
    %c0_40 = arith.constant 0 : index
    %84 = vector.load %arg14[%c0_39, %c0_40] : memref<64x1152xbf16, #tpu.memory_space<vmem>>, vector<64x128xbf16>
    tpu.vector_store %arg14[%c0_39, %c0_40], %83 {strides = array<i32>} : memref<64x1152xbf16, #tpu.memory_space<vmem>>, vector<64x128xbf16>,
    %c8 = arith.constant 8 : index
    %c0_41 = arith.constant 0 : index
    %85 = vector.load %arg13[%c8, %c0_41] : memref<96x128xbf16, #tpu.memory_space<vmem>>, vector<64x128xbf16>
    %86 = arith.andi %32, %68 : vector<64x1xi1>
    %cst_42 = arith.constant 0.000000e+00 : bf16
    %87 = vector.broadcast %cst_42 : bf16 to vector<64x128xbf16>
    %88 = vector.shape_cast %86 : vector<64x1xi1> to vector<64x1xi1>
    %89 = vector.broadcast %88 : vector<64x1xi1> to vector<64x128xi1>
    %90 = arith.select %89, %85, %87 : vector<64x128xi1>, vector<64x128xbf16>
    %c0_43 = arith.constant 0 : index
    %c128 = arith.constant 128 : index
    %91 = vector.load %arg14[%c0_43, %c128] : memref<64x1152xbf16, #tpu.memory_space<vmem>>, vector<64x128xbf16>
    tpu.vector_store %arg14[%c0_43, %c128], %90 {strides = array<i32>} : memref<64x1152xbf16, #tpu.memory_space<vmem>>, vector<64x128xbf16>,
    %c9 = arith.constant 9 : index
    %c0_44 = arith.constant 0 : index
    %92 = vector.load %arg13[%c9, %c0_44] : memref<96x128xbf16, #tpu.memory_space<vmem>>, vector<64x128xbf16>
    %93 = arith.andi %32, %77 : vector<64x1xi1>
    %cst_45 = arith.constant 0.000000e+00 : bf16
    %94 = vector.broadcast %cst_45 : bf16 to vector<64x128xbf16>
    %95 = vector.shape_cast %93 : vector<64x1xi1> to vector<64x1xi1>
    %96 = vector.broadcast %95 : vector<64x1xi1> to vector<64x128xi1>
    %97 = arith.select %96, %92, %94 : vector<64x128xi1>, vector<64x128xbf16>
    %c0_46 = arith.constant 0 : index
    %c256 = arith.constant 256 : index
    %98 = vector.load %arg14[%c0_46, %c256] : memref<64x1152xbf16, #tpu.memory_space<vmem>>, vector<64x128xbf16>
    tpu.vector_store %arg14[%c0_46, %c256], %97 {strides = array<i32>} : memref<64x1152xbf16, #tpu.memory_space<vmem>>, vector<64x128xbf16>,
    %c15 = arith.constant 15 : index
    %c0_47 = arith.constant 0 : index
    %99 = vector.load %arg13[%c15, %c0_47] : memref<96x128xbf16, #tpu.memory_space<vmem>>, vector<64x128xbf16>
    %100 = arith.andi %41, %59 : vector<64x1xi1>
    %cst_48 = arith.constant 0.000000e+00 : bf16
    %101 = vector.broadcast %cst_48 : bf16 to vector<64x128xbf16>
    %102 = vector.shape_cast %100 : vector<64x1xi1> to vector<64x1xi1>
    %103 = vector.broadcast %102 : vector<64x1xi1> to vector<64x128xi1>
    %104 = arith.select %103, %99, %101 : vector<64x128xi1>, vector<64x128xbf16>
    %c0_49 = arith.constant 0 : index
    %c384 = arith.constant 384 : index
    %105 = vector.load %arg14[%c0_49, %c384] : memref<64x1152xbf16, #tpu.memory_space<vmem>>, vector<64x128xbf16>
    tpu.vector_store %arg14[%c0_49, %c384], %104 {strides = array<i32>} : memref<64x1152xbf16, #tpu.memory_space<vmem>>, vector<64x128xbf16>,
    %c16_50 = arith.constant 16 : index
    %c0_51 = arith.constant 0 : index
    %106 = vector.load %arg13[%c16_50, %c0_51] : memref<96x128xbf16, #tpu.memory_space<vmem>>, vector<64x128xbf16>
    %107 = arith.andi %41, %68 : vector<64x1xi1>
    %cst_52 = arith.constant 0.000000e+00 : bf16
    %108 = vector.broadcast %cst_52 : bf16 to vector<64x128xbf16>
    %109 = vector.shape_cast %107 : vector<64x1xi1> to vector<64x1xi1>
    %110 = vector.broadcast %109 : vector<64x1xi1> to vector<64x128xi1>
    %111 = arith.select %110, %106, %108 : vector<64x128xi1>, vector<64x128xbf16>
    %c0_53 = arith.constant 0 : index
    %c512 = arith.constant 512 : index
    %112 = vector.load %arg14[%c0_53, %c512] : memref<64x1152xbf16, #tpu.memory_space<vmem>>, vector<64x128xbf16>
    tpu.vector_store %arg14[%c0_53, %c512], %111 {strides = array<i32>} : memref<64x1152xbf16, #tpu.memory_space<vmem>>, vector<64x128xbf16>,
    %c17 = arith.constant 17 : index
    %c0_54 = arith.constant 0 : index
    %113 = vector.load %arg13[%c17, %c0_54] : memref<96x128xbf16, #tpu.memory_space<vmem>>, vector<64x128xbf16>
    %114 = arith.andi %41, %77 : vector<64x1xi1>
    %cst_55 = arith.constant 0.000000e+00 : bf16
    %115 = vector.broadcast %cst_55 : bf16 to vector<64x128xbf16>
    %116 = vector.shape_cast %114 : vector<64x1xi1> to vector<64x1xi1>
    %117 = vector.broadcast %116 : vector<64x1xi1> to vector<64x128xi1>
    %118 = arith.select %117, %113, %115 : vector<64x128xi1>, vector<64x128xbf16>
    %c0_56 = arith.constant 0 : index
    %c640 = arith.constant 640 : index
    %119 = vector.load %arg14[%c0_56, %c640] : memref<64x1152xbf16, #tpu.memory_space<vmem>>, vector<64x128xbf16>
    tpu.vector_store %arg14[%c0_56, %c640], %118 {strides = array<i32>} : memref<64x1152xbf16, #tpu.memory_space<vmem>>, vector<64x128xbf16>,
    %c23 = arith.constant 23 : index
    %c0_57 = arith.constant 0 : index
    %120 = vector.load %arg13[%c23, %c0_57] : memref<96x128xbf16, #tpu.memory_space<vmem>>, vector<64x128xbf16>
    %121 = arith.andi %50, %59 : vector<64x1xi1>
    %cst_58 = arith.constant 0.000000e+00 : bf16
    %122 = vector.broadcast %cst_58 : bf16 to vector<64x128xbf16>
    %123 = vector.shape_cast %121 : vector<64x1xi1> to vector<64x1xi1>
    %124 = vector.broadcast %123 : vector<64x1xi1> to vector<64x128xi1>
    %125 = arith.select %124, %120, %122 : vector<64x128xi1>, vector<64x128xbf16>
    %c0_59 = arith.constant 0 : index
    %c768 = arith.constant 768 : index
    %126 = vector.load %arg14[%c0_59, %c768] : memref<64x1152xbf16, #tpu.memory_space<vmem>>, vector<64x128xbf16>
    tpu.vector_store %arg14[%c0_59, %c768], %125 {strides = array<i32>} : memref<64x1152xbf16, #tpu.memory_space<vmem>>, vector<64x128xbf16>,
    %c24 = arith.constant 24 : index
    %c0_60 = arith.constant 0 : index
    %127 = vector.load %arg13[%c24, %c0_60] : memref<96x128xbf16, #tpu.memory_space<vmem>>, vector<64x128xbf16>
    %128 = arith.andi %50, %68 : vector<64x1xi1>
    %cst_61 = arith.constant 0.000000e+00 : bf16
    %129 = vector.broadcast %cst_61 : bf16 to vector<64x128xbf16>
    %130 = vector.shape_cast %128 : vector<64x1xi1> to vector<64x1xi1>
    %131 = vector.broadcast %130 : vector<64x1xi1> to vector<64x128xi1>
    %132 = arith.select %131, %127, %129 : vector<64x128xi1>, vector<64x128xbf16>
    %c0_62 = arith.constant 0 : index
    %c896 = arith.constant 896 : index
    %133 = vector.load %arg14[%c0_62, %c896] : memref<64x1152xbf16, #tpu.memory_space<vmem>>, vector<64x128xbf16>
    tpu.vector_store %arg14[%c0_62, %c896], %132 {strides = array<i32>} : memref<64x1152xbf16, #tpu.memory_space<vmem>>, vector<64x128xbf16>,
    %c25 = arith.constant 25 : index
    %c0_63 = arith.constant 0 : index
    %134 = vector.load %arg13[%c25, %c0_63] : memref<96x128xbf16, #tpu.memory_space<vmem>>, vector<64x128xbf16>
    %135 = arith.andi %50, %77 : vector<64x1xi1>
    %cst_64 = arith.constant 0.000000e+00 : bf16
    %136 = vector.broadcast %cst_64 : bf16 to vector<64x128xbf16>
    %137 = vector.shape_cast %135 : vector<64x1xi1> to vector<64x1xi1>
    %138 = vector.broadcast %137 : vector<64x1xi1> to vector<64x128xi1>
    %139 = arith.select %138, %134, %136 : vector<64x128xi1>, vector<64x128xbf16>
    %c0_65 = arith.constant 0 : index
    %c1024 = arith.constant 1024 : index
    %140 = vector.load %arg14[%c0_65, %c1024] : memref<64x1152xbf16, #tpu.memory_space<vmem>>, vector<64x128xbf16>
    tpu.vector_store %arg14[%c0_65, %c1024], %139 {strides = array<i32>} : memref<64x1152xbf16, #tpu.memory_space<vmem>>, vector<64x128xbf16>,
    %c0_66 = arith.constant 0 : index
    %c0_67 = arith.constant 0 : index
    %141 = vector.load %arg14[%c0_66, %c0_67] : memref<64x1152xbf16, #tpu.memory_space<vmem>>, vector<64x1152xbf16>
    %c0_68 = arith.constant 0 : index
    %c0_69 = arith.constant 0 : index
    %142 = vector.load %arg6[%c0_68, %c0_69] : memref<1152x128xbf16, #tpu.memory_space<vmem>>, vector<1152x128xbf16>
    %cst_70 = arith.constant dense<0.000000e+00> : vector<64x128xf32>
    %143 = tpu.matmul %141, %142, %cst_70 {dimension_numbers = #tpu.dot_dimension_numbers<[1], [0], [0], [1], [0, 0, 1, 1], [], []>} : vector<64x1152xbf16>, vector<1152x128xbf16>, vector<64x128xf32> -> vector<64x128xf32>
    %c0_71 = arith.constant 0 : index
    %c0_72 = arith.constant 0 : index
    %144 = vector.load %arg7[%c0_71, %c0_72] : memref<1x128xf32, #tpu.memory_space<vmem>>, vector<1x128xf32>
    %145 = vector.broadcast %144 : vector<1x128xf32> to vector<64x128xf32>
    %146 = arith.mulf %143, %145 : vector<64x128xf32>
    %c0_73 = arith.constant 0 : index
    %c0_74 = arith.constant 0 : index
    %147 = vector.load %arg8[%c0_73, %c0_74] : memref<1x128xf32, #tpu.memory_space<vmem>>, vector<1x128xf32>
    %148 = vector.broadcast %147 : vector<1x128xf32> to vector<64x128xf32>
    %149 = arith.addf %146, %148 : vector<64x128xf32>
    %c0_75 = arith.constant 0 : index
    %c0_76 = arith.constant 0 : index
    %c0_77 = arith.constant 0 : index
    %150 = vector.load %arg2[%c0_75, %c0_76, %c0_77] : memref<1x64x128xbf16, #tpu.memory_space<vmem>>, vector<1x64x128xbf16>
    %151 = vector.shape_cast %150 : vector<1x64x128xbf16> to vector<64x128xbf16>
    %c0_78 = arith.constant 0 : index
    %c0_79 = arith.constant 0 : index
    %152 = vector.load %arg9[%c0_78, %c0_79] : memref<128x128xbf16, #tpu.memory_space<vmem>>, vector<128x128xbf16>
    %cst_80 = arith.constant dense<0.000000e+00> : vector<64x128xf32>
    %153 = tpu.matmul %151, %152, %cst_80 {dimension_numbers = #tpu.dot_dimension_numbers<[1], [0], [0], [1], [0, 0, 1, 1], [], []>} : vector<64x128xbf16>, vector<128x128xbf16>, vector<64x128xf32> -> vector<64x128xf32>
    %c0_81 = arith.constant 0 : index
    %c0_82 = arith.constant 0 : index
    %154 = vector.load %arg10[%c0_81, %c0_82] : memref<1x128xf32, #tpu.memory_space<vmem>>, vector<1x128xf32>
    %155 = vector.broadcast %154 : vector<1x128xf32> to vector<64x128xf32>
    %156 = arith.mulf %153, %155 : vector<64x128xf32>
    %c0_83 = arith.constant 0 : index
    %c0_84 = arith.constant 0 : index
    %157 = vector.load %arg11[%c0_83, %c0_84] : memref<1x128xf32, #tpu.memory_space<vmem>>, vector<1x128xf32>
    %158 = vector.broadcast %157 : vector<1x128xf32> to vector<64x128xf32>
    %159 = arith.addf %156, %158 : vector<64x128xf32>
    %160 = arith.addf %149, %159 : vector<64x128xf32>
    %cst_85 = arith.constant 0.000000e+00 : f32
    %161 = vector.broadcast %cst_85 : f32 to vector<64x128xf32>
    %162 = arith.maximumf %160, %161 : vector<64x128xf32>
    %c0_86 = arith.constant 0 : index
    %c0_87 = arith.constant 0 : index
    %c0_88 = arith.constant 0 : index
    %163 = vector.load %arg12[%c0_86, %c0_87, %c0_88] : memref<1x64x128xf32, #tpu.memory_space<vmem>>, vector<1x64x128xf32>
    %164 = vector.shape_cast %163 : vector<1x64x128xf32> to vector<64x128xf32>
    %165 = vector.shape_cast %162 : vector<64x128xf32> to vector<1x64x128xf32>
    tpu.vector_store %arg12[%c0_86, %c0_87, %c0_88], %165 {strides = array<i32>} : memref<1x64x128xf32, #tpu.memory_space<vmem>>, vector<1x64x128xf32>,
    return
  }
  func.func @transform_0(%arg0: i32) -> (i32, i32, i32) {
    %c0_i32 = arith.constant 0 : i32
    %c0_i32_0 = arith.constant 0 : i32
    %c0_i32_1 = arith.constant 0 : i32
    return %arg0, %c0_i32, %c0_i32_0 : i32, i32, i32
  }
  func.func @transform_1(%arg0: i32) -> (i32, i32, i32) {
    %c0_i32 = arith.constant 0 : i32
    %c0_i32_0 = arith.constant 0 : i32
    %c0_i32_1 = arith.constant 0 : i32
    return %arg0, %c0_i32, %c0_i32_0 : i32, i32, i32
  }
  func.func @transform_2(%arg0: i32) -> (i32, i32) {
    %c0_i32 = arith.constant 0 : i32
    %c0_i32_0 = arith.constant 0 : i32
    %c0_i32_1 = arith.constant 0 : i32
    return %c0_i32, %c0_i32_0 : i32, i32
  }
  func.func @transform_3(%arg0: i32) -> (i32, i32) {
    %c0_i32 = arith.constant 0 : i32
    %c0_i32_0 = arith.constant 0 : i32
    %c0_i32_1 = arith.constant 0 : i32
    return %c0_i32, %c0_i32_0 : i32, i32
  }
  func.func @transform_4(%arg0: i32) -> (i32, i32) {
    %c0_i32 = arith.constant 0 : i32
    %c0_i32_0 = arith.constant 0 : i32
    %c0_i32_1 = arith.constant 0 : i32
    return %c0_i32, %c0_i32_0 : i32, i32
  }
  func.func @transform_5(%arg0: i32) -> (i32, i32) {
    %c0_i32 = arith.constant 0 : i32
    %c0_i32_0 = arith.constant 0 : i32
    %c0_i32_1 = arith.constant 0 : i32
    return %c0_i32, %c0_i32_0 : i32, i32
  }
  func.func @transform_6(%arg0: i32) -> (i32, i32) {
    %c0_i32 = arith.constant 0 : i32
    %c0_i32_0 = arith.constant 0 : i32
    %c0_i32_1 = arith.constant 0 : i32
    return %c0_i32, %c0_i32_0 : i32, i32
  }
  func.func @transform_7(%arg0: i32) -> (i32, i32) {
    %c0_i32 = arith.constant 0 : i32
    %c0_i32_0 = arith.constant 0 : i32
    %c0_i32_1 = arith.constant 0 : i32
    return %c0_i32, %c0_i32_0 : i32, i32
  }
  func.func @transform_8(%arg0: i32) -> (i32, i32) {
    %c0_i32 = arith.constant 0 : i32
    %c0_i32_0 = arith.constant 0 : i32
    %c0_i32_1 = arith.constant 0 : i32
    return %c0_i32, %c0_i32_0 : i32, i32
  }
  func.func @transform_9(%arg0: i32) -> (i32, i32) {
    %c0_i32 = arith.constant 0 : i32
    %c0_i32_0 = arith.constant 0 : i32
    %c0_i32_1 = arith.constant 0 : i32
    return %c0_i32, %c0_i32_0 : i32, i32
  }
  func.func @transform_10(%arg0: i32) -> (i32, i32) {
    %c0_i32 = arith.constant 0 : i32
    %c0_i32_0 = arith.constant 0 : i32
    %c0_i32_1 = arith.constant 0 : i32
    return %c0_i32, %c0_i32_0 : i32, i32
  }
  func.func @transform_11(%arg0: i32) -> (i32, i32, i32) {
    %c0_i32 = arith.constant 0 : i32
    %c0_i32_0 = arith.constant 0 : i32
    %c0_i32_1 = arith.constant 0 : i32
    return %arg0, %c0_i32, %c0_i32_0 : i32, i32, i32
  }
}

</mosaic_0001>

<bundles_post_ra>
// kernel: tpu_custom_call.1
= control target key start
LH: loop header
LB: loop body
LE: loop exit
PB: predicated region body
PF: predicated region fallthrough
CT: control target
= control target key end

     0   :  { %s8339_s0 = inlined_call_operand.hbm [shape: bf16[2,64,128], index: 0, kind: input, shape index: {}]   ;;  %s8340_s1 = inlined_call_operand.hbm [shape: bf16[2,64,128], index: 1, kind: input, shape index: {}]   ;;  %s8341_s2 = inlined_call_operand.hbm [shape: bf16[128,128], index: 2, kind: input, shape index: {}]   ;;  %s8342_s3 = inlined_call_operand.vmem [shape: f32[1,128], index: 3, kind: input, shape index: {}]   ;;  %s8343_s4 = inlined_call_operand.vmem [shape: f32[1,128], index: 4, kind: input, shape index: {}]   ;;  %s8344_s5 = inlined_call_operand.hbm [shape: bf16[1152,128], index: 5, kind: input, shape index: {}]   ;;  %s8345_s6 = inlined_call_operand.vmem [shape: f32[1,128], index: 6, kind: input, shape index: {}]   ;;  %s8346_s7 = inlined_call_operand.vmem [shape: f32[1,128], index: 7, kind: input, shape index: {}]   ;;  %s8347_s8 = inlined_call_operand.hbm [shape: bf16[128,128], index: 8, kind: input, shape index: {}]   ;;  %s8348_s9 = inlined_call_operand.vmem [shape: f32[1,128], index: 9, kind: input, shape index: {}]   ;;  %s8349_s10 = inlined_call_operand.vmem [shape: f32[1,128], index: 10, kind: input, shape index: {}]   ;;  %s8350_s11 = inlined_call_operand.hbm [shape: f32[2,64,128], index: 11, kind: output, shape index: {}]  }
   0x1   :  { %8613 = sst [smem:[#allocation111_spill]] %s8339_s0 }
   0x2   :  { %8614 = sst [smem:[#allocation112_spill]] %s8341_s2 }
   0x3   :  { %8615 = sst [smem:[#allocation113_spill]] %s8344_s5 }
   0x4   :  { %8616 = sst [smem:[#allocation114_spill]] %s8347_s8 }
   0x5   :  { %8617 = sst [smem:[#allocation115_spill]] %s8350_s11 }
   0x6   :  { %16 = vsyncpa [#allocation5], 0 }
   0x7   :  { %18 = vsyncpa [#allocation5 + $0x1], 0 }
   0x8   :  { %19 = vsyncpa [#allocation8], 0 }
   0x9   :  { %21 = vsyncpa [#allocation8 + $0x1], 0 }
   0xa   :  { %22 = vsyncpa [#allocation11], 0 }
   0xb   :  { %23 = vsyncpa [#allocation6], 0 }
   0xc   :  { %25 = vsyncpa [#allocation6 + $0x1], 0  ;;  %s5093_s17 = smov 0   ;;  %s5095_s18 = smov 0  }
   0xd   :  { %s5097_s19 = smov 0   ;;  %s5099_s20 = smov 0  }
   0xe LB: > { %8618 = sst [smem:[#allocation19_spill]] %s5008_s17  ;;  %s5114_s21 = sadd.s32 4294967295, %s5020_s20   ;;  %s5020_s20 = sphi %s5099_s20, %s9467_s20   ;;  %s5016_s19 = sphi %s5097_s19, %s9469_s19   ;;  %s5012_s18 = sphi %s5095_s18, %s9471_s18   ;;  %s5008_s17 = sphi %s5093_s17, %s9470_s17  }
   0xf   : > { %8619 = sst [smem:[#allocation20_spill]] %s5016_s19  ;;  %s4089_s22 = sadd.s32 4294967294, %s5020_s20  }
  0x10   : > { %p51_p0 = scmp.ne.s32.totalorder %s5012_s18, %s5008_s17  ;;  %p8351_p1 = scmp.eq.s32.totalorder %s5114_s21, 0 }
  0x11   : > { %p290_p2 = scmp.eq.s32.totalorder %s5114_s21, 1  ;;  %p296_p3 = scmp.eq.s32.totalorder %s4089_s22, 1 }
  0x12   : > { %p5123_p4 = por %p8351_p1, %p51_p0  ;;  %p4090_p5 = scmp.ge.s32.totalorder %s5020_s20, 1 }
  0x13   : > { %p5128_p6 = por %p296_p3, %p51_p0  ;;  %p303_p7 = scmp.lt.s32.totalorder %s5020_s20, 3 }
  0x14   : > { %s8620_s23 = scalar_select %p5123_p4, 1, 0 }
  0x15   : > { %s8621_s24 = scalar_select %p5128_p6, 1, 0 }
  0x16   : > { %p5133_p8 = pnand %p4090_p5, %p303_p7  ;;  %s5022_s26 = smov [#allocation9]  }
  0x17   : > { %8622 = sst [smem:[#allocation21_spill]] %s8621_s24  ;;  %s315_s27 = sshll.u32 %s5022_s26, 4  ;;  %s316_s27 = int_to_ptr.vmem [resolvable:$true] %s315_s27 }
  0x18   : > { %p4599_p9 = pneg %p5133_p8  ;;  %s5023_s29 = smov [#allocation10]  }
  0x19   : > { %s334_s30 = sshll.u32 %s5023_s29, 4  ;;  %s5024_s12 = smov [#allocation12]   ;;  %s335_s30 = int_to_ptr.vmem [resolvable:$true] %s334_s30 }
  0x1a   : > { %p5142_p11 = pnand %p4599_p9, %p8351_p1  ;;  %s353_s13 = sshll.u32 %s5024_s12, 4  ;;  %s354_s13 = int_to_ptr.vmem [resolvable:$true] %s353_s13 }
  0x1b   : > { %s4821_s14 = scalar_lea.vmem %s316_s27, 1024  ;;  %p4829_p5 = scmp.lt.s32.totalorder %s316_s27, %s316_s27 }
  0x1c   : > { %p4812_p12 = pneg %p5142_p11  ;;  %p4822_p13 = scmp.ne.s32.totalorder %s316_s27, %s4821_s14 }
  0x1d   : > { %p4830_p7 = scmp.lt.s32.totalorder %s4821_s14, %s4821_s14 }
  0x1e   : > { %p4824_p0 = pnand %p4822_p13, %p4812_p12 }
  0x1f   : > { %p4831_p9 = por %p4830_p7, %p4829_p5 }
  0x20   : > { %p4825_p3 = pneg %p4824_p0 }
  0x22   : > { %p4832_p10 = pnand %p4831_p9, %p4825_p3 }
  0x24   : > { %4835 = shalt.err (!%p4832_p10)
}
  0x25   : > { %s8352_s15 = smov 64   ;;  %s8354_s16 = smov 4  }
  0x26   : > { %s8625_s2 = sld [smem:[#allocation112_spill]]  ;;  %s4847_s29 = scalar_lea.vmem %s335_s30, 9216 }
  0x27   : > { %p4848_p13 = scmp.ne.s32.totalorder %s335_s30, %s4847_s29  ;;  %p4855_p3 = scmp.lt.s32.totalorder %s335_s30, %s335_s30 }
  0x28   : > { %p4856_p10 = scmp.lt.s32.totalorder %s4847_s29, %s4847_s29 }
  0x29   : > { %p4850_p0 = pnand %p4848_p13, %p4812_p12 }
  0x2a   : > { %p4857_p7 = por %p4856_p10, %p4855_p3 }
  0x2b   : > { %p4851_p5 = pneg %p4850_p0 }
  0x2c   : > { %4602 = dma.hbm_to_vmem [thread:$0]  (!%p5142_p11), %s8625_s2, 1024, %s316_s27, [#allocation8], %s8352_s15, %s8352_s15, %s8354_s16  }
  0x2d   : > { %p4858_p9 = pnand %p4857_p7, %p4851_p5 }
  0x2f   : > { %4861 = shalt.err (!%p4858_p9)
}
  0x30   : > { %s8626_s5 = sld [smem:[#allocation113_spill]]  ;;  %s4873_s27 = scalar_lea.vmem %s354_s13, 1024 }
  0x31   : > { %p4874_p1 = scmp.ne.s32.totalorder %s354_s13, %s4873_s27  ;;  %p4881_p3 = scmp.lt.s32.totalorder %s354_s13, %s354_s13 }
  0x32   : > { %p4882_p5 = scmp.lt.s32.totalorder %s4873_s27, %s4873_s27 }
  0x33   : > { %p4876_p13 = pnand %p4874_p1, %p4812_p12 }
  0x34   : > { %p4883_p10 = por %p4882_p5, %p4881_p3 }
  0x35   : > { %p4877_p0 = pneg %p4876_p13 }
  0x36   : > { %4605 = dma.hbm_to_vmem [thread:$0]  (!%p5142_p11), %s8626_s5, 9216, %s335_s30, [#allocation11], %s8352_s15, %s8352_s15, %s8354_s16  }
  0x37   : > { %p4884_p7 = pnand %p4883_p10, %p4877_p0 }
  0x39   : > { %4887 = shalt.err (!%p4884_p7)
}
  0x3a   : > { %s8627_s8 = sld [smem:[#allocation114_spill]]  ;;  %s5182_s30 = sadd.s32 1, %s5020_s20  }
  0x3b   : > { %8628 = sst [smem:[#allocation22_spill]] %s5182_s30  ;;  %s35_s28 = ssub.s32 %s5020_s20, %s5182_s30 }
  0x3c   : > { %s38_s29 = sadd.s32 1, %s5016_s19  ;;  %p36_p1 = scmp.eq.s32.totalorder %s35_s28, 0 }
  0x3d   : > { %p45_p12 = scmp.ne.s32.totalorder %s5016_s19, %s5012_s18  ;;  %p46_p9 = scmp.eq.s32.totalorder %s5020_s20, 0 }
  0x3e   : > { %p4623_p13 = scmp.lt.s32.totalorder %s5020_s20, 2  ;;  %s373_s27 = sand.u32 1, %s5016_s19  }
  0x3f   : > { %s5192_s12 = scalar_select %p36_p1, %s5016_s19, %s38_s29  }
  0x40   : > { %4608 = dma.hbm_to_vmem [thread:$0]  (!%p5142_p11), %s8627_s8, 1024, %s354_s13, [#allocation11], %s8352_s15, %s8352_s15, %s8354_s16  }
  0x41   : > { %8629 = sst [smem:[#allocation23_spill]] %s5192_s12  ;;  %p47_p0 = por %p46_p9, %p45_p12 }
  0x42   : > { %p5196_p3 = por %p290_p2, %p45_p12  ;;  %s4262_s22 = sshll.u32 %s5020_s20, 9 }
  0x43   : > { %s5202_s13 = sshll.u32 %s373_s27, 5  ;;  %s8631_s0 = sld [smem:[#allocation111_spill]] }
  0x44   : > { %s8630_s14 = scalar_select %p5196_p3, 1, 0 }
  0x45   : > { %s377_s29 = scalar_lea.vmem [#allocation4], %s5202_s13  ;;  %p5210_p11 = pnand %p4623_p13, %p47_p0 }
  0x46   : > { %s384_s16 = sshll.u32 %s377_s29, 4  ;;  %s5219_s15 = scalar_lea.hbm %s8340_s1, %s4262_s22  ;;  %s5214_s16 = int_to_ptr.vmem [resolvable:$true] %s384_s16 }
  0x47   : > { %s5221_s26 = scalar_lea.sflag [#allocation5], %s373_s27  ;;  %p4890_p5 = pneg %p5210_p11 }
  0x49   : > { %s5207_s28 = scalar_lea.hbm %s8631_s0, %s4262_s22  ;;  %s4893_s30 = scalar_lea.hbm %s8631_s0, 1024 }
  0x4a   : > { %s4888_s12 = scalar_lea.hbm %s5207_s28, 512  ;;  %p4894_p1 = scmp.lt.s32.totalorder %s5207_s28, %s8631_s0 }
  0x4b   : > { %p4889_p2 = scmp.ne.s32.totalorder %s5207_s28, %s4888_s12  ;;  %p4895_p12 = scmp.lt.s32.totalorder %s4893_s30, %s4888_s12 }
  0x4d   : > { %p4891_p10 = pnand %p4890_p5, %p4889_p2  ;;  %p4896_p9 = por %p4895_p12, %p4894_p1 }
  0x4f   : > { %p4892_p7 = pneg %p4891_p10 }
  0x51   : > { %p4897_p13 = pnand %p4896_p9, %p4892_p7 }
  0x53   : > { %4900 = shalt.err (!%p4897_p13)
}
  0x54   : > { %s4901_s5 = scalar_lea.vmem %s5214_s16, 512  ;;  %s5027_s8 = smov [#allocation4]  }
  0x55   : > { %p4902_p0 = scmp.ne.s32.totalorder %s5214_s16, %s4901_s5  ;;  %s4906_s19 = sshll.u32 %s5027_s8, 4  ;;  %s4907_s19 = int_to_ptr.vmem [resolvable:$false] %s4906_s19 }
  0x56   : > { %s4908_s27 = scalar_lea.vmem %s4907_s19, 1024  ;;  %p4909_p6 = scmp.lt.s32.totalorder %s5214_s16, %s4907_s19 }
  0x57   : > { %p4904_p2 = pnand %p4902_p0, %p4890_p5  ;;  %p4910_p3 = scmp.lt.s32.totalorder %s4908_s27, %s4901_s5 }
  0x59   : > { %p4905_p10 = pneg %p4904_p2  ;;  %p4911_p4 = por %p4910_p3, %p4909_p6 }
  0x5b   : > { %p4912_p1 = pnand %p4911_p4, %p4905_p10 }
  0x5d   : > { %4915 = shalt.err (!%p4912_p1)
}
  0x5e   : > { %s8633_s17 = smov 4   ;;  %s8634_s24 = smov 64  }
  0x5f   : > { %4612 = dma.hbm_to_vmem [thread:$0]  (!%p5210_p11), %s5207_s28, 512, %s5214_s16, %s5221_s26, %s8634_s24, %s8634_s24, %s8633_s17  }
  0x60   : > { %s398_s30 = scalar_lea.vmem [#allocation7], %s5202_s13  ;;  %s394_s22 = sand.u32 1, %s5020_s20  }
  0x61   : > { %s405_s12 = sshll.u32 %s398_s30, 4  ;;  %s395_s29 = scalar_lea.sflag [#allocation8], %s394_s22  ;;  %s5253_s12 = int_to_ptr.vmem [resolvable:$true] %s405_s12 }
  0x62   : > { %s4916_s5 = scalar_lea.hbm %s5219_s15, 512  ;;  %s4921_s27 = scalar_lea.hbm %s8340_s1, 1024 }
  0x63   : > { %p4917_p4 = scmp.ne.s32.totalorder %s5219_s15, %s4916_s5  ;;  %p4922_p7 = scmp.lt.s32.totalorder %s5219_s15, %s8340_s1 }
  0x64   : > { %p4923_p12 = scmp.lt.s32.totalorder %s4921_s27, %s4916_s5 }
  0x65   : > { %p4919_p6 = pnand %p4917_p4, %p4890_p5 }
  0x66   : > { %p4924_p9 = por %p4923_p12, %p4922_p7 }
  0x67   : > { %p4920_p3 = pneg %p4919_p6 }
  0x69   : > { %p4925_p13 = pnand %p4924_p9, %p4920_p3 }
  0x6b   : > { %4928 = shalt.err (!%p4925_p13)
}
  0x6c   : > { %s4929_s16 = scalar_lea.vmem %s5253_s12, 512  ;;  %s5028_s13 = smov [#allocation7]  }
  0x6d   : > { %p4930_p0 = scmp.ne.s32.totalorder %s5253_s12, %s4929_s16  ;;  %s4934_s28 = sshll.u32 %s5028_s13, 4  ;;  %s4935_s28 = int_to_ptr.vmem [resolvable:$false] %s4934_s28 }
  0x6e   : > { %s4936_s26 = scalar_lea.vmem %s4935_s28, 1024  ;;  %p4937_p1 = scmp.lt.s32.totalorder %s5253_s12, %s4935_s28 }
  0x6f   : > { %p4932_p2 = pnand %p4930_p0, %p4890_p5  ;;  %p4938_p4 = scmp.lt.s32.totalorder %s4936_s26, %s4929_s16 }
  0x71   : > { %p4933_p10 = pneg %p4932_p2  ;;  %p4939_p6 = por %p4938_p4, %p4937_p1 }
  0x73   : > { %p4940_p7 = pnand %p4939_p6, %p4933_p10 }
  0x75   : > { %4943 = shalt.err (!%p4940_p7)
}
  0x76   : > { %4615 = dma.hbm_to_vmem [thread:$0]  (!%p5210_p11), %s5219_s15, 512, %s5253_s12, %s395_s29, %s8634_s24, %s8634_s24, %s8633_s17  }
  0x77   : > { %417 = sbr.rel (%p5133_p8) target bundleno = 835 (0x343), region = 64 }
  0x7c   : > { %s5283_s0 = sand.u32 1, %s5012_s18   ;;  %p8635_p5 = scmp.ne.s32.totalorder %s8620_s23, 0 }
  0x7d   : > { %s4102_s11 = sshll.u32 %s5283_s0, 5  ;;  %s420_s30 = scalar_lea.sflag [#allocation5], %s5283_s0 }
  0x7e   : > { %s5287_s22 = scalar_lea.vmem [#allocation4], %s4102_s11 }
  0x7f   : > { %4987 = dma.done.wait (%p8635_p5), %s420_s30, 512  }
  0x80   : > { %4989 = vsyncadd (%p8635_p5), %s420_s30, 4294966784  ;;  %s428_s2 = sand.u32 1, %s5114_s21   ;;  %s5294_s15 = scalar_lea.vmem [#allocation7], %s4102_s11 }
  0x81   : > { %s429_s25 = scalar_lea.sflag [#allocation8], %s428_s2 }
  0x82   : > { %4991 = dma.done.wait (%p8635_p5), %s429_s25, 512  }
  0x83   : > { %4993 = vsyncadd (%p8635_p5), %s429_s25, 4294966784  ;;  %p8636_p8 = scmp.eq.s32.totalorder %s5114_s21, 0 }
  0x85   : > { %4995 = dma.done.wait (%p8636_p8), [#allocation8], 1024   ;;  %p8637_p11 = pmov %p8636_p8 }
  0x86   : > { %p8638_p3 = pmov %p8636_p8 }
  0x87   : > { %4997 = vsyncadd (%p8637_p11), [#allocation8], 4294966272 }
  0x88   : > { %4999 = dma.done.wait (%p8638_p3), [#allocation11], 10240   ;;  %p8639_p12 = pmov %p8638_p3 }
  0x89   : > { %v4668_v0 = vld [vmem:[#allocation9 + $0x38] sm:$0xff]   ;;  %v4669_v1 = vld [vmem:[#allocation9 + $0x30] sm:$0xff]   ;;  %v4670_v2 = vld [vmem:[#allocation9 + $0x28] sm:$0xff]   ;;  %v730_v12 = vlaneseq  ;;  %v8644_v62 = vmov 0  ;;  %s4107_s26 = sshll.u32 %s5283_s0, 6  ;;  %s4272_s30 = sshll.u32 %s5114_s21, 10 }
  0x8a   : > { %5001 = vsyncadd (%p8639_p12), [#allocation11], 4294957056  ;;  %4493 = vmatprep.subr.bf16.mxu0 %v4668_v0  ;;  %v4671_v3 = vld [vmem:[#allocation9 + $0x20] sm:$0xff]   ;;  %v4672_v5 = vld [vmem:[#allocation9 + $0x18] sm:$0xff]   ;;  %s8247_s11 = scalar_lea.vmem [#allocation13], %s4107_s26  ;;  %s3952_s17 = scalar_lea.sflag [#allocation6], %s5283_s0 }
  0x8b   : > { %4494 = vmatpush3.bf16.msra.mxu0 %v4668_v0  ;;  %v4676_v4 = vld [vmem:[%s5287_s22] sm:$0xff]   ;;  %v4673_v6 = vld [vmem:[#allocation9 + $0x10] sm:$0xff]   ;;  %v4674_v7 = vld [vmem:[#allocation9 + $0x8] sm:$0xff]   ;;  %v5312_v13 = vshrl.u32 %v730_v12, 7  ;;  %p9462_p13 = scmp.ne.s32.totalorder %s8630_s14, 0  ;;  %s5030_s21 = smov [#allocation13]  }
  0x8c   : > { %4495 = vmatprep.subr.bf16.mxu0 %v4669_v1  ;;  %4509 = vmatprep.mubr.bf16.mxu0 %v4676_v4  ;;  %v4675_v8 = vld [vmem:[#allocation9] sm:$0xff]   ;;  %v4677_v9 = vld [vmem:[%s5287_s22 + $0x8] sm:$0xff]   ;;  %v4678_v10 = vld [vmem:[%s5287_s22 + $0x10] sm:$0xff]   ;;  %s4948_s12 = sshll.u32 %s5030_s21, 4  ;;  %s4949_s12 = int_to_ptr.vmem [resolvable:$false] %s4948_s12 }
  0x8d   : > { %v4679_v11 = vld [vmem:[%s5287_s22 + $0x18] sm:$0xff]   ;;  %v734_v14 = vadd.s32 24, %v5312_v13  ;;  %v735_v15 = vadd.s32 32, %v5312_v13  ;;  %v736_v16 = vadd.s32 40, %v5312_v13  ;;  %v733_v18 = vadd.s32 16, %v5312_v13  ;;  %v4683_v0 = vld [vmem:[#allocation10 + $0x70] sm:$0xff]  }
  0x8e   : > { %v5319_v24 = vadd.s32 8, %v5312_v13  ;;  %v739_v36 = vcvt.s32.f32 %v5312_v13  ;;  %v4680_v42 = vld [vmem:[#allocation10 + $0x78] sm:$0xff]   ;;  %s3965_s22 = sshll.u32 %s8247_s11, 4  ;;  %s4950_s29 = scalar_lea.vmem %s4949_s12, 2048  ;;  %s8294_s22 = int_to_ptr.vmem [resolvable:$true] %s3965_s22 }
  0x8f   : > { %4496 = vmatpush3.bf16.msra.mxu0 %v4669_v1  ;;  %v742_v17 = vcvt.s32.f32 %v734_v14  ;;  %v743_v19 = vcvt.s32.f32 %v735_v15  ;;  %v744_v20 = vcvt.s32.f32 %v736_v16  ;;  %v741_v22 = vcvt.s32.f32 %v733_v18  ;;  %v4681_v45 = vld [vmem:[#allocation10 + $0x38] sm:$0xff]   ;;  %4309 = vmatprep.subr.bf16.mxu1 %v4680_v42  ;;  %s4944_s24 = scalar_lea.vmem %s8294_s22, 1024  ;;  %p4951_p10 = scmp.lt.s32.totalorder %s8294_s22, %s4949_s12 }
  0x90   : > { %4497 = vmatprep.subr.bf16.mxu0 %v4670_v2  ;;  %v740_v29 = vcvt.s32.f32 %v5319_v24  ;;  %v747_v43 = vadd.f32 0.5, %v739_v36  ;;  %4310 = vmatpush3.bf16.msra.mxu1 %v4681_v45  ;;  %v4682_v61 = vld [vmem:[#allocation10 + $0xf8] sm:$0xff]   ;;  %v8668_v14 = vmov 0  ;;  %v8670_v15 = vmov 0  ;;  %p4945_p9 = scmp.ne.s32.totalorder %s8294_s22, %s4944_s24  ;;  %p4952_p1 = scmp.lt.s32.totalorder %s4950_s29, %s4944_s24 }
  0x91   : > { %v750_v21 = vadd.f32 0.5, %v742_v17  ;;  %v751_v23 = vadd.f32 0.5, %v743_v19  ;;  %v752_v25 = vadd.f32 0.5, %v744_v20  ;;  %v749_v27 = vadd.f32 0.5, %v741_v22  ;;  %v4684_v1 = vld [vmem:[#allocation10 + $0xb8] sm:$0xff]   ;;  %4311 = vmatprep.subr.bf16.mxu1 %v4683_v0 }
  0x92   : > { %v748_v34 = vadd.f32 0.5, %v740_v29  ;;  %v755_v54 = vmul.f32 0.125, %v747_v43  ;;  %v8675_v16 = vmov 0  ;;  %v8680_v18 = vmov 0  ;;  %p4946_p0 = pnand %p4945_p9, %p9462_p13  ;;  %p4953_p4 = por %p4952_p1, %p4951_p10 }
  0x93   : > { %4498 = vmatpush3.bf16.msra.mxu0 %v4670_v2  ;;  %v758_v26 = vmul.f32 0.125, %v750_v21  ;;  %v759_v28 = vmul.f32 0.125, %v751_v23  ;;  %v760_v30 = vmul.f32 0.125, %v752_v25  ;;  %v757_v32 = vmul.f32 0.125, %v749_v27 }
  0x94   : > { %4499 = vmatprep.subr.bf16.mxu0 %v4671_v3  ;;  %v756_v40 = vmul.f32 0.125, %v748_v34  ;;  %v8647_v2 = vmov 0  ;;  %v8688_v23 = vmov 0  ;;  %v8701_v34 = vmov 0  ;;  %p4947_p2 = pneg %p4946_p0 }
  0x95   : > { %v5322_v31 = vfloor.f32 %v758_v26  ;;  %v5324_v33 = vfloor.f32 %v759_v28  ;;  %v5326_v35 = vfloor.f32 %v760_v30  ;;  %v5330_v38 = vfloor.f32 %v757_v32 }
  0x96   : > { %v5342_v49 = vfloor.f32 %v756_v40  ;;  %v8698_v30 = vmov 0  ;;  %v8409_v42 = vmov 0   ;;  %v8712_v45 = vmov 0  ;;  %p4954_p6 = pnand %p4953_p4, %p4947_p2 }
  0x97   : > { %4500 = vmatpush3.bf16.msra.mxu0 %v4671_v3  ;;  %v774_v37 = vmul.f32 8.0, %v5322_v31  ;;  %v775_v39 = vmul.f32 8.0, %v5324_v33  ;;  %v776_v41 = vmul.f32 8.0, %v5326_v35  ;;  %v773_v46 = vmul.f32 8.0, %v5330_v38 }
  0x98   : > { %4501 = vmatprep.subr.bf16.mxu0 %v4672_v5  ;;  %v790_v48 = vadd.f32 -1.0, %v5322_v31  ;;  %v791_v51 = vadd.f32 -1.0, %v5324_v33  ;;  %v789_v52 = vadd.f32 -1.0, %v5330_v38  ;;  %v792_v53 = vadd.f32 -1.0, %v5326_v35 }
  0x99   : > { %v5336_v44 = vsub.f32 %v742_v17, %v774_v37  ;;  %v5339_v47 = vsub.f32 %v743_v19, %v775_v39  ;;  %v5344_v50 = vsub.f32 %v744_v20, %v776_v41  ;;  %v5350_v56 = vsub.f32 %v741_v22, %v773_v46  ;;  %v4685_v41 = vld [vmem:[#allocation10 + $0x30] sm:$0xff]  }
  0x9a   : > { %vm798_vm0 = vcmp.ge.f32.partialorder %v790_v48, 0.0  ;;  %vm806_vm1 = vcmp.lt.f32.partialorder %v790_v48, 8.0  ;;  %v772_v58 = vmul.f32 8.0, %v5342_v49  ;;  %vm799_vm2 = vcmp.ge.f32.partialorder %v791_v51, 0.0  ;;  %4312 = vmatpush3.bf16.msra.mxu1 %v4685_v41 }
  0x9b   : > { %4502 = vmatpush3.bf16.msra.mxu0 %v4672_v5  ;;  %8640 = vst [vmem:[#allocation24_spill] sm:$0xff] %v5336_v44  ;;  %8641 = vst [vmem:[#allocation25_spill] sm:$0xff] %v5339_v47  ;;  %v886_v55 = vadd.f32 -1.0, %v5336_v44  ;;  %v887_v57 = vadd.f32 -1.0, %v5339_v47  ;;  %vm807_vm3 = vcmp.lt.f32.partialorder %v791_v51, 8.0  ;;  %v888_v59 = vadd.f32 -1.0, %v5344_v50 }
  0x9c   : > { %4503 = vmatprep.subr.bf16.mxu0 %v4673_v6  ;;  %8642 = vst [vmem:[#allocation26_spill] sm:$0xff] %v5344_v50  ;;  %8643 = vst [vmem:[#allocation27_spill] sm:$0xff] %v5350_v56  ;;  %vm797_vm4 = vcmp.ge.f32.partialorder %v789_v52, 0.0  ;;  %vm800_vm5 = vcmp.ge.f32.partialorder %v792_v53, 0.0  ;;  %vm808_vm6 = vcmp.lt.f32.partialorder %v792_v53, 8.0  ;;  %v949_v60 = vadd.f32 1.0, %v5350_v56 }
  0x9d   : > { %vm805_vm7 = vcmp.lt.f32.partialorder %v789_v52, 8.0  ;;  %vm5356_vm8 = vmand %vm798_vm0, %vm806_vm1  ;;  %vm894_vm9 = vcmp.ge.f32.partialorder %v886_v55, 0.0  ;;  %vm902_vm10 = vcmp.lt.f32.partialorder %v886_v55, 8.0  ;;  %v950_v63 = vadd.f32 1.0, %v5336_v44 }
  0x9e   : > { %v8645_v62 = vsel %vm5356_vm8, 4294967295, %v8644_v62  ;;  %vm5362_vm11 = vmand %vm799_vm2, %vm807_vm3  ;;  %v885_v3 = vadd.f32 -1.0, %v5350_v56  ;;  %vm895_vm12 = vcmp.ge.f32.partialorder %v887_v57, 0.0  ;;  %vm903_vm13 = vcmp.lt.f32.partialorder %v887_v57, 8.0 }
  0x9f   : > { %4504 = vmatpush3.bf16.msra.mxu0 %v4673_v6  ;;  %8646 = vst [vmem:[#allocation28_spill] sm:$0xff] %v8645_v62  ;;  %v8648_v2 = vsel %vm5362_vm11, 4294967295, %v8647_v2  ;;  %v951_v4 = vadd.f32 1.0, %v5339_v47  ;;  %vm5370_vm14 = vmand %vm800_vm5, %vm808_vm6  ;;  %v8650_v5 = vmov 0  ;;  %v5374_v6 = vfloor.f32 %v755_v54  ;;  %v4686_v54 = vld [vmem:[#allocation10 + $0xf0] sm:$0xff]   ;;  %v4700_v47 = vld [vmem:[#allocation10 + $0x98] sm:$0xff]  }
  0xa0   : > { %4505 = vmatprep.subr.bf16.mxu0 %v4674_v7  ;;  %8649 = vst [vmem:[#allocation29_spill] sm:$0xff] %v8648_v2  ;;  %v8651_v5 = vsel %vm5370_vm14, 4294967295, %v8650_v5  ;;  %vm5380_vm1 = vmand %vm797_vm4, %vm805_vm7  ;;  %vm965_vm5 = vcmp.lt.f32.partialorder %v949_v60, 8.0  ;;  %vm958_vm4 = vcmp.ge.f32.partialorder %v950_v63, 0.0  ;;  %vm966_vm7 = vcmp.lt.f32.partialorder %v950_v63, 8.0 }
  0xa1   : > { %8652 = vst [vmem:[#allocation30_spill] sm:$0xff] %v8651_v5  ;;  %vm5386_vm2 = vmand %vm894_vm9, %vm902_vm10  ;;  %vm901_vm14 = vcmp.lt.f32.partialorder %v885_v3, 8.0  ;;  %vm8662_vm9 = vcmp.lt.f32.partialorder %v888_v59, 8.0  ;;  %vm8663_vm10 = vcmp.ge.f32.partialorder %v888_v59, 0.0  ;;  %vm959_vm3 = vcmp.ge.f32.partialorder %v951_v4, 0.0  ;;  %v4687_v59 = vld [vmem:[#allocation10 + $0x68] sm:$0xff]  }
  0xa2   : > { %vm5394_vm0 = vmand %vm895_vm12, %vm903_vm13  ;;  %vm967_vm6 = vcmp.lt.f32.partialorder %v951_v4, 8.0  ;;  %vm830_vm15 = vcmp.ge.f32.partialorder %v5322_v31, 0.0  ;;  %vm838_vm8 = vcmp.lt.f32.partialorder %v5322_v31, 8.0  ;;  %vm8667_vm12 = vcmp.ge.f32.partialorder %v949_v60, 0.0  ;;  %v4688_v60 = vld [vmem:[#allocation10 + $0xb0] sm:$0xff]   ;;  %4313 = vmatprep.subr.bf16.mxu1 %v4687_v59 }
  0xa3   : > { %4506 = vmatpush3.bf16.msra.mxu0 %v4674_v7  ;;  %v5376_v7 = vsub.f32 %v740_v29, %v772_v58  ;;  %vm5400_vm11 = vmand %vm8663_vm10, %vm8662_vm9  ;;  %vm839_vm9 = vcmp.lt.f32.partialorder %v5324_v33, 8.0  ;;  %v8678_v17 = vmov 0  ;;  %v5435_v19 = vadd.s32 48, %v5312_v13 }
  0xa4   : > { %4507 = vmatprep.subr.bf16.mxu0 %v4675_v8  ;;  %vm5408_vm13 = vmand %vm8667_vm12, %vm965_vm5  ;;  %v5438_v20 = vadd.s32 56, %v5312_v13  ;;  %v771_v21 = vmul.f32 8.0, %v5374_v6  ;;  %v8683_v22 = vmov 0  ;;  %v852_v24 = vadd.f32 1.0, %v5342_v49 }
  0xa5   : > { %8653 = vst [vmem:[#allocation31_spill] sm:$0xff] %v5376_v7  ;;  %v948_v12 = vadd.f32 1.0, %v5376_v7  ;;  %v8669_v14 = vsel %vm5408_vm13, 4294967295, %v8668_v14  ;;  %vm5414_vm10 = vmand %vm958_vm4, %vm966_vm7  ;;  %v884_v25 = vadd.f32 -1.0, %v5376_v7  ;;  %v8395_v27 = vcvt.s32.f32 %v5435_v19 }
  0xa6   : > { %v8671_v15 = vsel %vm5414_vm10, 4294967295, %v8670_v15  ;;  %vm5430_vm13 = vmand %vm959_vm3, %vm967_vm6  ;;  %vm828_vm3 = vcmp.ge.f32.partialorder %v5342_v49, 0.0  ;;  %vm836_vm6 = vcmp.lt.f32.partialorder %v5342_v49, 8.0  ;;  %v8394_v28 = vcvt.s32.f32 %v5438_v20 }
  0xa7   : > { %4508 = vmatpush3.bf16.msra.mxu0 %v4675_v8  ;;  %v8654_v8 = vmov 0  ;;  %8672 = vst [vmem:[#allocation35_spill] sm:$0xff] %v8671_v15  ;;  %v8681_v18 = vsel %vm5430_vm13, 4294967295, %v8680_v18  ;;  %vm956_vm7 = vcmp.ge.f32.partialorder %v948_v12, 0.0  ;;  %v5473_v29 = vsub.f32 %v739_v36, %v771_v21  ;;  %v4695_v21 = vld [vmem:[#allocation10 + $0x58] sm:$0xff]  }
  0xa8   : > { %4349 = vmatprep.subr.bf16.mxu0 %v4682_v61  ;;  %v8655_v8 = vsel %vm5380_vm1, 4294967295, %v8654_v8  ;;  %vm893_vm1 = vcmp.ge.f32.partialorder %v885_v3, 0.0  ;;  %8682 = vst [vmem:[#allocation37_spill] sm:$0xff] %v8681_v18  ;;  %v853_v32 = vadd.f32 1.0, %v5330_v38  ;;  %v8704_v37 = vmov 0 }
  0xa9   : > { %8656 = vst [vmem:[#allocation32_spill] sm:$0xff] %v8655_v8  ;;  %vm5426_vm12 = vmand %vm893_vm1, %vm901_vm14  ;;  %vm8687_vm1 = vnez %v8645_v62  ;;  %v854_v39 = vadd.f32 1.0, %v5322_v31  ;;  %v851_v13 = vadd.f32 1.0, %v5374_v6  ;;  %v753_v31 = vadd.f32 0.5, %v8395_v27 }
  0xaa   : > { %4510 = vmatmul.mubr.bf16.vlgmr.msra.gmra.mxu0 %v4677_v9  ;;  %v8657_v9 = vmov 0  ;;  %v8679_v17 = vsel %vm5426_vm12, 4294967295, %v8678_v17  ;;  %8697 = vst [vmem:[#allocation40_spill] sm:$0xff] %v5473_v29  ;;  %v754_v36 = vadd.f32 0.5, %v8394_v28  ;;  %v8715_v46 = vmov 0 }
  0xab   : > { %4513 = vmatprep.mubr.bf16.mxu0 %v4678_v10  ;;  %4350 = vmatpush3.bf16.msra.mxu0 %v4684_v1  ;;  %v8658_v9 = vsel %vm5386_vm2, 4294967295, %v8657_v9  ;;  %v8659_v10 = vmov 0  ;;  %vm8674_vm2 = vcmp.ge.f32.partialorder %v5330_v38, 0.0  ;;  %v8719_v48 = vmov 0  ;;  %v4689_v1 = vld [vmem:[#allocation10 + $0x28] sm:$0xff]  }
  0xac   : > { %v8660_v10 = vsel %vm5394_vm0, 4294967295, %v8659_v10  ;;  %vm831_vm0 = vcmp.ge.f32.partialorder %v5324_v33, 0.0  ;;  %vm8686_vm14 = vnez %v8658_v9  ;;  %v8724_v51 = vmov 0  ;;  %4351 = vmatprep.subr.bf16.mxu0 %v4686_v54  ;;  %4314 = vmatpush3.bf16.msra.mxu1 %v4689_v1  ;;  %v4703_v1 = vld [vmem:[#allocation10 + $0x48] sm:$0xff]  }
  0xad   : > { %8661 = vst [vmem:[#allocation33_spill] sm:$0xff] %v8660_v10  ;;  %vm5451_vm4 = vmand %vm831_vm0, %vm839_vm9  ;;  %v8729_v53 = vmov 0  ;;  %v8735_v55 = vmov 0  ;;  %v761_v57 = vmul.f32 0.125, %v753_v31  ;;  %v762_v58 = vmul.f32 0.125, %v754_v36 }
  0xae   : > { %v8689_v23 = vsel %vm5451_vm4, 4294967295, %v8688_v23  ;;  %vm5475_vm9 = vmand %vm828_vm3, %vm836_vm6  ;;  %vm8706_vm4 = vnez %v8669_v14  ;;  %v8742_v61 = vmov 0  ;;  %v8759_v26 = vmov 0 }
  0xaf   : > { %8690 = vst [vmem:[#allocation39_spill] sm:$0xff] %v8689_v23  ;;  %v8699_v30 = vsel %vm5475_vm9, 4294967295, %v8698_v30  ;;  %4352 = vmatpush3.bf16.msra.mxu0 %v4688_v60  ;;  %v5646_v41 = vadd.f32 -1.0, %v5473_v29  ;;  %v8769_v54 = vmov 0  ;;  %v5679_v60 = vadd.f32 1.0, %v5326_v35 }
  0xb0   : > { %8700 = vst [vmem:[#allocation41_spill] sm:$0xff] %v8699_v30 }
  0xb2   : > { %4514 = vmatmul.mubr.bf16.gmra.mxu0 %v4679_v11  ;;  %v8664_v11 = vmov 0 }
  0xb3   : > { %v8665_v11 = vsel %vm5400_vm11, 4294967295, %v8664_v11  ;;  %vm8673_vm11 = vcmp.lt.f32.partialorder %v5330_v38, 8.0  ;;  %v947_v38 = vadd.f32 1.0, %v5473_v29  ;;  %v8801_v29 = vcvt.s32.f32 %v5438_v20 }
  0xb4   : > { %8666 = vst [vmem:[#allocation34_spill] sm:$0xff] %v8665_v11  ;;  %vm5422_vm5 = vmand %vm8674_vm2, %vm8673_vm11  ;;  %vm8693_vm12 = vnez %v8665_v11 }
  0xb5   : > { %v8676_v16 = vsel %vm5422_vm5, 4294967295, %v8675_v16  ;;  %vm5441_vm11 = vmand %vm830_vm15, %vm838_vm8  ;;  %vm964_vm5 = vcmp.lt.f32.partialorder %v948_v12, 8.0  ;;  %vm8691_vm8 = vnez %v8660_v10  ;;  %vm8692_vm15 = vnez %v8648_v2 }
  0xb6   : > { %8677 = vst [vmem:[#allocation36_spill] sm:$0xff] %v8676_v16  ;;  %v8684_v22 = vsel %vm5441_vm11, 4294967295, %v8683_v22  ;;  %vm991_vm2 = vmand %vm8687_vm1, %vm8686_vm14  ;;  %vm8694_vm14 = vnez %v8651_v5  ;;  %v8748_v12 = vmov 0 }
  0xb7   : > { %8685 = vst [vmem:[#allocation38_spill] sm:$0xff] %v8684_v22  ;;  %vm992_vm11 = vmand %vm8692_vm15, %vm8691_vm8  ;;  %vm8707_vm8 = vnez %v8655_v8 }
  0xb8   : > { %vm5465_vm0 = vmpackc.low %vm991_vm2, %vm991_vm2 }
  0xb9   : > { %vm5480_vm13 = vmand %vm956_vm7, %vm964_vm5  ;;  %v1023_v43 = vsel %vm5465_vm0, 65537, %v8409_v42  ;;  %vm8717_vm0 = vcmp.lt.f32.partialorder %v852_v24, 8.0  ;;  %vm8718_vm5 = vcmp.ge.f32.partialorder %v852_v24, 0.0  ;;  %v4690_v24 = vld [vmem:[#allocation10 + $0xe8] sm:$0xff]  }
  0xba   : > { %v8702_v34 = vsel %vm5480_vm13, 4294967295, %v8701_v34  ;;  %vm5484_vm2 = vmpackc.low %vm992_vm11, %vm992_vm11  ;;  %vm8708_vm13 = vnez %v8681_v18  ;;  %v1061_v63 = vshll.u32 %v1023_v43, 16  ;;  %v1065_v0 = vshrl.u32 %v1023_v43, 16  ;;  %4353 = vmatprep.subr.bf16.mxu0 %v4690_v24  ;;  %v4693_v43 = vld [vmem:[#allocation10 + $0x20] sm:$0xff]  }
  0xbb   : > { %8703 = vst [vmem:[#allocation42_spill] sm:$0xff] %v8702_v34  ;;  %v8705_v37 = vsel %vm5484_vm2, 4294967295, %v8704_v37  ;;  %vm1290_vm3 = vmand %vm8707_vm8, %vm8706_vm4  ;;  %vm8757_vm8 = vcmp.lt.f32.partialorder %v947_v38, 8.0  ;;  %v4696_v24 = vld [vmem:[#allocation10 + $0xa0] sm:$0xff]  }
  0xbc   : > { %vm8709_vm11 = vmand %vm8694_vm14, %vm8693_vm12  ;;  %vm8723_vm14 = vcmp.ge.f32.partialorder %v884_v25, 0.0  ;;  %v5629_v31 = vrot.slane %v1061_v63, 5  ;;  %v1067_v36 = vrot.slane %v1065_v0, 4  ;;  %v4694_v63 = vld [vmem:[#allocation10 + $0xe0] sm:$0xff]  }
  0xbd   : > { %vm5513_vm7 = vmpackc.low %vm8709_vm11, %vm8709_vm11 }
  0xbe   : > { %vm5526_vm6 = vmpackc.low %vm1290_vm3, %vm1290_vm3  ;;  %vm8722_vm3 = vcmp.lt.f32.partialorder %v884_v25, 8.0  ;;  %v8754_v25 = vmov 0 }
  0xbf   : > { %v8713_v45 = vsel %vm5526_vm6, 4294967295, %v8712_v45  ;;  %vm8714_vm11 = vmand %vm8687_vm1, %vm5414_vm10  ;;  %vm8727_vm1 = vnez %v8705_v37  ;;  %v5627_v37 = vfloor.f32 %v762_v58 }
  0xc0   : > { %vm5536_vm2 = vmpackc.low %vm8714_vm11, %vm8714_vm11  ;;  %v1024_v52 = vsel %vm8727_vm1, 65537, %v8409_v42  ;;  %vm8733_vm1 = vcmp.lt.f32.partialorder %v853_v32, 8.0 }
  0xc1   : > { %v8716_v46 = vsel %vm5536_vm2, 4294967295, %v8715_v46  ;;  %vm5542_vm9 = vmand %vm8718_vm5, %vm8717_vm0  ;;  %vm8731_vm0 = vnez %v8679_v17  ;;  %v1071_v3 = vshll.u32 %v1024_v52, 16  ;;  %v1075_v4 = vshrl.u32 %v1024_v52, 16 }
  0xc2   : > { %v8720_v48 = vsel %vm5542_vm9, 4294967295, %v8719_v48  ;;  %vm5548_vm12 = vmand %vm8723_vm14, %vm8722_vm3  ;;  %vm8732_vm14 = vnez %v8676_v16  ;;  %vm8740_vm3 = vcmp.lt.f32.partialorder %v854_v39, 8.0  ;;  %vm8746_vm9 = vnez %v8689_v23 }
  0xc3   : > { %8721 = vst [vmem:[#allocation43_spill] sm:$0xff] %v8720_v48  ;;  %v8725_v51 = vsel %vm5548_vm12, 4294967295, %v8724_v51  ;;  %vm8728_vm11 = vmand %vm8692_vm15, %vm8708_vm13  ;;  %vm8734_vm12 = vcmp.ge.f32.partialorder %v853_v32, 0.0  ;;  %vm8739_vm15 = vnez %v8684_v22  ;;  %v5625_v32 = vfloor.f32 %v761_v57 }
  0xc4   : > { %8726 = vst [vmem:[#allocation44_spill] sm:$0xff] %v8725_v51  ;;  %vm5561_vm5 = vmpackc.low %vm8728_vm11, %vm8728_vm11  ;;  %vm8738_vm11 = vnez %v8658_v9  ;;  %v5651_v52 = vsel %vm5513_vm7, 65537, %v8409_v42  ;;  %v5659_v57 = vrot.slane %v1071_v3, 5  ;;  %v1077_v58 = vrot.slane %v1075_v4, 4 }
  0xc5   : > { %v8730_v53 = vsel %vm5561_vm5, 4294967295, %v8729_v53  ;;  %vm5571_vm2 = vmand %vm8734_vm12, %vm8733_vm1  ;;  %vm8741_vm5 = vcmp.ge.f32.partialorder %v854_v39, 0.0  ;;  %vm8745_vm1 = vnez %v8660_v10  ;;  %vm8758_vm12 = vcmp.ge.f32.partialorder %v947_v38, 0.0  ;;  %v4691_v39 = vld [vmem:[#allocation10 + $0x60] sm:$0xff]   ;;  %v4701_v10 = vld [vmem:[#allocation10 + $0x10] sm:$0xff]  }
  0xc6   : > { %v8736_v55 = vsel %vm5571_vm2, 4294967295, %v8735_v55  ;;  %vm1529_vm13 = vmand %vm8739_vm15, %vm8738_vm11  ;;  %vm8762_vm11 = vnez %v8702_v34  ;;  %v8765_v38 = vmov 0  ;;  %8771 = vst [vmem:[#allocation49_spill] sm:$0xff] %v5659_v57  ;;  %4315 = vmatprep.subr.bf16.mxu1 %v4691_v39  ;;  %v777_v3 = vmul.f32 8.0, %v5625_v32  ;;  %v4708_v34 = vld [vmem:[#allocation10 + $0x88] sm:$0xff]  }
  0xc7   : > { %8737 = vst [vmem:[#allocation45_spill] sm:$0xff] %v8736_v55  ;;  %vm5581_vm6 = vmand %vm8741_vm5, %vm8740_vm3  ;;  %4316 = vmatpush3.bf16.msra.mxu1 %v4693_v43  ;;  %v778_v4 = vmul.f32 8.0, %v5627_v37  ;;  %v1068_v39 = vor.u32 %v1067_v36, %v5629_v31  ;;  %v8782_v36 = vmov 0 }
  0xc8   : > { %v8743_v61 = vsel %vm5581_vm6, 4294967295, %v8742_v61  ;;  %vm8747_vm5 = vmand %vm8732_vm14, %vm8731_vm0  ;;  %vm8753_vm6 = vcmp.ge.f32.partialorder %v851_v13, 0.0  ;;  %4317 = vmatprep.subr.bf16.mxu1 %v4695_v21 }
  0xc9   : > { %8744 = vst [vmem:[#allocation46_spill] sm:$0xff] %v8743_v61  ;;  %vm5595_vm3 = vmpackc.low %vm8747_vm5, %vm8747_vm5  ;;  %vm8752_vm5 = vcmp.lt.f32.partialorder %v851_v13, 8.0  ;;  %v4692_v13 = vld [vmem:[#allocation10 + $0xa8] sm:$0xff]   ;;  %v5757_v44 = vrot.slane %v1068_v39, 4  ;;  %v8799_v39 = vcvt.s32.f32 %v5435_v19  ;;  %v5782_v15 = vsub.f32 %v8801_v29, %v778_v4  ;;  %v4704_v4 = vld [vmem:[#allocation10 + $0x90] sm:$0xff]  }
  0xca   : > { %v8749_v12 = vsel %vm5595_vm3, 4294967295, %v8748_v12  ;;  %vm5605_vm2 = vmpackc.low %vm1529_vm13, %vm1529_vm13  ;;  %vm8763_vm13 = vnez %v8699_v30  ;;  %4354 = vmatpush3.bf16.msra.mxu0 %v4692_v13  ;;  %v1081_v13 = vshll.u32 %v5651_v52, 16  ;;  %v5955_v19 = vadd.f32 1.0, %v5344_v50 }
  0xcb   : > { %vm5611_vm0 = vmand %vm8753_vm6, %vm8752_vm5  ;;  %vm8767_vm5 = vsmask.f32 7440  ;;  %vm8773_vm7 = vnez %v8749_v12  ;;  %v1561_v0 = vsel %vm5605_vm2, 65537, %v8409_v42  ;;  %v5699_v12 = vadd.f32 1.0, %v5625_v32  ;;  %4355 = vmatprep.subr.bf16.mxu0 %v4694_v63  ;;  %8791 = vst [vmem:[#allocation50_spill] sm:$0xff] %v5757_v44 }
  0xcc   : > { %v8755_v25 = vsel %vm5611_vm0, 4294967295, %v8754_v25  ;;  %vm5617_vm3 = vmand %vm8758_vm12, %vm8757_vm8  ;;  %v1560_v40 = vsel %vm8773_vm7, 65537, %v8409_v42  ;;  %vm8780_vm2 = vnez %v8713_v45  ;;  %v4697_v45 = vld [vmem:[#allocation10 + $0x18] sm:$0xff]   ;;  %v1596_v2 = vshll.u32 %v1561_v0, 16  ;;  %8802 = vst [vmem:[#allocation52_spill] sm:$0xff] %v5782_v15 }
  0xcd   : > { %8756 = vst [vmem:[#allocation47_spill] sm:$0xff] %v8755_v25  ;;  %v8760_v26 = vsel %vm5617_vm3, 4294967295, %v8759_v26  ;;  %vm8764_vm8 = vmand %vm8746_vm9, %vm8745_vm1  ;;  %vm8772_vm1 = vnez %v8684_v22  ;;  %v5706_v43 = vsel %vm8780_vm2, 65537, %v8409_v42  ;;  %v1586_v22 = vshll.u32 %v1560_v40, 16  ;;  %4318 = vmatpush3.bf16.msra.mxu1 %v4697_v45 }
  0xce   : > { %8761 = vst [vmem:[#allocation48_spill] sm:$0xff] %v8760_v26  ;;  %vm5637_vm6 = vmpackc.low %vm8764_vm8, %vm8764_vm8  ;;  %vm8768_vm8 = vsmask.f32 3328  ;;  %v1590_v16 = vshrl.u32 %v1560_v40, 16  ;;  %4356 = vmatpush3.bf16.msra.mxu0 %v4696_v24  ;;  %v1600_v62 = vshrl.u32 %v1561_v0, 16  ;;  %vm8788_vm2 = vnez %v8736_v55  ;;  %v4698_v40 = vld [vmem:[#allocation10 + $0xd8] sm:$0xff]  }
  0xcf   : > { %v8766_v38 = vsel %vm5637_vm6, 4294967295, %v8765_v38  ;;  %vm5655_vm15 = vmor %vm8768_vm8, %vm8767_vm5  ;;  %vm8787_vm6 = vnez %v8679_v17  ;;  %v1346_v63 = vshrl.u32 %v5706_v43, 16  ;;  %v5752_v0 = vadd.f32 -1.0, %v5627_v37  ;;  %4357 = vmatprep.subr.bf16.mxu0 %v4698_v40  ;;  %v4705_v40 = vld [vmem:[#allocation10 + $0x8] sm:$0xff]  }
  0xd0   : > { %v8770_v54 = vsel %vm5655_vm15, 4294967295, %v8769_v54  ;;  %vm1823_vm9 = vmand %vm8772_vm1, %vm5414_vm10  ;;  %vm8786_vm1 = vnez %v8720_v48  ;;  %v5755_v24 = vadd.f32 1.0, %v5324_v33  ;;  %vm8792_vm10 = vsmask.f32 4368 }
  0xd1   : > { %vm8774_vm5 = vmand %vm8763_vm13, %vm8762_vm11  ;;  %v8794_v45 = vmov 0  ;;  %v5778_v7 = vsub.f32 %v8799_v39, %v777_v3  ;;  %v5786_v5 = vrot.slane %v1081_v13, 5  ;;  %v5788_v18 = vrot.slane %v1586_v22, 5 }
  0xd2   : > { %vm5674_vm8 = vmpackc.low %vm8774_vm5, %vm8774_vm5  ;;  %v5790_v11 = vrot.slane %v1590_v16, 4  ;;  %4358 = vmatpush3.bf16.msra.mxu0 %v4700_v47  ;;  %v5802_v20 = vrot.slane %v1596_v2, 5  ;;  %v1602_v29 = vrot.slane %v1600_v62, 4  ;;  %v8808_v3 = vmov 0   ;;  %v4702_v47 = vld [vmem:[#allocation10 + $0xd0] sm:$0xff]  }
  0xd3   : > { %vm8777_vm7 = vmand %vm8732_vm14, %vm8706_vm4  ;;  %vm8790_vm14 = vnez %v8743_v61  ;;  %8800 = vst [vmem:[#allocation51_spill] sm:$0xff] %v5778_v7  ;;  %v5807_v16 = vsel %vm5674_vm8, 65537, %v8808_v3  ;;  %v5818_v2 = vrot.slane %v1346_v63, 7  ;;  %vm8809_vm8 = vnez %v8766_v38  ;;  %4359 = vmatprep.subr.bf16.mxu0 %v4702_v47 }
  0xd4   : > { %vm5690_vm12 = vmpackc.low %vm8777_vm7, %vm8777_vm7  ;;  %vm8781_vm7 = vnez %v8716_v46  ;;  %v1078_v46 = vor.u32 %v1077_v58, %v5659_v57  ;;  %v5743_v58 = vadd.f32 1.0, %v5627_v37  ;;  %8807 = vst [vmem:[#allocation54_spill] sm:$0xff] %v5802_v20  ;;  %v5826_v59 = vsel %vm8809_vm8, 65537, %v8808_v3 }
  0xd5   : > { %v5711_v28 = vsel %vm8781_vm7, 65537, %v8409_v42  ;;  %vm5719_vm5 = vmpackc.low %vm1823_vm9, %vm1823_vm9  ;;  %vm8784_vm7 = vnez %v8730_v53  ;;  %vm8785_vm9 = vnez %v8725_v51  ;;  %v5740_v53 = vadd.f32 -1.0, %v5625_v32 }
  0xd6   : > { %v8783_v36 = vsel %vm5719_vm5, 4294967295, %v8782_v36  ;;  %v5729_v27 = vsel %vm8784_vm7, 65537, %v8409_v42  ;;  %v1355_v21 = vshrl.u32 %v5711_v28, 16  ;;  %v4699_v42 = vld [vmem:[#allocation10 + $0x50] sm:$0xff]   ;;  %vm8793_vm5 = vsmask.f32 256  ;;  %vm8796_vm13 = vmand %vm8786_vm1, %vm8785_vm9  ;;  %4360 = vmatpush3.bf16.msra.mxu0 %v4704_v4 }
  0xd7   : > { %vm5761_vm4 = vmor %vm8793_vm5, %vm8792_vm10  ;;  %v1364_v56 = vshrl.u32 %v5729_v27, 16  ;;  %v5784_v23 = vrot.slane %v1078_v46, 4  ;;  %4319 = vmatprep.subr.bf16.mxu1 %v4699_v42  ;;  %v5812_v22 = vsel %vm5690_vm12, 65537, %v8808_v3  ;;  %v1358_v42 = vshll.u32 %v5711_v28, 16 }
  0xd8   : > { %v8795_v45 = vsel %vm5761_vm4, 4294967295, %v8794_v45  ;;  %vm5772_vm7 = vmpackc.low %vm8796_vm13, %vm8796_vm13  ;;  %4320 = vmatpush3.bf16.msra.mxu1 %v4701_v10  ;;  %v5820_v62 = vrot.slane %v1355_v21, 7  ;;  %v1367_v38 = vshll.u32 %v5729_v27, 16  ;;  %v8812_v46 = vmov 0 }
  0xd9   : > { %8803 = vst [vmem:[#allocation53_spill] sm:$0xff] %v5784_v23  ;;  %vm8804_vm10 = vmand %vm8788_vm2, %vm8787_vm6  ;;  %v5837_v28 = vrot.slane %v1364_v56, 7  ;;  %v1869_v27 = vshrl.u32 %v5807_v16, 16  ;;  %v1878_v21 = vshrl.u32 %v5812_v22, 16  ;;  %4321 = vmatprep.subr.bf16.mxu1 %v4703_v1  ;;  %v1603_v39 = vor.u32 %v1602_v29, %v5802_v20  ;;  %v4706_v29 = vld [vmem:[#allocation10 + $0xc8] sm:$0xff]  }
  0xda   : > { %vm5798_vm13 = vmpackc.low %vm8804_vm10, %vm8804_vm10  ;;  %vm8810_vm10 = vnez %v8658_v9  ;;  %v1593_v9 = vor.u32 %v5790_v11, %v5788_v18  ;;  %v1606_v47 = vshll.u32 %v5826_v59, 16  ;;  %vm8815_vm5 = vnez %v8783_v36  ;;  %4361 = vmatprep.subr.bf16.mxu0 %v4706_v29 }
  0xdb   : > { %vm8811_vm8 = vmand %vm8790_vm14, %vm8810_vm10  ;;  %vm8814_vm10 = vnez %v8669_v14  ;;  %v5868_v56 = vsel %vm8815_vm5, 65537, %v8808_v3  ;;  %vm8822_vm5 = vcmp.lt.f32.partialorder %v5374_v6, 8.0  ;;  %vm8823_vm9 = vcmp.ge.f32.partialorder %v5374_v6, 0.0  ;;  %4362 = vmatpush3.bf16.msra.mxu0 %v4708_v34  ;;  %v4710_v34 = vld [vmem:[#allocation10 + $0xc0] sm:$0xff]  }
  0xdc   : > { %vm5846_vm12 = vmpackc.low %vm8811_vm8, %vm8811_vm8  ;;  %v8824_v36 = vmov 0  ;;  %4322 = vmatpush3.bf16.msra.mxu1 %v4705_v40  ;;  %v1353_v4 = vrot.slane %v5818_v2, 4  ;;  %v1360_v10 = vor.u32 %v1358_v42, %v5820_v62  ;;  %v8829_v63 = vmov 0  ;;  %v4707_v40 = vld [vmem:[#allocation10 + $0x40] sm:$0xff]   ;;  %4363 = vmatprep.subr.bf16.mxu0 %v4710_v34 }
  0xdd   : > { %v8813_v46 = vsel %vm5846_vm12, 4294967295, %v8812_v46  ;;  %vm8816_vm14 = vmand %vm5611_vm0, %vm5617_vm3  ;;  %v5909_v13 = vadd.f32 -1.0, %v5778_v7  ;;  %v5912_v48 = vadd.f32 -1.0, %v5782_v15  ;;  %v1362_v23 = vrot.slane %v5820_v62, 4  ;;  %v4709_v62 = vld [vmem:[#allocation10] sm:$0xff]   ;;  %4323 = vmatprep.subr.bf16.mxu1 %v4707_v40 }
  0xde   : > { %vm5876_vm8 = vmpackc.low %vm8816_vm14, %vm8816_vm14  ;;  %vm8827_vm14 = vcmp.lt.f32.partialorder %v5646_v41, 8.0  ;;  %v1369_v42 = vor.u32 %v1367_v38, %v5837_v28  ;;  %v1881_v57 = vshll.u32 %v5812_v22, 16  ;;  %v1871_v61 = vrot.slane %v1869_v27, 7 }
  0xdf   : > { %vm8819_vm12 = vmand %vm8786_vm1, %vm8762_vm11  ;;  %v5930_v38 = vrot.slane %v1878_v21, 7  ;;  %v1887_v22 = vshrl.u32 %v5868_v56, 16  ;;  %v2092_v33 = vsel %vm5798_vm13, 65537, %v8808_v3  ;;  %v5942_v14 = vrot.slane %v1593_v9, 4 }
  0xe0   : > { %vm5886_vm15 = vmpackc.low %vm8819_vm12, %vm8819_vm12  ;;  %vm8828_vm12 = vcmp.ge.f32.partialorder %v5646_v41, 0.0  ;;  %v2091_v41 = vsel %vm5772_vm7, 65537, %v8808_v3  ;;  %vm8835_vm7 = vnez %v8655_v8  ;;  %v5944_v27 = vrot.slane %v1603_v39, 4  ;;  %4324 = vmatpush3.bf16.msra.mxu1 %v4709_v62 }
  0xe1   : > { %vm5894_vm0 = vmand %vm8823_vm9, %vm8822_vm5  ;;  %8836 = vst [vmem:[#allocation57_spill] sm:$0xff] %v5942_v14  ;;  %v5946_v21 = vrot.slane %v1606_v47, 5  ;;  %v5959_v9 = vsel %vm5761_vm4, %v1353_v4, %v1360_v10  ;;  %v2108_v39 = vshll.u32 %v2091_v41, 16  ;;  %v2112_v47 = vshrl.u32 %v2091_v41, 16 }
  0xe2   : > { %v8825_v36 = vsel %vm5894_vm0, 4294967295, %v8824_v36  ;;  %vm5904_vm1 = vmand %vm8828_vm12, %vm8827_vm14  ;;  %8837 = vst [vmem:[#allocation58_spill] sm:$0xff] %v5944_v27  ;;  %vm8839_vm14 = vnez %v8725_v51  ;;  %vm8840_vm12 = vnez %v8699_v30  ;;  %v1872_v29 = vshll.u32 %v5807_v16, 16 }
  0xe3   : > { %8826 = vst [vmem:[#allocation55_spill] sm:$0xff] %v8825_v36  ;;  %v8830_v63 = vsel %vm5904_vm1, 4294967295, %v8829_v63  ;;  %vm8832_vm9 = vmand %vm8788_vm2, %vm8814_vm10  ;;  %v5970_v40 = vsel %vm5761_vm4, %v1362_v23, %v1369_v42  ;;  %v2118_v4 = vshll.u32 %v2092_v33, 16  ;;  %v2122_v62 = vshrl.u32 %v2092_v33, 16 }
  0xe4   : > { %8831 = vst [vmem:[#allocation56_spill] sm:$0xff] %v8830_v63  ;;  %vm5926_vm5 = vmpackc.low %vm8832_vm9, %vm8832_vm9  ;;  %v1876_v23 = vrot.slane %v1871_v61, 4  ;;  %v1883_v42 = vor.u32 %v1881_v57, %v5930_v38  ;;  %v5986_v41 = vrot.slane %v1887_v22, 7  ;;  %v1890_v33 = vshll.u32 %v5868_v56, 16 }
  0xe5   : > { %8838 = vst [vmem:[#allocation59_spill] sm:$0xff] %v5959_v9  ;;  %8841 = vst [vmem:[#allocation60_spill] sm:$0xff] %v5970_v40  ;;  %v8846_v17 = vmov 0  ;;  %v6026_v56 = vrot.slane %v2108_v39, 5  ;;  %v6028_v57 = vrot.slane %v2112_v47, 4  ;;  %v6034_v10 = vor.u32 %v1872_v29, %v1871_v61 }
  0xe6   : > { %vm8842_vm2 = vmand %vm8835_vm7, %vm8787_vm6  ;;  %vm8848_vm7 = vnez %v8770_v54  ;;  %v6041_v30 = vrot.slane %v2122_v62, 4  ;;  %v953_v39 = vadd.f32 1.0, %v5778_v7  ;;  %v6050_v61 = vsel %vm5761_vm4, %v1876_v23, %v1883_v42  ;;  %v4796_v54 = vld [vmem:[#allocation12 + $0x10] sm:$0xff]  }
  0xe7   : > { %vm5979_vm13 = vmpackc.low %vm8842_vm2, %vm8842_vm2  ;;  %8853 = vst [vmem:[#allocation61_spill] sm:$0xff] %v6026_v56  ;;  %v6053_v47 = vor.u32 %v1890_v33, %v5986_v41  ;;  %v6058_v29 = vsel %vm5876_vm8, 65537, %v8808_v3  ;;  %v6069_v23 = vsel %vm5926_vm5, 65537, %v8808_v3  ;;  %v2115_v44 = vor.u32 %v6028_v57, %v6026_v56 }
  0xe8   : > { %vm8845_vm6 = vmand %vm5894_vm0, %vm5904_vm1  ;;  %8855 = vst [vmem:[#allocation62_spill] sm:$0xff] %v6050_v61  ;;  %v1022_v42 = vsel %vm5979_vm13, 65537, %v8808_v3  ;;  %v8863_v57 = vmov 0  ;;  %v2410_v22 = vshrl.u32 %v6069_v23, 16  ;;  %vm8866_vm13 = vcmp.lt.f32.partialorder %v5752_v0, 8.0 }
  0xe9   : > { %vm5995_vm2 = vmpackc.low %vm8845_vm6, %vm8845_vm6  ;;  %v1051_v8 = vshll.u32 %v1022_v42, 16  ;;  %vm8867_vm10 = vcmp.ge.f32.partialorder %v5752_v0, 0.0  ;;  %v8883_v51 = vmov 0 }
  0xea   : > { %v8847_v17 = vsel %vm5995_vm2, 4294967295, %v8846_v17  ;;  %vm8849_vm6 = vmand %vm8840_vm12, %vm8839_vm14  ;;  %vm8852_vm2 = vnez %v8813_v46  ;;  %v6039_v46 = vrot.slane %v2118_v4, 5  ;;  %v6063_v4 = vsel %vm5886_vm15, 65537, %v8808_v3 }
  0xeb   : > { %vm6015_vm11 = vmpackc.low %vm8849_vm6, %vm8849_vm6  ;;  %v6024_v34 = vsel %vm8852_vm2, 65537, %v8808_v3  ;;  %vm8854_vm2 = vnez %v8755_v25  ;;  %vm8856_vm8 = vnez %v8847_v17  ;;  %v954_v17 = vadd.f32 1.0, %v5782_v15 }
  0xec   : > { %vm1820_vm6 = vmand %vm5894_vm0, %vm5617_vm3  ;;  %v2128_v62 = vshll.u32 %v6024_v34, 16  ;;  %v1558_v1 = vsel %vm8856_vm8, 65537, %v8808_v3  ;;  %v1559_v16 = vsel %vm6015_vm11, 65537, %v8808_v3  ;;  %v2125_v55 = vor.u32 %v6041_v30, %v6039_v46 }
  0xed   : > { %vm2058_vm12 = vmand %vm8854_vm2, %vm5904_vm1  ;;  %v2393_v25 = vshrl.u32 %v6058_v29, 16  ;;  %v2401_v36 = vshrl.u32 %v6063_v4, 16  ;;  %vm8862_vm8 = vcmp.ge.f32.partialorder %v5740_v53, 0.0  ;;  %v1055_v15 = vshrl.u32 %v1022_v42, 16 }
  0xee   : > { %vm6083_vm15 = vmpackc.low %vm1820_vm6, %vm1820_vm6  ;;  %vm8861_vm6 = vcmp.lt.f32.partialorder %v5740_v53, 8.0  ;;  %v1567_v7 = vshll.u32 %v1558_v1, 16  ;;  %v8868_v30 = vmov 0  ;;  %v1570_v53 = vshrl.u32 %v1558_v1, 16 }
  0xef   : > { %vm6092_vm5 = vmpackc.low %vm2058_vm12, %vm2058_vm12  ;;  %v1576_v50 = vshll.u32 %v1559_v16, 16  ;;  %v1580_v26 = vshrl.u32 %v1559_v16, 16  ;;  %vm8872_vm12 = vcmp.ge.f32.partialorder %v5625_v32, 0.0  ;;  %v8873_v42 = vmov 0 }
  0xf0   : > { %vm6106_vm11 = vmand %vm8862_vm8, %vm8861_vm6  ;;  %vm8871_vm8 = vcmp.lt.f32.partialorder %v5625_v32, 8.0  ;;  %v6134_v0 = vsel %vm6083_vm15, 65537, %v8808_v3  ;;  %vm8876_vm2 = vcmp.lt.f32.partialorder %v5627_v37, 8.0  ;;  %vm8877_vm6 = vcmp.ge.f32.partialorder %v5627_v37, 0.0 }
  0xf1   : > { %v8864_v57 = vsel %vm6106_vm11, 4294967295, %v8863_v57  ;;  %vm6115_vm9 = vmand %vm8867_vm10, %vm8866_vm13  ;;  %v8878_v32 = vmov 0  ;;  %vm968_vm13 = vcmp.lt.f32.partialorder %v5955_v19, 8.0  ;;  %v6147_v1 = vrot.slane %v2393_v25, 7 }
  0xf2   : > { %8865 = vst [vmem:[#allocation63_spill] sm:$0xff] %v8864_v57  ;;  %v8869_v30 = vsel %vm6115_vm9, 4294967295, %v8868_v30  ;;  %vm6125_vm0 = vmand %vm8872_vm12, %vm8871_vm8  ;;  %v2404_v11 = vshll.u32 %v6063_v4, 16  ;;  %v2413_v16 = vshll.u32 %v6069_v23, 16  ;;  %v2090_v37 = vsel %vm6092_vm5, 65537, %v8808_v3 }
  0xf3   : > { %8870 = vst [vmem:[#allocation64_spill] sm:$0xff] %v8869_v30  ;;  %v8874_v42 = vsel %vm6125_vm0, 4294967295, %v8873_v42  ;;  %vm6140_vm14 = vmand %vm8877_vm6, %vm8876_vm2  ;;  %vm8881_vm2 = vcmp.lt.f32.partialorder %v5909_v13, 8.0  ;;  %vm8882_vm15 = vcmp.ge.f32.partialorder %v5909_v13, 0.0  ;;  %vm8885_vm12 = vcmp.lt.f32.partialorder %v5912_v48, 8.0 }
  0xf4   : > { %8875 = vst [vmem:[#allocation65_spill] sm:$0xff] %v8874_v42  ;;  %v8879_v32 = vsel %vm6140_vm14, 4294967295, %v8878_v32  ;;  %vm6158_vm6 = vmand %vm8882_vm15, %vm8881_vm2  ;;  %vm8886_vm8 = vcmp.ge.f32.partialorder %v5912_v48, 0.0  ;;  %v6170_v4 = vrot.slane %v2401_v36, 7  ;;  %v6172_v23 = vrot.slane %v1051_v8, 5 }
  0xf5   : > { %8880 = vst [vmem:[#allocation66_spill] sm:$0xff] %v8879_v32  ;;  %v8884_v51 = vsel %vm6158_vm6, 4294967295, %v8883_v51  ;;  %vm6166_vm10 = vmand %vm8886_vm8, %vm8885_vm12  ;;  %v1057_v33 = vrot.slane %v1055_v15, 4  ;;  %v6174_v63 = vrot.slane %v1567_v7, 5  ;;  %vm8890_vm5 = vcmp.lt.f32.partialorder %v953_v39, 8.0 }
  0xf6   : > { %8889 = vst [vmem:[#allocation67_spill] sm:$0xff] %v6172_v23  ;;  %vm8891_vm2 = vcmp.ge.f32.partialorder %v953_v39, 0.0  ;;  %v1572_v61 = vrot.slane %v1570_v53, 4  ;;  %v6182_v27 = vrot.slane %v1576_v50, 5  ;;  %v1582_v48 = vrot.slane %v1580_v26, 4 }
  0xf7   : > { %vm6178_vm15 = vmand %vm8891_vm2, %vm8890_vm5  ;;  %v1861_v20 = vshrl.u32 %v6134_v0, 16  ;;  %vm8894_vm12 = vcmp.lt.f32.partialorder %v5326_v35, 8.0  ;;  %vm8895_vm8 = vcmp.ge.f32.partialorder %v5326_v35, 0.0  ;;  %v8896_v8 = vmov 0  ;;  %v6540_v7 = vld [vmem:[%s8342_s3] ss:$0 sm:$0xff] }
  0xf8   : > { %vm6189_vm3 = vmand %vm8895_vm8, %vm8894_vm12  ;;  %vm8899_vm5 = vcmp.ge.f32.partialorder %v5955_v19, 0.0  ;;  %vm8902_vm1 = vcmp.lt.f32.partialorder %v954_v17, 8.0  ;;  %vm8903_vm14 = vcmp.ge.f32.partialorder %v954_v17, 0.0  ;;  %v8904_v50 = vmov 0 }
  0xf9   : > { %v8897_v8 = vsel %vm6189_vm3, 4294967295, %v8896_v8  ;;  %vm6197_vm2 = vmand %vm8899_vm5, %vm968_vm13  ;;  %v6207_v15 = vrot.slane %v2410_v22, 7  ;;  %v2099_v35 = vshll.u32 %v2090_v37, 16  ;;  %v2102_v26 = vshrl.u32 %v2090_v37, 16 }
  0xfa   : > { %8898 = vst [vmem:[#allocation68_spill] sm:$0xff] %v8897_v8  ;;  %vm6203_vm0 = vmand %vm8903_vm14, %vm8902_vm1  ;;  %v8908_v36 = vshrl.u32 %v5651_v52, 16  ;;  %v6217_v39 = vrot.slane %v2115_v44, 4  ;;  %v6219_v17 = vrot.slane %v2125_v55, 4  ;;  %v6221_v22 = vrot.slane %v2128_v62, 5 }
  0xfb   : > { %v8905_v50 = vsel %vm6203_vm0, 4294967295, %v8904_v50  ;;  %8907 = vst [vmem:[#allocation70_spill] sm:$0xff] %v6207_v15  ;;  %vm995_vm13 = vmand %vm6115_vm9, %vm6166_vm10  ;;  %v2132_v53 = vshrl.u32 %v6024_v34, 16  ;;  %v2399_v14 = vrot.slane %v6147_v1, 4  ;;  %v2406_v40 = vor.u32 %v2404_v11, %v6170_v4  ;;  %v4714_v11 = vld [vmem:[#allocation10 + $0x80] sm:$0xff]  }
  0xfc   : > { %8906 = vst [vmem:[#allocation69_spill] sm:$0xff] %v8905_v50  ;;  %v1087_v19 = vrot.slane %v8908_v36, 4  ;;  %vm6224_vm1 = vmpackc.low %vm995_vm13, %vm995_vm13  ;;  %v1058_v9 = vor.u32 %v1057_v33, %v6172_v23  ;;  %v2396_v52 = vshll.u32 %v6058_v29, 16  ;;  %v2408_v55 = vrot.slane %v6170_v4, 4  ;;  %v4715_v33 = vld [vmem:[#allocation10 + $0x178] sm:$0xff]   ;;  %4364 = vmatpush3.bf16.msra.mxu0 %v4714_v11 }
  0xfd   : > { %vm1294_vm14 = vmand %vm6106_vm11, %vm6178_vm15  ;;  %v1573_v34 = vor.u32 %v1572_v61, %v6174_v63  ;;  %v1583_v62 = vor.u32 %v1582_v48, %v6182_v27  ;;  %v1863_v44 = vrot.slane %v1861_v20, 7  ;;  %v2415_v29 = vor.u32 %v2413_v16, %v6207_v15  ;;  %4389 = vmatprep.subr.bf16.mxu1 %v4715_v33  ;;  %v1517_v16 = vld [vmem:[#allocation2 + $0x4] sm:$0x8] }
  0xfe   : > { %vm1295_vm5 = vmand %vm6115_vm9, %vm6203_vm0  ;;  %v6244_v36 = vrot.slane %v2099_v35, 5  ;;  %v2104_v23 = vrot.slane %v2102_v26, 4  ;;  %v1088_v61 = vor.u32 %v1087_v19, %v5786_v5  ;;  %v8914_v20 = vrot.slane %v5930_v38, 4 }
  0xff   : > { %vm6246_vm13 = vmpackc.low %vm1294_vm14, %vm1294_vm14  ;;  %vm8915_vm14 = vcmp.lt.f32.partialorder %v5679_v60, 8.0  ;;  %vm8916_vm12 = vcmp.ge.f32.partialorder %v5679_v60, 0.0  ;;  %v8917_v38 = vmov 0  ;;  %v8922_v35 = vshrl.u32 %v5826_v59, 16 }
 0x100   : > { %8911 = vst [vmem:[#allocation71_spill] sm:$0xff] %v6244_v36  ;;  %v6256_v4 = vsel %vm5761_vm4, %v8914_v20, %v6053_v47  ;;  %vm6270_vm8 = vmand %vm8916_vm12, %vm8915_vm14  ;;  %v8920_v47 = vmov 0  ;;  %v6280_v19 = vrot.slane %v1058_v9, 4  ;;  %v1864_v20 = vshll.u32 %v6134_v0, 16 }
 0x101   : > { %v8918_v38 = vsel %vm6270_vm8, 4294967295, %v8917_v38  ;;  %vm6274_vm9 = vmpackc.low %vm1295_vm5, %vm1295_vm5  ;;  %v1612_v26 = vrot.slane %v8922_v35, 4  ;;  %v6284_v48 = vor.u32 %v2396_v52, %v6147_v1  ;;  %vm8924_vm12 = vcmp.lt.f32.partialorder %v5699_v12, 8.0 }
 0x102   : > { %8919 = vst [vmem:[#allocation72_spill] sm:$0xff] %v8918_v38  ;;  %v8921_v47 = vsel %vm6274_vm9, 4294967295, %v8920_v47  ;;  %vm8925_vm14 = vcmp.ge.f32.partialorder %v5699_v12, 0.0  ;;  %v8926_v60 = vmov 0  ;;  %v1027_v59 = vsel %vm6224_vm1, 65537, %v8808_v3 }
 0x103   : > { %8923 = vst [vmem:[#allocation73_spill] sm:$0xff] %v6284_v48  ;;  %vm6290_vm5 = vmand %vm8925_vm14, %vm8924_vm12  ;;  %vm8929_vm11 = vnez %v8874_v42  ;;  %v6303_v9 = vsel %vm5761_vm4, %v2399_v14, %v2406_v40  ;;  %v6305_v0 = vrot.slane %v1573_v34, 4  ;;  %v6307_v12 = vrot.slane %v1583_v62, 4 }
 0x104   : > { %v8927_v60 = vsel %vm6290_vm5, 4294967295, %v8926_v60  ;;  %vm1532_vm8 = vmand %vm8929_vm11, %vm6158_vm6  ;;  %v1867_v1 = vrot.slane %v1863_v44, 4  ;;  %vm8930_vm12 = vcmp.lt.f32.partialorder %v5743_v58, 8.0  ;;  %vm8931_vm14 = vcmp.ge.f32.partialorder %v5743_v58, 0.0 }
 0x105   : > { %8928 = vst [vmem:[#allocation74_spill] sm:$0xff] %v8927_v60  ;;  %vm6313_vm5 = vmand %vm8931_vm14, %vm8930_vm12  ;;  %v8932_v37 = vmov 0  ;;  %vm8935_vm1 = vnez %v8879_v32  ;;  %v6323_v14 = vsel %vm5761_vm4, %v2408_v55, %v2415_v29  ;;  %v2105_v40 = vor.u32 %v2104_v23, %v6244_v36  ;;  %v8956_v32 = vld [vmem:[#allocation34_spill] sm:$0xff] }
 0x106   : > { %v8933_v37 = vsel %vm6313_vm5, 4294967295, %v8932_v37  ;;  %vm1533_vm6 = vmand %vm8935_vm1, %vm6166_vm10  ;;  %v6330_v58 = vrot.slane %v1088_v61, 4  ;;  %v2134_v34 = vrot.slane %v2132_v53, 4  ;;  %v1101_v62 = vshll.u32 %v1027_v59, 16 }
 0x107   : > { %8934 = vst [vmem:[#allocation75_spill] sm:$0xff] %v8933_v37  ;;  %vm6326_vm9 = vmpackc.low %vm1532_vm8, %vm1532_vm8  ;;  %v1105_v11 = vshrl.u32 %v1027_v59, 16  ;;  %v1613_v35 = vor.u32 %v1612_v26, %v5946_v21  ;;  %v6342_v55 = vor.u32 %v1864_v20, %v1863_v44  ;;  %v6361_v26 = vsel %vm5761_vm4, %v1867_v1, %v6034_v10 }
 0x108   : > { %vm6332_vm12 = vmpackc.low %vm1533_vm6, %vm1533_vm6  ;;  %8941 = vst [vmem:[#allocation77_spill] sm:$0xff] %v6361_v26  ;;  %vm8942_vm8 = vcmp.lt.f32.partialorder %v5755_v24, 8.0  ;;  %vm8943_vm6 = vcmp.ge.f32.partialorder %v5755_v24, 0.0  ;;  %v8944_v20 = vmov 0  ;;  %v1564_v59 = vsel %vm6326_vm9, 65537, %v8808_v3  ;;  %v9018_v26 = vld [vmem:[#allocation54_spill] sm:$0xff] }
 0x109   : > { %8940 = vst [vmem:[#allocation76_spill] sm:$0xff] %v6342_v55  ;;  %vm6367_vm14 = vmand %vm8943_vm6, %vm8942_vm8  ;;  %v6378_v44 = vrot.slane %v2105_v40, 4  ;;  %v6383_v10 = vsel %vm6246_vm13, 65537, %v8808_v3  ;;  %v2135_v24 = vor.u32 %v2134_v34, %v6221_v22  ;;  %vm8948_vm9 = vcmp.ne.s16.totalorder %v6174_v63, 0 }
 0x10a   : > { %v8945_v20 = vsel %vm6367_vm14, 4294967295, %v8944_v20  ;;  %vm1826_vm5 = vmand %vm8929_vm11, %vm6178_vm15  ;;  %v1654_v1 = vsel %vm8948_vm9, %v1517_v16, 0  ;;  %v6392_v52 = vrot.slane %v1101_v62, 5  ;;  %v1107_v61 = vrot.slane %v1105_v11, 4  ;;  %v4722_v11 = vld [vmem:[#allocation10 + $0x1f8] sm:$0xff]  }
 0x10b   : > { %8946 = vst [vmem:[#allocation78_spill] sm:$0xff] %v8945_v20  ;;  %8947 = vst [vmem:[#allocation79_spill] sm:$0xff] %v6378_v44  ;;  %vm8949_vm8 = vnez %v8921_v47  ;;  %v6403_v57 = vrot.slane %v1613_v35, 4  ;;  %v1565_v63 = vsel %vm6332_vm12, 65537, %v8808_v3  ;;  %v1626_v16 = vshll.u32 %v1564_v59, 16  ;;  %4429 = vmatprep.subr.bf16.mxu0 %v4722_v11 }
 0x10c   : > { %vm1827_vm6 = vmand %vm8935_vm1, %vm6203_vm0  ;;  %v1327_v40 = vsel %vm8949_vm8, 65537, %v8808_v3  ;;  %v1630_v34 = vshrl.u32 %v1564_v59, 16  ;;  %v1382_v23 = vshrl.u32 %v6383_v10, 16  ;;  %v6419_v35 = vadd.f32 -1.0, %v5374_v6 }
 0x10d   : > { %vm8950_vm13 = vmand %vm6189_vm3, %vm6197_vm2  ;;  %v6422_v33 = vadd.f32 -1.0, %v5342_v49  ;;  %v1664_v59 = vshrl.u32 %v1654_v1, 16  ;;  %v1391_v47 = vshrl.u32 %v1327_v40, 16  ;;  %vm8958_vm12 = vnez %v8918_v38 }
 0x10e   : > { %vm1849_vm11 = vmpackc.low %vm8950_vm13, %vm8950_vm13  ;;  %v6435_v6 = vrot.slane %v2135_v24, 4  ;;  %v1108_v49 = vor.u32 %v1107_v61, %v6392_v52  ;;  %v1636_v1 = vshll.u32 %v1565_v63, 16  ;;  %vm8959_vm13 = vnez %v8884_v51 }
 0x10f   : > { %vm6408_vm9 = vmpackc.low %vm1826_vm5, %vm1826_vm5  ;;  %8955 = vst [vmem:[#allocation80_spill] sm:$0xff] %v6422_v33  ;;  %v6429_v50 = vsel %vm1849_vm11, 65537, %v8808_v3  ;;  %vm8957_vm5 = vnez %v8956_v32  ;;  %vm8960_vm11 = vnez %v8927_v60  ;;  %v8961_v53 = vshll.u32 %v5706_v43, 16  ;;  %v8976_v60 = vld [vmem:[#allocation63_spill] sm:$0xff] }
 0x110   : > { %vm6414_vm8 = vmpackc.low %vm1827_vm6, %vm1827_vm6  ;;  %v1858_v42 = vsel %vm6408_vm9, 65537, %v8808_v3  ;;  %v6450_v24 = vrot.slane %v1626_v16, 5  ;;  %v1632_v11 = vrot.slane %v1630_v34, 4  ;;  %v1640_v15 = vshrl.u32 %v1565_v63, 16 }
 0x111   : > { %vm2063_vm6 = vmand %vm8958_vm12, %vm8957_vm5  ;;  %v6448_v30 = vor.u32 %v8961_v53, %v5818_v2  ;;  %v1859_v61 = vsel %vm6414_vm8, 65537, %v8808_v3  ;;  %vm8963_vm9 = vnez %v8933_v37  ;;  %v1384_v62 = vrot.slane %v1382_v23, 7 }
 0x112   : > { %vm2064_vm0 = vmand %vm8960_vm11, %vm8959_vm13  ;;  %v1905_v33 = vshrl.u32 %v6429_v50, 16  ;;  %v1385_v43 = vshll.u32 %v6383_v10, 16  ;;  %v6461_v2 = vrot.slane %v1664_v59, 11  ;;  %v6463_v53 = vrot.slane %v1391_v47, 7  ;;  %v8970_v59 = vld [vmem:[#allocation37_spill] sm:$0xff] }
 0x113   : > { %8962 = vst [vmem:[#allocation34_spill] sm:$0xff] %v6448_v30  ;;  %vm2065_vm1 = vmand %vm8963_vm9, %vm6166_vm10  ;;  %v1394_v63 = vshll.u32 %v1327_v40, 16  ;;  %v1914_v16 = vshrl.u32 %v1858_v42, 16  ;;  %v1923_v34 = vshrl.u32 %v1859_v61, 16  ;;  %v6471_v48 = vrot.slane %v1108_v49, 4 }
 0x114   : > { %vm2087_vm3 = vmpackc.low %vm2063_vm6, %vm2063_vm6  ;;  %8964 = vst [vmem:[#allocation81_spill] sm:$0xff] %v6461_v2  ;;  %v1633_v10 = vor.u32 %v1632_v11, %v6450_v24  ;;  %v6474_v47 = vrot.slane %v1636_v1, 5  ;;  %v1642_v40 = vrot.slane %v1640_v15, 4  ;;  %v1389_v2 = vrot.slane %v1384_v62, 4 }
 0x115   : > { %8965 = vst [vmem:[#allocation82_spill] sm:$0xff] %v6463_v53  ;;  %vm2088_vm5 = vmpackc.low %vm2064_vm0, %vm2064_vm0  ;;  %v2095_v29 = vsel %vm2087_vm3, 65537, %v8808_v3  ;;  %vm8971_vm0 = vnez %v8970_v59  ;;  %v1907_v56 = vrot.slane %v1905_v33, 7  ;;  %v1916_v49 = vrot.slane %v1914_v16, 7 }
 0x116   : > { %vm6466_vm8 = vmpackc.low %vm2065_vm1, %vm2065_vm1  ;;  %v2096_v23 = vsel %vm2088_vm5, 65537, %v8808_v3  ;;  %v2148_v37 = vshll.u32 %v2095_v29, 16  ;;  %v2152_v30 = vshrl.u32 %v2095_v29, 16  ;;  %8968 = vst [vmem:[#allocation83_spill] sm:$0xff] %v6471_v48  ;;  %v1917_v29 = vshll.u32 %v1858_v42, 16 }
 0x117   : > { %8969 = vst [vmem:[#allocation84_spill] sm:$0xff] %v6474_v47  ;;  %vm2356_vm3 = vmand %vm6367_vm14, %vm8971_vm0  ;;  %v2158_v44 = vshll.u32 %v2096_v23, 16  ;;  %v2162_v36 = vshrl.u32 %v2096_v23, 16  ;;  %v1396_v15 = vor.u32 %v1394_v63, %v6463_v53  ;;  %v6492_v23 = vrot.slane %v1923_v34, 7 }
 0x118   : > { %vm2357_vm10 = vmand %vm8958_vm12, %vm6197_vm2  ;;  %v6484_v11 = vrot.slane %v2148_v37, 5  ;;  %v2154_v1 = vrot.slane %v2152_v30, 4  ;;  %v1926_v48 = vshll.u32 %v1859_v61, 16  ;;  %v6494_v38 = vrot.slane %v1633_v10, 4 }
 0x119   : > { %vm2358_vm1 = vmand %vm8960_vm11, %vm6178_vm15  ;;  %8973 = vst [vmem:[#allocation85_spill] sm:$0xff] %v6492_v23  ;;  %v1643_v42 = vor.u32 %v1642_v40, %v6474_v47  ;;  %v1908_v13 = vshll.u32 %v6429_v50, 16  ;;  %v2097_v37 = vsel %vm6466_vm8, 65537, %v8808_v3  ;;  %v6504_v63 = vrot.slane %v2158_v44, 5 }
 0x11a   : > { %8972 = vst [vmem:[#allocation37_spill] sm:$0xff] %v6484_v11  ;;  %vm2380_vm5 = vmpackc.low %vm2356_vm3, %vm2356_vm3  ;;  %v2164_v16 = vrot.slane %v2162_v36, 4  ;;  %v1912_v34 = vrot.slane %v1907_v56, 4  ;;  %v1919_v10 = vor.u32 %v1917_v29, %v1916_v49  ;;  %v2155_v40 = vor.u32 %v2154_v1, %v6484_v11  ;;  %v8979_v1 = vld [vmem:[#allocation30_spill] sm:$0xff] }
 0x11b   : > { %8974 = vst [vmem:[#allocation86_spill] sm:$0xff] %v6494_v38  ;;  %vm2381_vm6 = vmpackc.low %vm2357_vm10, %vm2357_vm10  ;;  %v6498_v30 = vsel %vm2380_vm5, 65537, %v8808_v3  ;;  %vm8977_vm3 = vnez %v8976_v60  ;;  %v1921_v50 = vrot.slane %v1916_v49, 4  ;;  %v1928_v25 = vor.u32 %v1926_v48, %v6492_v23 }
 0x11c   : > { %8975 = vst [vmem:[#allocation87_spill] sm:$0xff] %v6504_v63  ;;  %vm2382_vm15 = vmpackc.low %vm2358_vm1, %vm2358_vm1  ;;  %v2389_v61 = vsel %vm2381_vm6, 65537, %v8808_v3  ;;  %v2428_v33 = vshrl.u32 %v6498_v30, 16  ;;  %v6517_v53 = vsel %vm5761_vm4, %v1389_v2, %v1396_v15  ;;  %v2168_v51 = vshll.u32 %v2097_v37, 16 }
 0x11d   : > { %vm994_vm10 = vmand %vm8977_vm3, %vm8959_vm13  ;;  %v2390_v44 = vsel %vm2382_vm15, 65537, %v8808_v3  ;;  %v2437_v36 = vshrl.u32 %v2389_v61, 16  ;;  %8978 = vst [vmem:[#allocation88_spill] sm:$0xff] %v6517_v53  ;;  %vm8980_vm13 = vnez %v8979_v1  ;;  %v6527_v48 = vor.u32 %v1385_v43, %v1384_v62 }
 0x11e   : > { %vm1018_vm8 = vmpackc.low %vm994_vm10, %vm994_vm10  ;;  %v6529_v49 = vrot.slane %v1643_v42, 4  ;;  %v2165_v23 = vor.u32 %v2164_v16, %v6504_v63  ;;  %v2172_v60 = vshrl.u32 %v2097_v37, 16  ;;  %v6542_v29 = vrot.slane %v2155_v40, 4 }
 0x11f   : > { %vm1293_vm1 = vmand %vm8980_vm13, %vm6197_vm2  ;;  %v1026_v2 = vsel %vm1018_vm8, 65537, %v8808_v3  ;;  %v6544_v62 = vrot.slane %v2428_v33, 7  ;;  %v2446_v43 = vshrl.u32 %v2390_v44, 16  ;;  %vm8985_vm2 = vnez %v8956_v32 }
 0x120   : > { %8981 = vst [vmem:[#allocation89_spill] sm:$0xff] %v6529_v49  ;;  %vm6533_vm5 = vmpackc.low %vm1293_vm1, %vm1293_vm1  ;;  %vm8986_vm6 = vnez %v8897_v8  ;;  %v6550_v42 = vor.u32 %v1908_v13, %v1907_v56  ;;  %v6554_v37 = vsel %vm5761_vm4, %v1912_v34, %v1919_v10  ;;  %v6558_v16 = vsel %vm5761_vm4, %v1921_v50, %v1928_v25  ;;  %v8990_v13 = vld [vmem:[#allocation39_spill] sm:$0xff]  ;;  %v6573_v10 = vld [vmem:[%s8343_s4] ss:$0 sm:$0xff] }
 0x121   : > { %8984 = vst [vmem:[#allocation90_spill] sm:$0xff] %v6542_v29  ;;  %vm1531_vm15 = vmand %vm8986_vm6, %vm8985_vm2  ;;  %v6560_v40 = vrot.slane %v2437_v36, 7  ;;  %v2440_v33 = vshll.u32 %v2389_v61, 16  ;;  %v6562_v11 = vrot.slane %v2168_v51, 5  ;;  %v1091_v32 = vshll.u32 %v1026_v2, 16  ;;  %v8997_v29 = vld [vmem:[#allocation33_spill] sm:$0xff] }
 0x122   : > { %8987 = vst [vmem:[#allocation91_spill] sm:$0xff] %v6554_v37  ;;  %8988 = vst [vmem:[#allocation92_spill] sm:$0xff] %v6558_v16  ;;  %v1095_v8 = vshrl.u32 %v1026_v2, 16  ;;  %vm8991_vm8 = vnez %v8990_v13  ;;  %v6575_v61 = vrot.slane %v2165_v23, 4  ;;  %v6577_v50 = vrot.slane %v2172_v60, 4 }
 0x123   : > { %vm1555_vm10 = vmpackc.low %vm1531_vm15, %vm1531_vm15  ;;  %8989 = vst [vmem:[#allocation93_spill] sm:$0xff] %v6562_v11  ;;  %v6582_v25 = vsel %vm6533_vm5, 65537, %v8808_v3  ;;  %v6589_v2 = vrot.slane %v2446_v43, 7  ;;  %v2449_v16 = vshll.u32 %v2390_v44, 16  ;;  %v2442_v23 = vor.u32 %v2440_v33, %v6560_v40  ;;  %v9004_v43 = vld [vmem:[#allocation46_spill] sm:$0xff]  ;;  %v9007_v11 = vld [vmem:[#allocation49_spill] sm:$0xff] }
 0x124   : > { %v1563_v56 = vsel %vm1555_vm10, 65537, %v8808_v3  ;;  %vm1824_vm1 = vmand %vm8991_vm8, %vm8971_vm0  ;;  %8992 = vst [vmem:[#allocation94_spill] sm:$0xff] %v6575_v61  ;;  %v6606_v63 = vrot.slane %v1091_v32, 5  ;;  %v1373_v33 = vshrl.u32 %v6582_v25, 16  ;;  %vm8998_vm10 = vnez %v8997_v29 }
 0x125   : > { %8993 = vst [vmem:[#allocation95_spill] sm:$0xff] %v6577_v50  ;;  %8994 = vst [vmem:[#allocation96_spill] sm:$0xff] %v6589_v2  ;;  %v1616_v15 = vshll.u32 %v1563_v56, 16  ;;  %v1620_v50 = vshrl.u32 %v1563_v56, 16  ;;  %v2444_v32 = vrot.slane %v6560_v40, 4  ;;  %v1376_v37 = vshll.u32 %v6582_v25, 16 }
 0x126   : > { %vm6601_vm5 = vmpackc.low %vm1824_vm1, %vm1824_vm1  ;;  %vm9026_vm11 = vcmp.lt.f32.partialorder %v6419_v35, 8.0  ;;  %vm9027_vm12 = vcmp.ge.f32.partialorder %v6419_v35, 0.0 }
 0x127   : > { %vm2062_vm2 = vmand %vm6367_vm14, %vm8998_vm10  ;;  %v6622_v29 = vrot.slane %v1616_v15, 5  ;;  %v1622_v20 = vrot.slane %v1620_v50, 4  ;;  %v1856_v40 = vsel %vm6601_vm5, 65537, %v8808_v3  ;;  %v1375_v15 = vrot.slane %v1373_v33, 7 }
 0x128   : > { %vm6633_vm0 = vmpackc.low %vm2062_vm2, %vm2062_vm2  ;;  %vm9005_vm2 = vnez %v9004_v43  ;;  %v1896_v47 = vshrl.u32 %v1856_v40, 16 }
 0x129   : > { %vm6702_vm14 = vmand %vm9027_vm12, %vm9026_vm11  ;;  %v1378_v35 = vor.u32 %v1376_v37, %v1375_v15 }
 0x16a   : > { %v4511_v1 = vpop.f32.mrf.mxu0 }
 0x16b   : > { %v661_v34 = vmul.f32 %v4511_v1, %v6540_v7  ;;  %v2435_v1 = vrot.slane %v6544_v62, 4 }
 0x16c   : > { %v621_v36 = vpop.f32.mrf.mxu0 }
 0x16d   : > { %v659_v60 = vmul.f32 %v6540_v7, %v621_v36  ;;  %v676_v44 = vadd.f32 %v6573_v10, %v661_v34  ;;  %v1097_v36 = vrot.slane %v1095_v8, 4  ;;  %v2451_v8 = vor.u32 %v2449_v16, %v6589_v2 }
 0x16e   : > { %v4512_v51 = vpop.f32.mrf.mxu0  ;;  %v1898_v34 = vrot.slane %v1896_v47, 7 }
 0x16f   : > { %v674_v59 = vadd.f32 %v6573_v10, %v659_v60  ;;  %v662_v56 = vmul.f32 %v4512_v51, %v6540_v7  ;;  %v6628_v51 = vsel %vm5761_vm4, %v2435_v1, %v2442_v23  ;;  %v684_v16 = vmax.f32 %v676_v44, 0.0  ;;  %v9006_v44 = vld [vmem:[#allocation50_spill] sm:$0xff] }
 0x170   : > { %v624_v13 = vpop.f32.mrf.mxu0  ;;  %8999 = vst [vmem:[#allocation33_spill] sm:$0xff] %v6628_v51  ;;  %v1098_v50 = vor.u32 %v1097_v36, %v6606_v63  ;;  %v9002_v51 = vld [vmem:[#allocation35_spill] sm:$0xff]  ;;  %v9008_v61 = vsel %vm8848_vm7, %v9006_v44, %v9007_v11  ;;  %v1899_v11 = vshll.u32 %v1856_v40, 16  ;;  %v9049_v36 = vsel %vm8848_vm7, %v6280_v19, %v5629_v31 }
 0x171   : > { %v677_v49 = vadd.f32 %v6573_v10, %v662_v56  ;;  %v660_v60 = vmul.f32 %v6540_v7, %v624_v13  ;;  %v682_v13 = vmax.f32 %v674_v59, 0.0  ;;  %vm9003_vm1 = vnez %v9002_v51  ;;  %v9030_v51 = vld [vmem:[#allocation58_spill] sm:$0xff] }
 0x172   : > { %v4515_v25 = vpop.f32.mrf.mxu0  ;;  %vm6650_vm10 = vcmp.ne.s16.totalorder %v9008_v61, 0  ;;  %v1623_v56 = vor.u32 %v1622_v20, %v6622_v29  ;;  %v2094_v61 = vsel %vm6633_vm0, 65537, %v8808_v3  ;;  %vm9023_vm0 = vmand %vm9005_vm2, %vm9003_vm1 }
 0x173   : > { %v685_v2 = vmax.f32 %v677_v49, 0.0  ;;  %v675_v1 = vadd.f32 %v6573_v10, %v660_v60  ;;  %v665_v23 = vmul.f32 %v4515_v25, %v6540_v7  ;;  %v9011_v49 = vld [vmem:[#allocation53_spill] sm:$0xff]  ;;  %v9015_v60 = vld [vmem:[#allocation59_spill] sm:$0xff]  ;;  %vm6690_vm9 = vmpackc.low %vm9023_vm0, %vm9023_vm0 }
 0x174   : > { %v9012_v33 = vsel %vm8848_vm7, %v9011_v49, %v5786_v5  ;;  %v637_v25 = vpop.f32.mrf.mxu0  ;;  %v9016_v49 = vld [vmem:[#allocation60_spill] sm:$0xff]  ;;  %v6732_v37 = vsel %vm6690_vm9, 65537, %v8808_v3 }
 0x175   : > { %vm6659_vm15 = vcmp.ne.s16.totalorder %v9012_v33, 0  ;;  %v4281_v44 = vpack.c.bf16 %v685_v2, %v684_v16  ;;  %v683_v38 = vmax.f32 %v675_v1, 0.0  ;;  %v680_v53 = vadd.f32 %v6573_v10, %v665_v23  ;;  %v9017_v33 = vld [vmem:[#allocation57_spill] sm:$0xff] }
 0x176   : > { %v663_v5 = vmul.f32 %v6540_v7, %v637_v25  ;;  %v9019_v55 = vsel %vm8848_vm7, %v9017_v33, %v9018_v26  ;;  %v4516_v40 = vpop.f32.mrf.mxu0  ;;  %v6682_v2 = vsel %vm5761_vm4, %v2444_v32, %v2451_v8  ;;  %v2138_v16 = vshll.u32 %v2094_v61, 16 }
 0x177   : > { %vm6676_vm5 = vcmp.ne.s16.totalorder %v9019_v55, 0  ;;  %9022 = vst [vmem:[#allocation35_spill] sm:$0xff] %v6682_v2  ;;  %v2142_v1 = vshrl.u32 %v2094_v61, 16  ;;  %4294 = vst [vmem:[#allocation2 + $0x10] sm:$0xff] %v4281_v44   ;;  %v4276_v55 = vpack.c.bf16 %v683_v38, %v682_v13  ;;  %v666_v32 = vmul.f32 %v4516_v40, %v6540_v7 }
 0x178   : > { %v678_v23 = vadd.f32 %v6573_v10, %v663_v5  ;;  %v6696_v8 = vrot.slane %v1098_v50, 4  ;;  %v9031_v25 = vsel %vm8848_vm7, %v9030_v51, %v5946_v21  ;;  %v640_v13 = vpop.f32.mrf.mxu0  ;;  %v1380_v61 = vrot.slane %v1375_v15, 4  ;;  %v9034_v51 = vld [vmem:[#allocation62_spill] sm:$0xff] }
 0x179   : > { %vm6711_vm1 = vcmp.ne.s16.totalorder %v9031_v25, 0  ;;  %v6719_v44 = vrot.slane %v1623_v56, 4  ;;  %4293 = vst [vmem:[#allocation2 + $0x8] sm:$0xff] %v4276_v55   ;;  %v688_v5 = vmax.f32 %v680_v53, 0.0  ;;  %v681_v33 = vadd.f32 %v6573_v10, %v666_v32  ;;  %v9035_v53 = vld [vmem:[#allocation56_spill] sm:$0xff] }
 0x17a   : > { %v664_v21 = vmul.f32 %v6540_v7, %v640_v13  ;;  %v1901_v40 = vor.u32 %v1899_v11, %v1898_v34  ;;  %v1903_v25 = vrot.slane %v1898_v34, 4  ;;  %v6725_v43 = vrot.slane %v2138_v16, 5 }
 0x17b   : > { %v6727_v2 = vrot.slane %v2142_v1, 4  ;;  %vm9036_vm0 = vnez %v9035_v53  ;;  %v686_v7 = vmax.f32 %v678_v23, 0.0  ;;  %v689_v15 = vmax.f32 %v681_v33, 0.0 }
 0x17c   : > { %vm988_vm6 = vmand %vm6702_vm14, %vm9036_vm0  ;;  %v679_v56 = vadd.f32 %v6573_v10, %v664_v21  ;;  %v9037_v34 = vsel %vm8848_vm7, %v6217_v39, %v6039_v46  ;;  %v9040_v1 = vsel %vm8848_vm7, %v6219_v17, %v6221_v22  ;;  %v9043_v26 = vrot.slane %v5837_v28, 4  ;;  %v9081_v17 = vld [vmem:[#allocation83_spill] sm:$0xff] }
 0x17d   : > { %vm6748_vm9 = vcmp.ne.s16.totalorder %v9037_v34, 0  ;;  %vm6757_vm11 = vcmp.ne.s16.totalorder %v9040_v1, 0  ;;  %v6771_v39 = vsel %vm5761_vm4, %v1380_v61, %v6527_v48  ;;  %v4291_v28 = vpack.c.bf16 %v689_v15, %v688_v5  ;;  %vm6789_vm12 = vmpackc.low %vm988_vm6, %vm988_vm6  ;;  %v9083_v15 = vld [vmem:[#allocation88_spill] sm:$0xff] }
 0x17e   : > { %v6766_v46 = vsel %vm5761_vm4, %v9043_v26, %v1378_v35  ;;  %v687_v55 = vmax.f32 %v679_v56, 0.0  ;;  %v983_v13 = vld [vmem:[#allocation2 + $0x10] sm:$0xf]  ;;  %v984_v35 = vld [vmem:[#allocation2 + $0x14] sm:$0xf]  ;;  %v9046_v5 = vrot.slane %v5986_v41, 4  ;;  %v6802_v21 = vsel %vm5761_vm4, %v1903_v25, %v6550_v42 }
 0x17f   : > { %v1282_v61 = vld [vmem:[#allocation2 + $0x10] sm:$0xf]  ;;  %v6812_v41 = vsel %vm6650_vm10, %v983_v13, 0  ;;  %v1283_v56 = vld [vmem:[#allocation2 + $0x14] sm:$0xf]  ;;  %vm9048_vm6 = vcmp.ne.s16.totalorder %v9015_v60, 0 }
 0x180   : > { %v6797_v33 = vsel %vm5761_vm4, %v9046_v5, %v1901_v40  ;;  %v6816_v40 = vsel %vm6659_vm15, %v984_v35, 0  ;;  %v1411_v42 = vsel %vm9048_vm6, %v1282_v61, 0  ;;  %4296 = vst [vmem:[#allocation2 + $0x20] sm:$0xff] %v4291_v28   ;;  %v4286_v25 = vpack.c.bf16 %v687_v55, %v686_v7  ;;  %v1520_v26 = vld [vmem:[#allocation2 + $0x10] sm:$0xf] }
 0x181   : > { %9047 = vst [vmem:[#allocation50_spill] sm:$0xff] %v6816_v40  ;;  %v1164_v34 = vshrl.u32 %v6812_v41, 16  ;;  %v1173_v1 = vshrl.u32 %v6816_v40, 16  ;;  %vm6828_vm15 = vcmp.ne.s16.totalorder %v9049_v36, 0  ;;  %v9052_v60 = vshll.u32 %v6498_v30, 16  ;;  %v9111_v40 = vld [vmem:[#allocation94_spill] sm:$0xff] }
 0x182   : > { %v6840_v7 = vsel %vm6789_vm12, 65537, %v8808_v3  ;;  %vm9053_vm10 = vcmp.ne.s16.totalorder %v9016_v49, 0  ;;  %v1447_v55 = vshll.u32 %v1411_v42, 16  ;;  %v1451_v35 = vshrl.u32 %v1411_v42, 16  ;;  %v1521_v31 = vld [vmem:[#allocation2 + $0x14] sm:$0xf] }
 0x183   : > { %v6835_v13 = vor.u32 %v9052_v60, %v6544_v62  ;;  %v1412_v28 = vsel %vm9053_vm10, %v1283_v56, 0  ;;  %v6846_v19 = vsel %vm6676_vm5, %v1520_v26, 0  ;;  %4295 = vst [vmem:[#allocation2 + $0x18] sm:$0xff] %v4286_v25   ;;  %v1813_v48 = vld [vmem:[#allocation2 + $0x10] sm:$0xf]  ;;  %v9054_v49 = vsel %vm8848_vm7, %v6305_v0, %v6182_v27 }
 0x184   : > { %v1457_v61 = vshll.u32 %v1412_v28, 16  ;;  %v1461_v5 = vshrl.u32 %v1412_v28, 16  ;;  %vm6855_vm12 = vcmp.ne.s16.totalorder %v9054_v49, 0  ;;  %v6859_v20 = vrot.slane %v1164_v34, 7  ;;  %v1814_v36 = vld [vmem:[#allocation2 + $0x14] sm:$0xf] }
 0x185   : > { %v6861_v42 = vrot.slane %v1173_v1, 7  ;;  %v6865_v25 = vsel %vm6711_vm1, %v1521_v31, 0  ;;  %v1687_v26 = vshrl.u32 %v6846_v19, 16  ;;  %v9058_v27 = vsel %vm8848_vm7, %v6307_v12, %v5788_v18  ;;  %v2051_v28 = vld [vmem:[#allocation2 + $0x10] sm:$0xf] }
 0x186   : > { %vm6873_vm5 = vcmp.ne.s16.totalorder %v9058_v27, 0  ;;  %v6877_v34 = vrot.slane %v1447_v55, 5  ;;  %v6879_v1 = vrot.slane %v1451_v35, 4  ;;  %v6881_v60 = vrot.slane %v1457_v61, 5  ;;  %v9062_v31 = vld [vmem:[#allocation76_spill] sm:$0xff]  ;;  %v9066_v35 = vld [vmem:[#allocation77_spill] sm:$0xff] }
 0x187   : > { %9057 = vst [vmem:[#allocation49_spill] sm:$0xff] %v6861_v42  ;;  %v1696_v38 = vshrl.u32 %v6865_v25, 16  ;;  %vm1931_vm1 = vcmp.ne.s16.totalorder %v9062_v31, 0  ;;  %v6885_v49 = vrot.slane %v1461_v5, 4  ;;  %vm9064_vm6 = vcmp.ne.s16.totalorder %v9034_v51, 0 }
 0x188   : > { %9061 = vst [vmem:[#allocation53_spill] sm:$0xff] %v6881_v60  ;;  %v1942_v18 = vsel %vm9064_vm6, %v1813_v48, 0  ;;  %vm9065_vm10 = vcmp.ne.s16.totalorder %v6256_v4, 0  ;;  %v2052_v55 = vld [vmem:[#allocation2 + $0x14] sm:$0xf]  ;;  %v6893_v61 = vrot.slane %v1687_v26, 7 }
 0x189   : > { %9063 = vst [vmem:[#allocation59_spill] sm:$0xff] %v6885_v49  ;;  %v1943_v12 = vsel %vm9065_vm10, %v1814_v36, 0  ;;  %v1969_v27 = vshll.u32 %v1942_v18, 16  ;;  %v1973_v30 = vshrl.u32 %v1942_v18, 16  ;;  %v2344_v23 = vld [vmem:[#allocation2 + $0x10] sm:$0xf] }
 0x18a   : > { %v1979_v32 = vshll.u32 %v1943_v12, 16  ;;  %v1983_v53 = vshrl.u32 %v1943_v12, 16  ;;  %v6897_v5 = vsel %vm6748_vm9, %v2051_v28, 0  ;;  %v6901_v51 = vsel %vm6757_vm11, %v2052_v55, 0  ;;  %v2345_v4 = vld [vmem:[#allocation2 + $0x14] sm:$0xf] }
 0x18b   : > { %9067 = vst [vmem:[#allocation60_spill] sm:$0xff] %v6897_v5  ;;  %9068 = vst [vmem:[#allocation57_spill] sm:$0xff] %v6901_v51  ;;  %vm9069_vm6 = vcmp.ne.s16.totalorder %v6303_v9, 0  ;;  %v9070_v36 = vld [vmem:[#allocation71_spill] sm:$0xff]  ;;  %v9072_v18 = vld [vmem:[#allocation61_spill] sm:$0xff]  ;;  %v6915_v16 = vrot.slane %v1696_v38, 7 }
 0x18c   : > { %v2473_v48 = vsel %vm9069_vm6, %v2344_v23, 0  ;;  %v9071_v26 = vld [vmem:[#allocation79_spill] sm:$0xff]  ;;  %v6918_v28 = vrot.slane %v1969_v27, 5  ;;  %v2210_v9 = vshrl.u32 %v6897_v5, 16  ;;  %v6921_v23 = vrot.slane %v1973_v30, 4 }
 0x18d   : > { %v9073_v62 = vsel %vm8848_vm7, %v9071_v26, %v9072_v18  ;;  %v6923_v55 = vrot.slane %v1979_v32, 5  ;;  %v6925_v22 = vrot.slane %v1983_v53, 4  ;;  %v2219_v26 = vshrl.u32 %v6901_v51, 16  ;;  %v9080_v18 = vld [vmem:[#allocation73_spill] sm:$0xff]  ;;  %v1518_v30 = vld [vmem:[#allocation2 + $0x8] sm:$0xf] }
 0x18e   : > { %vm6911_vm0 = vcmp.ne.s16.totalorder %v9073_v62, 0  ;;  %9076 = vst [vmem:[#allocation54_spill] sm:$0xff] %v6918_v28  ;;  %9077 = vst [vmem:[#allocation58_spill] sm:$0xff] %v6921_v23  ;;  %v982_v62 = vld [vmem:[#allocation2 + $0xc] sm:$0xf]  ;;  %vm2463_vm11 = vcmp.ne.s16.totalorder %v9080_v18, 0 }
 0x18f   : > { %9078 = vst [vmem:[#allocation62_spill] sm:$0xff] %v6923_v55  ;;  %9079 = vst [vmem:[#allocation56_spill] sm:$0xff] %v6925_v22  ;;  %vm9082_vm6 = vcmp.ne.s16.totalorder %v6323_v14, 0  ;;  %v2491_v10 = vshll.u32 %v2473_v48, 16  ;;  %v2495_v11 = vshrl.u32 %v2473_v48, 16  ;;  %v6936_v53 = vsel %vm6828_vm15, %v982_v62, 0 }
 0x190   : > { %v2474_v27 = vsel %vm9082_vm6, %v2345_v4, 0  ;;  %vm1406_vm10 = vcmp.ne.s16.totalorder %v9083_v15, 0  ;;  %v9084_v22 = vld [vmem:[#allocation82_spill] sm:$0xff]  ;;  %v6945_v14 = vrot.slane %v2210_v9, 7  ;;  %v6947_v4 = vrot.slane %v2219_v26, 7  ;;  %v9104_v60 = vld [vmem:[#allocation87_spill] sm:$0xff] }
 0x191   : > { %v2501_v32 = vshll.u32 %v2474_v27, 16  ;;  %v2505_v50 = vshrl.u32 %v2474_v27, 16  ;;  %v9085_v55 = vrot.slane %v9084_v22, 4  ;;  %v6949_v48 = vrot.slane %v2491_v10, 5  ;;  %v1519_v51 = vld [vmem:[#allocation2 + $0xc] sm:$0xf] }
 0x192   : > { %9088 = vst [vmem:[#allocation76_spill] sm:$0xff] %v6945_v14  ;;  %9089 = vst [vmem:[#allocation77_spill] sm:$0xff] %v6947_v4  ;;  %v1155_v27 = vshrl.u32 %v6936_v53, 16  ;;  %v6952_v59 = vrot.slane %v2495_v11, 4  ;;  %v6958_v22 = vsel %vm6855_vm12, %v1518_v30, 0  ;;  %v9093_v9 = vld [vmem:[#allocation86_spill] sm:$0xff] }
 0x193   : > { %vm6941_vm9 = vcmp.ne.s16.totalorder %v9085_v55, 0  ;;  %9090 = vst [vmem:[#allocation71_spill] sm:$0xff] %v6949_v48  ;;  %v6954_v62 = vrot.slane %v2501_v32, 5  ;;  %v2507_v38 = vrot.slane %v2505_v50, 4  ;;  %v9094_v55 = vld [vmem:[#allocation84_spill] sm:$0xff]  ;;  %v9098_v48 = vld [vmem:[#allocation89_spill] sm:$0xff]  ;;  %v9099_v32 = vor.u32 %v6727_v2, %v6725_v43 }
 0x194   : > { %9091 = vst [vmem:[#allocation79_spill] sm:$0xff] %v6952_v59  ;;  %v9095_v26 = vsel %vm8848_vm7, %v9093_v9, %v9094_v55  ;;  %v6973_v50 = vsel %vm6873_vm5, %v1519_v51, 0  ;;  %v1669_v56 = vshrl.u32 %v6958_v22, 16  ;;  %v1811_v30 = vld [vmem:[#allocation2 + $0x8] sm:$0xf]  ;;  %v6982_v55 = vrot.slane %v1155_v27, 7 }
 0x195   : > { %9092 = vst [vmem:[#allocation61_spill] sm:$0xff] %v6954_v62  ;;  %vm6965_vm15 = vcmp.ne.s16.totalorder %v9095_v26, 0  ;;  %v6979_v59 = vrot.slane %v9099_v32, 4  ;;  %v2508_v9 = vor.u32 %v2507_v38, %v6954_v62  ;;  %v1678_v26 = vshrl.u32 %v6973_v50, 16  ;;  %v1812_v4 = vld [vmem:[#allocation2 + $0xc] sm:$0xf] }
 0x196   : > { %v1940_v0 = vsel %vm1931_vm1, %v1811_v30, 0  ;;  %v9100_v51 = vld [vmem:[#allocation91_spill] sm:$0xff]  ;;  %vm9101_vm5 = vcmp.ne.s16.totalorder %v9066_v35, 0  ;;  %v9102_v14 = vld [vmem:[#allocation92_spill] sm:$0xff]  ;;  %v6992_v38 = vrot.slane %v1669_v56, 7  ;;  %v9103_v30 = vld [vmem:[#allocation90_spill] sm:$0xff] }
 0x197   : > { %v1941_v28 = vsel %vm9101_vm5, %v1812_v4, 0  ;;  %v1950_v2 = vshrl.u32 %v1940_v0, 16  ;;  %v1953_v32 = vshll.u32 %v1940_v0, 16  ;;  %v2049_v5 = vld [vmem:[#allocation2 + $0x8] sm:$0x8]  ;;  %v9105_v11 = vsel %vm8848_vm7, %v9103_v30, %v9104_v60  ;;  %v9112_v60 = vld [vmem:[#allocation93_spill] sm:$0xff] }
 0x198   : > { %v1959_v62 = vshll.u32 %v1941_v28, 16  ;;  %v1963_v49 = vshrl.u32 %v1941_v28, 16  ;;  %v2050_v31 = vld [vmem:[#allocation2 + $0xc] sm:$0xf]  ;;  %vm7000_vm1 = vcmp.ne.s16.totalorder %v9105_v11, 0  ;;  %v7004_v4 = vrot.slane %v2508_v9, 4 }
 0x199   : > { %v7006_v0 = vrot.slane %v1678_v26, 7  ;;  %vm9109_vm5 = vcmp.ne.s16.totalorder %v9070_v36, 0  ;;  %v7012_v28 = vsel %vm6911_vm0, %v2050_v31, 0  ;;  %v2343_v27 = vld [vmem:[#allocation2 + $0xc] sm:$0xf]  ;;  %v9113_v11 = vsel %vm8848_vm7, %v9111_v40, %v9112_v60 }
 0x19a   : > { %9108 = vst [vmem:[#allocation73_spill] sm:$0xff] %v7004_v4  ;;  %v2186_v56 = vsel %vm9109_vm5, %v2049_v5, 0  ;;  %9110 = vst [vmem:[#allocation83_spill] sm:$0xff] %v7012_v28  ;;  %vm7019_vm6 = vcmp.ne.s16.totalorder %v9113_v11, 0  ;;  %v7023_v9 = vrot.slane %v1950_v2, 4  ;;  %v7025_v26 = vrot.slane %v1953_v32, 5 }
 0x19b   : > { %v2196_v36 = vshrl.u32 %v2186_v56, 16  ;;  %v2201_v5 = vshrl.u32 %v7012_v28, 16  ;;  %v987_v12 = vld [vmem:[#allocation2 + $0x20] sm:$0xf]  ;;  %v7028_v31 = vrot.slane %v1959_v62, 5  ;;  %v7030_v4 = vrot.slane %v1963_v49, 4 }
 0x19c   : > { %9116 = vst [vmem:[#allocation88_spill] sm:$0xff] %v7023_v9  ;;  %9117 = vst [vmem:[#allocation82_spill] sm:$0xff] %v7025_v26  ;;  %v2472_v42 = vsel %vm2463_vm11, %v2343_v27, 0  ;;  %vm9120_vm0 = vcmp.ne.s16.totalorder %v9081_v17, 0  ;;  %v1286_v11 = vld [vmem:[#allocation2 + $0x20] sm:$0xf] }
 0x19d   : > { %9118 = vst [vmem:[#allocation86_spill] sm:$0xff] %v7028_v31  ;;  %9119 = vst [vmem:[#allocation84_spill] sm:$0xff] %v7030_v4  ;;  %v7036_v40 = vsel %vm9120_vm0, %v987_v12, 0  ;;  %v9121_v2 = vld [vmem:[#allocation33_spill] sm:$0xff]  ;;  %v9122_v32 = vld [vmem:[#allocation35_spill] sm:$0xff]  ;;  %v2482_v60 = vshrl.u32 %v2472_v42, 16 }
 0x19e   : > { %vm2468_vm5 = vcmp.ne.s16.totalorder %v9121_v2, 0  ;;  %v2485_v26 = vshll.u32 %v2472_v42, 16  ;;  %v1287_v62 = vld [vmem:[#allocation2 + $0x24] sm:$0x1]  ;;  %v9123_v31 = vld [vmem:[#allocation37_spill] sm:$0xff]  ;;  %v7045_v18 = vrot.slane %v2196_v36, 11  ;;  %v9125_v42 = vsel %vm8848_vm7, %v6330_v58, %v6606_v63 }
 0x19f   : > { %v1200_v17 = vshrl.u32 %v7036_v40, 16  ;;  %v1415_v27 = vsel %vm1406_vm10, %v1286_v11, 0  ;;  %v1416_v12 = vsel %vm6941_vm9, %v1287_v62, 0  ;;  %v1524_v4 = vld [vmem:[#allocation2 + $0x20] sm:$0xf]  ;;  %vm7057_vm11 = vcmp.ne.s16.totalorder %v9125_v42, 0 }
 0x1a0   : > { %9124 = vst [vmem:[#allocation89_spill] sm:$0xff] %v7045_v18  ;;  %v9128_v36 = vsel %vm8848_vm7, %v6696_v8, %v6392_v52  ;;  %v7071_v23 = vrot.slane %v2201_v5, 7  ;;  %v1487_v58 = vshll.u32 %v1415_v27, 16  ;;  %v1491_v63 = vshrl.u32 %v1415_v27, 16  ;;  %v1525_v62 = vld [vmem:[#allocation2 + $0x24] sm:$0xf] }
 0x1a1   : > { %vm7066_vm0 = vcmp.ne.s16.totalorder %v9128_v36, 0  ;;  %v7074_v42 = vrot.slane %v2482_v60, 4  ;;  %v7076_v49 = vshll.u32 %v1416_v12, 16  ;;  %v7080_v52 = vsel %vm6965_vm15, %v1524_v4, 0  ;;  %v1817_v36 = vld [vmem:[#allocation2 + $0x20] sm:$0xf] }
 0x1a2   : > { %9131 = vst [vmem:[#allocation91_spill] sm:$0xff] %v7071_v23  ;;  %9134 = vst [vmem:[#allocation87_spill] sm:$0xff] %v7080_v52  ;;  %vm9135_vm9 = vcmp.ne.s16.totalorder %v9098_v48, 0  ;;  %v7086_v5 = vrot.slane %v2485_v26, 5  ;;  %v7088_v18 = vrot.slane %v1200_v17, 7  ;;  %v7090_v11 = vrot.slane %v1487_v58, 5 }
 0x1a3   : > { %9132 = vst [vmem:[#allocation92_spill] sm:$0xff] %v7074_v42  ;;  %9133 = vst [vmem:[#allocation90_spill] sm:$0xff] %v7076_v49  ;;  %v7084_v8 = vsel %vm9135_vm9, %v1525_v62, 0  ;;  %v1723_v60 = vshrl.u32 %v7080_v52, 16  ;;  %v1818_v27 = vld [vmem:[#allocation2 + $0x24] sm:$0xf]  ;;  %v9141_v58 = vsel %vm8848_vm7, %v6403_v57, %v6622_v29 }
 0x1a4   : > { %9136 = vst [vmem:[#allocation94_spill] sm:$0xff] %v7084_v8  ;;  %9137 = vst [vmem:[#allocation33_spill] sm:$0xff] %v7086_v5  ;;  %v9138_v12 = vld [vmem:[#allocation80_spill] sm:$0xff]  ;;  %v7096_v10 = vrot.slane %v1491_v63, 4  ;;  %v1732_v4 = vshrl.u32 %v7084_v8, 16  ;;  %vm9140_vm9 = vcmp.ne.s16.totalorder %v9100_v51, 0  ;;  %v9145_v51 = vsel %vm8848_vm7, %v6719_v44, %v6450_v24 }
 0x1a5   : > { %v1946_v26 = vsel %vm9140_vm9, %v1817_v36, 0  ;;  %v2055_v17 = vld [vmem:[#allocation2 + $0x20] sm:$0xf]  ;;  %vm7107_vm10 = vcmp.ne.s16.totalorder %v9141_v58, 0  ;;  %vm9144_vm12 = vcmp.ne.s16.totalorder %v9102_v14, 0  ;;  %vm7119_vm9 = vcmp.ne.s16.totalorder %v9145_v51, 0 }
 0x1a6   : > { %9139 = vst [vmem:[#allocation35_spill] sm:$0xff] %v7096_v10  ;;  %v1947_v48 = vsel %vm9144_vm12, %v1818_v27, 0  ;;  %v2009_v5 = vshll.u32 %v1946_v26, 16  ;;  %v2013_v42 = vshrl.u32 %v1946_v26, 16  ;;  %v2056_v28 = vld [vmem:[#allocation2 + $0x24] sm:$0xf] }
 0x1a7   : > { %v2019_v29 = vshll.u32 %v1947_v48, 16  ;;  %v2023_v58 = vshrl.u32 %v1947_v48, 16  ;;  %v7126_v14 = vsel %vm7000_vm1, %v2055_v17, 0  ;;  %v2348_v27 = vld [vmem:[#allocation2 + $0x20] sm:$0xf]  ;;  %v7128_v26 = vrot.slane %v1723_v60, 7 }
 0x1a8   : > { %9148 = vst [vmem:[#allocation37_spill] sm:$0xff] %v7126_v14  ;;  %v7130_v63 = vrot.slane %v1732_v4, 7  ;;  %v7134_v24 = vsel %vm7019_vm6, %v2056_v28, 0  ;;  %v2246_v44 = vshrl.u32 %v7126_v14, 16  ;;  %v2349_v51 = vld [vmem:[#allocation2 + $0x24] sm:$0xf] }
 0x1a9   : > { %9149 = vst [vmem:[#allocation80_spill] sm:$0xff] %v7128_v26  ;;  %9151 = vst [vmem:[#allocation98_spill] sm:$0xff] %v7134_v24  ;;  %vm1935_vm12 = vcmp.ne.s16.totalorder %v6797_v33, 0  ;;  %v7139_v48 = vrot.slane %v2009_v5, 5  ;;  %v7141_v35 = vrot.slane %v2013_v42, 4  ;;  %v7143_v17 = vrot.slane %v2019_v29, 5 }
 0x1aa   : > { %9150 = vst [vmem:[#allocation97_spill] sm:$0xff] %v7130_v63  ;;  %v2255_v60 = vshrl.u32 %v7134_v24, 16  ;;  %v985_v4 = vld [vmem:[#allocation2 + $0x18] sm:$0xf]  ;;  %v9155_v57 = vld [vmem:[#allocation40_spill] sm:$0xff]  ;;  %v7148_v28 = vrot.slane %v2023_v58, 4  ;;  %v9159_v29 = vsel %vm8848_vm7, %v6435_v6, %v6725_v43 }
 0x1ab   : > { %9152 = vst [vmem:[#allocation99_spill] sm:$0xff] %v7139_v48  ;;  %9153 = vst [vmem:[#allocation100_spill] sm:$0xff] %v7141_v35  ;;  %v2477_v49 = vsel %vm2468_vm5, %v2348_v27, 0  ;;  %vm9157_vm15 = vcmp.ne.s16.totalorder %v9122_v32, 0  ;;  %v986_v5 = vld [vmem:[#allocation2 + $0x1c] sm:$0xf] }
 0x1ac   : > { %9154 = vst [vmem:[#allocation101_spill] sm:$0xff] %v7143_v17  ;;  %9156 = vst [vmem:[#allocation40_spill] sm:$0xff] %v7148_v28  ;;  %v7155_v42 = vsel %vm9157_vm15, %v2349_v51, 0  ;;  %vm7162_vm1 = vcmp.ne.s16.totalorder %v9159_v29, 0  ;;  %v7166_v58 = vrot.slane %v2246_v44, 7  ;;  %v2531_v30 = vshll.u32 %v2477_v49, 16 }
 0x1ad   : > { %9158 = vst [vmem:[#allocation102_spill] sm:$0xff] %v7155_v42  ;;  %v2535_v28 = vshrl.u32 %v2477_v49, 16  ;;  %v2541_v2 = vshll.u32 %v7155_v42, 16  ;;  %v1284_v27 = vld [vmem:[#allocation2 + $0x18] sm:$0xf]  ;;  %v7172_v51 = vsel %vm7057_vm11, %v985_v4, 0 }
 0x1ae   : > { %9162 = vst [vmem:[#allocation103_spill] sm:$0xff] %v7166_v58  ;;  %v7176_v6 = vsel %vm7066_vm0, %v986_v5, 0  ;;  %v1285_v43 = vld [vmem:[#allocation2 + $0x1c] sm:$0xf]  ;;  %vm9163_vm5 = vcmp.ne.s16.totalorder %v6766_v46, 0  ;;  %v9164_v29 = vld [vmem:[#allocation31_spill] sm:$0xff] }
 0x1af   : > { %v1413_v44 = vsel %vm9163_vm5, %v1284_v27, 0  ;;  %v7182_v49 = vrot.slane %v2255_v60, 7  ;;  %v7184_v35 = vrot.slane %v2531_v30, 5  ;;  %v1182_v4 = vshrl.u32 %v7172_v51, 16  ;;  %v1522_v32 = vld [vmem:[#allocation2 + $0x18] sm:$0xf] }
 0x1b0   : > { %v7188_v15 = vrot.slane %v2535_v28, 4  ;;  %v7190_v5 = vrot.slane %v2541_v2, 5  ;;  %v1191_v27 = vshrl.u32 %v7176_v6, 16  ;;  %v1523_v24 = vld [vmem:[#allocation2 + $0x1c] sm:$0xf]  ;;  %vm9169_vm11 = vcmp.ne.s16.totalorder %v6771_v39, 0 }
 0x1b1   : > { %9165 = vst [vmem:[#allocation31_spill] sm:$0xff] %v7182_v49  ;;  %9166 = vst [vmem:[#allocation104_spill] sm:$0xff] %v7184_v35  ;;  %v1414_v60 = vsel %vm9169_vm11, %v1285_v43, 0  ;;  %v1467_v30 = vshll.u32 %v1413_v44, 16  ;;  %v1471_v35 = vshrl.u32 %v1413_v44, 16  ;;  %vm9170_vm0 = vcmp.lt.f32.partialorder %v9138_v12, 8.0 }
 0x1b2   : > { %9167 = vst [vmem:[#allocation105_spill] sm:$0xff] %v7188_v15  ;;  %9168 = vst [vmem:[#allocation106_spill] sm:$0xff] %v7190_v5  ;;  %v1815_v56 = vld [vmem:[#allocation2 + $0x18] sm:$0xf]  ;;  %vm9171_vm5 = vcmp.ge.f32.partialorder %v9138_v12, 0.0  ;;  %v7205_v2 = vrot.slane %v1182_v4, 7 }
 0x1b3   : > { %vm7201_vm15 = vmand %vm9171_vm5, %vm9170_vm0  ;;  %v1477_v46 = vshll.u32 %v1414_v60, 16  ;;  %v1481_v42 = vshrl.u32 %v1414_v60, 16  ;;  %v7209_v48 = vsel %vm7107_vm10, %v1522_v32, 0  ;;  %v1816_v39 = vld [vmem:[#allocation2 + $0x1c] sm:$0xf]  ;;  %v7211_v43 = vrot.slane %v1191_v27, 7 }
 0x1b4   : > { %v7213_v44 = vrot.slane %v1467_v30, 5  ;;  %v7217_v12 = vsel %vm7119_vm9, %v1523_v24, 0  ;;  %v1705_v5 = vshrl.u32 %v7209_v48, 16  ;;  %v7220_v15 = vrot.slane %v1471_v35, 4  ;;  %v2053_v32 = vld [vmem:[#allocation2 + $0x18] sm:$0xf] }
 0x1b5   : > { %v7222_v4 = vrot.slane %v1477_v46, 5  ;;  %v7224_v60 = vrot.slane %v1481_v42, 4  ;;  %v1714_v62 = vshrl.u32 %v7217_v12, 16  ;;  %v9174_v49 = vld [vmem:[#allocation44_spill] sm:$0xff]  ;;  %v1944_v24 = vsel %vm1935_vm12, %v1815_v56, 0  ;;  %v9181_v36 = vld [vmem:[#allocation27_spill] sm:$0xff] }
 0x1b6   : > { %vm9175_vm10 = vnez %v9174_v49  ;;  %v7231_v27 = vrot.slane %v1705_v5, 7  ;;  %vm9176_vm9 = vcmp.ne.s16.totalorder %v6802_v21, 0  ;;  %v2054_v42 = vld [vmem:[#allocation2 + $0x1c] sm:$0xf]  ;;  %v1989_v30 = vshll.u32 %v1944_v24, 16 }
 0x1b7   : > { %v1945_v35 = vsel %vm9176_vm9, %v1816_v39, 0  ;;  %v1993_v14 = vshrl.u32 %v1944_v24, 16  ;;  %vm9177_vm0 = vcmp.lt.f32.partialorder %v9155_v57, 8.0  ;;  %vm9178_vm5 = vcmp.ge.f32.partialorder %v9155_v57, 0.0  ;;  %v9202_v24 = vld [vmem:[#allocation70_spill] sm:$0xff] }
 0x1b8   : > { %v1999_v58 = vshll.u32 %v1945_v35, 16  ;;  %vm7243_vm6 = vmand %vm9178_vm5, %vm9177_vm0  ;;  %v9179_v5 = vmov 0  ;;  %v2003_v33 = vshrl.u32 %v1945_v35, 16  ;;  %v9182_v21 = vsel %vm8848_vm7, %v6979_v59, %v9123_v31  ;;  %v9188_v35 = vld [vmem:[#allocation24_spill] sm:$0xff]  ;;  %v979_v23 = vld [vmem:[#allocation2] sm:$0x8] }
 0x1b9   : > { %v9180_v5 = vsel %vm7243_vm6, 4294967295, %v9179_v5  ;;  %vm2182_vm9 = vcmp.ne.s16.totalorder %v9182_v21, 0  ;;  %v7256_v56 = vsel %vm7162_vm1, %v2053_v32, 0  ;;  %v9184_v57 = vshrl.u32 %v6732_v37, 16  ;;  %vm9185_vm0 = vmand %vm7201_vm15, %vm9175_vm10  ;;  %v1224_v52 = vld [vmem:[#allocation2 + $0x8] sm:$0xf] }
 0x1ba   : > { %9183 = vst [vmem:[#allocation44_spill] sm:$0xff] %v7256_v56  ;;  %vm7266_vm5 = vmpackc.low %vm9185_vm0, %vm9185_vm0  ;;  %v7272_v59 = vrot.slane %v1714_v62, 7  ;;  %v7274_v31 = vrot.slane %v1989_v30, 5  ;;  %v7276_v17 = vrot.slane %v1993_v14, 4  ;;  %v7278_v32 = vsel %vm2182_vm9, %v2054_v42, 0 }
 0x1bb   : > { %v2421_v39 = vrot.slane %v9184_v57, 7  ;;  %9191 = vst [vmem:[#allocation107_spill] sm:$0xff] %v7278_v32  ;;  %vm1231_vm1 = vmand %vm6702_vm14, %vm7243_vm6  ;;  %v7284_v49 = vrot.slane %v1999_v58, 5  ;;  %v7286_v21 = vrot.slane %v2003_v33, 4  ;;  %v2228_v57 = vshrl.u32 %v7256_v56, 16  ;;  %v9206_v56 = vld [vmem:[#allocation25_spill] sm:$0xff] }
 0x1bc   : > { %9189 = vst [vmem:[#allocation27_spill] sm:$0xff] %v7274_v31  ;;  %9190 = vst [vmem:[#allocation24_spill] sm:$0xff] %v7276_v17  ;;  %vm9194_vm10 = vcmp.lt.f32.partialorder %v9164_v29, 8.0  ;;  %vm9195_vm0 = vcmp.ge.f32.partialorder %v9164_v29, 0.0  ;;  %v2237_v42 = vshrl.u32 %v7278_v32, 16  ;;  %v9198_v58 = vshll.u32 %v6732_v37, 16 }
 0x1bd   : > { %9192 = vst [vmem:[#allocation108_spill] sm:$0xff] %v7284_v49  ;;  %9193 = vst [vmem:[#allocation109_spill] sm:$0xff] %v7286_v21  ;;  %v2346_v30 = vld [vmem:[#allocation2 + $0x18] sm:$0xf]  ;;  %v2426_v33 = vrot.slane %v2421_v39, 4  ;;  %v1021_v21 = vsel %vm7266_vm5, 65537, %v8808_v3 }
 0x1be   : > { %vm7294_vm11 = vmand %vm9195_vm0, %vm9194_vm10  ;;  %v2424_v46 = vor.u32 %v9198_v58, %v2421_v39  ;;  %v7308_v29 = vrot.slane %v2228_v57, 7  ;;  %v2347_v49 = vld [vmem:[#allocation2 + $0x1c] sm:$0xf]  ;;  %v1032_v17 = vshll.u32 %v6840_v7, 16  ;;  %v1035_v37 = vshrl.u32 %v6840_v7, 16  ;;  %v9204_v31 = vld [vmem:[#allocation48_spill] sm:$0xff] }
 0x1bf   : > { %vm7319_vm5 = vmpackc.low %vm1231_vm1, %vm1231_vm1  ;;  %v9203_v57 = vrot.slane %v9202_v24, 4  ;;  %v2434_v62 = vsel %vm5761_vm4, %v2426_v33, %v6835_v13  ;;  %v1041_v7 = vshll.u32 %v1021_v21, 16  ;;  %v1045_v32 = vshrl.u32 %v1021_v21, 16  ;;  %v9209_v13 = vld [vmem:[#allocation26_spill] sm:$0xff]  ;;  %v9225_v39 = vld [vmem:[#allocation51_spill] sm:$0xff] }
 0x1c0   : > { %9199 = vst [vmem:[#allocation110_spill] sm:$0xff] %v7308_v29  ;;  %vm9205_vm10 = vnez %v9204_v31  ;;  %vm2467_vm8 = vcmp.ne.s16.totalorder %v2434_v62, 0  ;;  %v1034_v24 = vrot.slane %v1032_v17, 5  ;;  %v1037_v29 = vrot.slane %v1035_v37, 4  ;;  %vm9210_vm1 = vmand %vm7201_vm15, %vm7294_vm11 }
 0x1c1   : > { %v2425_v58 = vsel %vm5761_vm4, %v9203_v57, %v2424_v46  ;;  %vm1288_vm0 = vmand %vm6702_vm14, %vm9205_vm10  ;;  %v1223_v46 = vld [vmem:[#allocation2 + $0x4] sm:$0xf]  ;;  %vm936_vm4 = vcmp.lt.f32.partialorder %v9209_v13, 8.0  ;;  %v2476_v33 = vsel %vm2467_vm8, %v2347_v49, 0  ;;  %v1043_v9 = vrot.slane %v1041_v7, 5 }
 0x1c2   : > { %vm2466_vm9 = vcmp.ne.s16.totalorder %v2425_v58, 0  ;;  %v9207_v57 = vld [vmem:[#allocation42_spill] sm:$0xff]  ;;  %v1047_v8 = vrot.slane %v1045_v32, 4  ;;  %vm7348_vm12 = vmpackc.low %vm9210_vm1, %vm9210_vm1  ;;  %v2521_v58 = vshll.u32 %v2476_v33, 16  ;;  %v2525_v63 = vshrl.u32 %v2476_v33, 16 }
 0x1c3   : > { %vm9208_vm2 = vnez %v9207_v57  ;;  %v2475_v21 = vsel %vm2466_vm9, %v2346_v30, 0  ;;  %vm7358_vm8 = vmpackc.low %vm1288_vm0, %vm1288_vm0  ;;  %v1038_v49 = vor.u32 %v1037_v29, %v1034_v24  ;;  %vm1110_vm9 = vcmp.ne.s16.totalorder %v1034_v24, 0 }
 0x1c4   : > { %vm1289_vm6 = vmand %vm7201_vm15, %vm9208_vm2  ;;  %v2511_v62 = vshll.u32 %v2475_v21, 16  ;;  %v2515_v37 = vshrl.u32 %v2475_v21, 16  ;;  %v1048_v30 = vor.u32 %v1047_v8, %v1043_v9  ;;  %v1263_v7 = vsel %vm7319_vm5, %v1223_v46, 0 }
 0x1c5   : > { %vm7370_vm1 = vmpackc.low %vm1289_vm6, %vm1289_vm6  ;;  %v7374_v31 = vrot.slane %v2237_v42, 7  ;;  %v7380_v8 = vrot.slane %v2521_v58, 5  ;;  %1271 = vst [vmem:[#allocation3 + $0x4] sm:$0xf] %v1263_v7  ;;  %vm9221_vm14 = vcmp.lt.f32.partialorder %v9181_v36, 8.0  ;;  %vm9222_vm5 = vcmp.ge.f32.partialorder %v9181_v36, 0.0 }
 0x1c6   : > { %v7376_v21 = vrot.slane %v2511_v62, 5  ;;  %v7378_v29 = vrot.slane %v2515_v37, 4  ;;  %vm7386_vm10 = vmand %vm9222_vm5, %vm9221_vm14  ;;  %vm937_vm6 = vcmp.lt.f32.partialorder %v9225_v39, 8.0  ;;  %v980_v42 = vld [vmem:[#allocation2 + $0x4] sm:$0xf]  ;;  %v1039_v24 = vrot.slane %v1038_v49, 4 }
 0x1c7   : > { %9217 = vst [vmem:[#allocation70_spill] sm:$0xff] %v7374_v31  ;;  %9220 = vst [vmem:[#allocation42_spill] sm:$0xff] %v7380_v8  ;;  %v1049_v46 = vrot.slane %v1048_v30, 4  ;;  %v1119_v57 = vsel %vm1110_vm9, %v979_v23, 0  ;;  %v1264_v33 = vsel %vm7348_vm12, %v1224_v52, 0  ;;  %vm9226_vm15 = vcmp.lt.f32.partialorder %v9188_v35, 8.0 }
 0x1c8   : > { %9218 = vst [vmem:[#allocation48_spill] sm:$0xff] %v7376_v21  ;;  %9219 = vst [vmem:[#allocation25_spill] sm:$0xff] %v7378_v29  ;;  %vm9227_vm0 = vcmp.ge.f32.partialorder %v9188_v35, 0.0  ;;  %v9228_v36 = vmov 0  ;;  %v9230_v62 = vld [vmem:[#allocation52_spill] sm:$0xff]  ;;  %v7404_v58 = vrot.slane %v2525_v63, 4  ;;  %v1044_v17 = vsel %vm8848_vm7, %v1039_v24, %v1043_v9 }
 0x1c9   : > { %vm7398_vm3 = vmand %vm9227_vm0, %vm9226_vm15  ;;  %v981_v37 = vld [vmem:[#allocation2 + $0x8] sm:$0xf]  ;;  %v1132_v49 = vshrl.u32 %v1119_v57, 16  ;;  %1272 = vst [vmem:[#allocation3 + $0x28] sm:$0xf] %v1264_v33  ;;  %v1320_v23 = vsel %vm7358_vm8, 65537, %v8808_v3 }
 0x1ca   : > { %v9229_v36 = vsel %vm7398_vm3, 4294967295, %v9228_v36  ;;  %9231 = vst [vmem:[#allocation26_spill] sm:$0xff] %v7404_v58  ;;  %v1321_v52 = vsel %vm7370_vm1, 65537, %v8808_v3  ;;  %v9232_v35 = vld [vmem:[#allocation32_spill] sm:$0xff]  ;;  %v9234_v63 = vld [vmem:[#allocation67_spill] sm:$0xff]  ;;  %v1329_v7 = vshrl.u32 %v1320_v23, 16 }
 0x1cb   : > { %vm9233_vm12 = vnez %v9232_v35  ;;  %v1054_v30 = vsel %vm8848_vm7, %v1049_v46, %v9234_v63  ;;  %v1332_v57 = vshll.u32 %v1320_v23, 16  ;;  %vm1111_vm8 = vcmp.ne.s16.totalorder %v1044_v17, 0  ;;  %v9235_v33 = vld [vmem:[#allocation28_spill] sm:$0xff]  ;;  %v1279_v17 = vld [vmem:[#allocation2 + $0x4] sm:$0xf] }
 0x1cc   : > { %vm1233_vm9 = vmand %vm9233_vm12, %vm7386_vm10  ;;  %vm1112_vm15 = vcmp.ne.s16.totalorder %v1054_v30, 0  ;;  %v4130_v47 = vrot.slane %v1132_v49, 11  ;;  %vm9236_vm1 = vnez %v9235_v33  ;;  %v1120_v35 = vsel %vm1111_vm8, %v980_v42, 0  ;;  %v1225_v8 = vld [vmem:[#allocation2 + $0xc] sm:$0xf]  ;;  %v9257_v58 = vld [vmem:[#allocation34_spill] sm:$0xff] }
 0x1cd   : > { %vm1234_vm0 = vmand %vm9236_vm1, %vm7398_vm3  ;;  %v1121_v3 = vsel %vm1112_vm15, %v981_v37, 0  ;;  %v1331_v9 = vrot.slane %v1329_v7, 7  ;;  %v1337_v24 = vshrl.u32 %v1321_v52, 16  ;;  %v1137_v46 = vshrl.u32 %v1120_v35, 16  ;;  %v1280_v33 = vld [vmem:[#allocation2 + $0x8] sm:$0xf] }
 0x1ce   : > { %vm7427_vm12 = vmpackc.low %vm1233_vm9, %vm1233_vm9  ;;  %v1140_v23 = vshll.u32 %v1120_v35, 16  ;;  %v1146_v63 = vshrl.u32 %v1121_v3, 16  ;;  %v1149_v32 = vshll.u32 %v1121_v3, 16  ;;  %vm9239_vm14 = vcmp.lt.f32.partialorder %v9206_v56, 8.0 }
 0x1cf   : > { %vm9240_vm5 = vcmp.ge.f32.partialorder %v9206_v56, 0.0  ;;  %v9241_v49 = vmov 0  ;;  %v1334_v42 = vor.u32 %v1332_v57, %v1331_v9  ;;  %v1335_v37 = vrot.slane %v1331_v9, 4  ;;  %v1226_v9 = vld [vmem:[#allocation2 + $0x10] sm:$0xf] }
 0x1d0   : > { %vm7435_vm2 = vmand %vm9240_vm5, %vm9239_vm14  ;;  %v1339_v30 = vrot.slane %v1337_v24, 7  ;;  %v1340_v7 = vshll.u32 %v1321_v52, 16  ;;  %vm9243_vm9 = vcmp.ge.f32.partialorder %v9209_v13, 0.0  ;;  %v9244_v3 = vmov 0 }
 0x1d1   : > { %v9242_v49 = vsel %vm7435_vm2, 4294967295, %v9241_v49  ;;  %vm7443_vm8 = vmand %vm9243_vm9, %vm936_vm4  ;;  %v1139_v35 = vrot.slane %v1137_v46, 7  ;;  %v1148_v31 = vrot.slane %v1146_v63, 7  ;;  %v9246_v56 = vshll.u32 %v6936_v53, 16 }
 0x1d2   : > { %v9245_v3 = vsel %vm7443_vm8, 4294967295, %v9244_v3  ;;  %v1162_v57 = vrot.slane %v6982_v55, 4  ;;  %vm7457_vm14 = vmpackc.low %vm1234_vm0, %vm1234_vm0  ;;  %v1342_v52 = vor.u32 %v1340_v7, %v1339_v30  ;;  %v1344_v24 = vrot.slane %v1339_v30, 4 }
 0x1d3   : > { %v1160_v21 = vor.u32 %v9246_v56, %v6982_v55  ;;  %vm1399_vm4 = vcmp.ne.s16.totalorder %v1334_v42, 0  ;;  %v9249_v53 = vshll.u32 %v6812_v41, 16  ;;  %v9250_v55 = vld [vmem:[#allocation29_spill] sm:$0xff]  ;;  %v1142_v63 = vor.u32 %v1140_v23, %v1139_v35  ;;  %v1281_v42 = vld [vmem:[#allocation2 + $0xc] sm:$0xf] }
 0x1d4   : > { %vm9251_vm5 = vnez %v9250_v55  ;;  %v1144_v56 = vrot.slane %v1139_v35, 4  ;;  %v1151_v29 = vor.u32 %v1149_v32, %v1148_v31  ;;  %v1408_v26 = vsel %vm1399_vm4, %v1279_v17, 0 }
 0x1d5   : > { %v1169_v46 = vor.u32 %v9249_v53, %v6859_v20  ;;  %vm1235_vm15 = vmand %vm9251_vm5, %vm7435_vm2  ;;  %v1153_v30 = vrot.slane %v1148_v31, 4  ;;  %vm9253_vm0 = vnez %v8795_v45  ;;  %v1265_v7 = vsel %vm7427_vm12, %v1225_v8, 0  ;;  %v4788_v45 = vld [vmem:[#allocation10 + $0x218] sm:$0xff]  }
 0x1d6   : > { %v1266_v53 = vsel %vm7457_vm14, %v1226_v9, 0  ;;  %vm9254_vm9 = vcmp.ge.f32.partialorder %v9225_v39, 0.0  ;;  %v9255_v32 = vmov 0  ;;  %v1143_v31 = vsel %vm9253_vm0, %v4130_v47, %v1142_v63  ;;  %1273 = vst [vmem:[#allocation3 + $0x4c] sm:$0xf] %v1265_v7  ;;  %vm7511_vm3 = vmpackc.low %vm1235_vm15, %vm1235_vm15  ;;  %v9270_v63 = vld [vmem:[#allocation64_spill] sm:$0xff] }
 0x1d7   : > { %v1170_v41 = vsel %vm9253_vm0, %v1162_v57, %v1169_v46  ;;  %vm7482_vm4 = vmand %vm9254_vm9, %vm937_vm6  ;;  %v1152_v23 = vsel %vm9253_vm0, %v1144_v56, %v1151_v29  ;;  %1274 = vst [vmem:[#allocation3 + $0x70] sm:$0xf] %v1266_v53  ;;  %v1343_v8 = vsel %vm9253_vm0, %v1335_v37, %v1342_v52  ;;  %v1352_v39 = vsel %vm9253_vm0, %v1344_v24, %v9257_v58  ;;  %v9268_v52 = vld [vmem:[#allocation63_spill] sm:$0xff]  ;;  %v9272_v56 = vld [vmem:[#allocation81_spill] sm:$0xff] }
 0x1d8   : > { %v9256_v32 = vsel %vm7482_vm4, 4294967295, %v9255_v32  ;;  %1218 = vst [vmem:[#allocation3 + $0x6c] sm:$0xf] %v1170_v41  ;;  %vm9258_vm6 = vcmp.lt.f32.partialorder %v9230_v62, 8.0  ;;  %vm9259_vm12 = vcmp.ge.f32.partialorder %v9230_v62, 0.0  ;;  %v9260_v17 = vmov 0 }
 0x1d9   : > { %vm7499_vm14 = vmand %vm9259_vm12, %vm9258_vm6  ;;  %1215 = vst [vmem:[#allocation3] sm:$0xf] %v1143_v31  ;;  %v1161_v29 = vsel %vm9253_vm0, %v1153_v30, %v1160_v21  ;;  %vm1400_vm9 = vcmp.ne.s16.totalorder %v1343_v8, 0  ;;  %vm1401_vm1 = vcmp.ne.s16.totalorder %v1352_v39, 0  ;;  %v1418_v47 = vshrl.u32 %v1408_v26, 16  ;;  %v9274_v30 = vld [vmem:[#allocation55_spill] sm:$0xff] }
 0x1da   : > { %v9261_v17 = vsel %vm7499_vm14, 4294967295, %v9260_v17  ;;  %1216 = vst [vmem:[#allocation3 + $0x24] sm:$0xf] %v1152_v23  ;;  %v9262_v62 = vmov 0  ;;  %vm9264_vm6 = vmand %vm8980_vm13, %vm7443_vm8  ;;  %v9265_v21 = vmov 0  ;;  %v1409_v37 = vsel %vm1400_vm9, %v1280_v33, 0 }
 0x1db   : > { %v9263_v62 = vsel %vm7511_vm3, 4294967295, %v9262_v62  ;;  %vm7521_vm12 = vmpackc.low %vm9264_vm6, %vm9264_vm6  ;;  %1217 = vst [vmem:[#allocation3 + $0x48] sm:$0xf] %v1161_v29  ;;  %v1410_v35 = vsel %vm1401_vm1, %v1281_v42, 0  ;;  %v1421_v57 = vshll.u32 %v1408_v26, 16  ;;  %v9267_v9 = vshll.u32 %v6958_v22, 16 }
 0x1dc   : > { %v9266_v21 = vsel %vm7521_vm12, 4294967295, %v9265_v21  ;;  %vm9269_vm5 = vnez %v9268_v52  ;;  %v1420_v10 = vrot.slane %v1418_v47, 4  ;;  %v1427_v24 = vshll.u32 %v1409_v37, 16  ;;  %v9277_v8 = vld [vmem:[#allocation41_spill] sm:$0xff]  ;;  %v4716_v47 = vld [vmem:[#allocation10 + $0x138] sm:$0xff]  }
 0x1dd   : > { %v1674_v13 = vor.u32 %v9267_v9, %v6992_v38  ;;  %v1431_v46 = vshrl.u32 %v1409_v37, 16  ;;  %v1437_v55 = vshll.u32 %v1410_v35, 16  ;;  %vm9271_vm13 = vnez %v9270_v63  ;;  %vm9279_vm15 = vmand %vm9269_vm5, %vm7482_vm4 }
 0x1de   : > { %v1423_v33 = vrot.slane %v1421_v57, 5  ;;  %v1441_v26 = vshrl.u32 %v1410_v35, 16  ;;  %v1676_v42 = vrot.slane %v6992_v38, 4  ;;  %vm9273_vm1 = vnez %v9180_v5  ;;  %vm7560_vm2 = vmpackc.low %vm9279_vm15, %vm9279_vm15  ;;  %v9321_v5 = vld [vmem:[#allocation46_spill] sm:$0xff] }
 0x1df   : > { %v1675_v22 = vsel %vm9253_vm0, %v9272_v56, %v1674_v13  ;;  %vm9275_vm6 = vnez %v9274_v30  ;;  %v1429_v41 = vrot.slane %v1427_v24, 5  ;;  %v1433_v7 = vrot.slane %v1431_v46, 4  ;;  %vm9282_vm8 = vmand %vm9271_vm13, %vm7499_vm14  ;;  %v7578_v37 = vld [vmem:[#allocation3 + $0x6c] sm:$0xff]  ;;  %v9288_v24 = vld [vmem:[#allocation43_spill] sm:$0xff] }
 0x1e0   : > { %v1439_v53 = vrot.slane %v1437_v55, 5  ;;  %v9276_v31 = vshll.u32 %v6973_v50, 16  ;;  %1747 = vst [vmem:[#allocation3 + $0xc] sm:$0xf] %v1675_v22  ;;  %vm9278_vm9 = vnez %v9277_v8  ;;  %v1424_v58 = vor.u32 %v1423_v33, %v1420_v10  ;;  %vm7570_vm12 = vmpackc.low %vm9282_vm8, %vm9282_vm8  ;;  %v1227_v10 = vld [vmem:[#allocation2 + $0x14] sm:$0xf] }
 0x1e1   : > { %v1443_v38 = vrot.slane %v1441_v26, 4  ;;  %v1454_v39 = vor.u32 %v6879_v1, %v6877_v34  ;;  %v1685_v29 = vrot.slane %v7006_v0, 4  ;;  %v9283_v1 = vmov 0  ;;  %v4711_v46 = vld [vmem:[#allocation3] ss:$36 sps:$4 sm:$0xff]   ;;  %vm9296_vm13 = vmand %vm9275_vm6, %vm9273_vm1 }
 0x1e2   : > { %v1683_v23 = vor.u32 %v9276_v31, %v7006_v0  ;;  %v9284_v1 = vsel %vm7570_vm12, 4294967295, %v9283_v1  ;;  %v9285_v0 = vld [vmem:[#allocation47_spill] sm:$0xff]  ;;  %v1434_v35 = vor.u32 %v1433_v7, %v1429_v41  ;;  %v9287_v9 = vshll.u32 %v6846_v19, 16  ;;  %v4713_v22 = vld [vmem:[#allocation3 + $0x4] ss:$36 sps:$4 sm:$0xff]   ;;  %v9292_v31 = vld [vmem:[#allocation50_spill] sm:$0xff] }
 0x1e3   : > { %vm9286_vm3 = vnez %v9285_v0  ;;  %v1694_v52 = vrot.slane %v6893_v61, 4  ;;  %vm9289_vm8 = vnez %v9288_v24  ;;  %v1425_v55 = vrot.slane %v1424_v58, 4  ;;  %v7593_v19 = vld [vmem:[#allocation3 + $0x48] sm:$0xff]  ;;  %vm7616_vm15 = vmpackc.low %vm9296_vm13, %vm9296_vm13  ;;  %3413 = vmatprep.mubr.bf16.mxu1 %v4713_v22 }
 0x1e4   : > { %v1684_v57 = vsel %vm9253_vm0, %v1676_v42, %v1683_v23  ;;  %v1692_v13 = vor.u32 %v9287_v9, %v6893_v61  ;;  %v1444_v63 = vor.u32 %v1443_v38, %v1439_v53  ;;  %v1455_v33 = vrot.slane %v1454_v39, 4  ;;  %v9291_v7 = vld [vmem:[#allocation49_spill] sm:$0xff]  ;;  %vm9301_vm6 = vmand %vm9278_vm9, %vm7294_vm11  ;;  %3414 = vmatmul.mubr.bf16.vlgmr.msra.gmra.mxu1 %v4711_v46  ;;  %v4727_v46 = vld [vmem:[#allocation10 + $0x130] sm:$0xff]  }
 0x1e5   : > { %1748 = vst [vmem:[#allocation3 + $0x30] sm:$0xf] %v1684_v57  ;;  %v9290_v26 = vshll.u32 %v6865_v25, 16  ;;  %v1435_v42 = vrot.slane %v1434_v35, 4  ;;  %v9293_v23 = vshll.u32 %v9292_v31, 16  ;;  %v9294_v58 = vshll.u32 %v7172_v51, 16  ;;  %vm7636_vm13 = vmpackc.low %vm9301_vm6, %vm9301_vm6  ;;  %4390 = vmatpush3.bf16.msra.mxu1 %v4716_v47 }
 0x1e6   : > { %v1693_v61 = vsel %vm9253_vm0, %v1685_v29, %v1692_v13  ;;  %v1228_v39 = vld [vmem:[#allocation2 + $0x18] sm:$0xf]  ;;  %v1430_v25 = vsel %vm8848_vm7, %v1425_v55, %v1429_v41  ;;  %v1445_v57 = vrot.slane %v1444_v63, 4  ;;  %v4725_v13 = vld [vmem:[#allocation10 + $0x170] sm:$0xff]   ;;  %v9297_v51 = vmov 0  ;;  %v9299_v41 = vld [vmem:[#allocation36_spill] sm:$0xff] }
 0x1e7   : > { %v1701_v56 = vor.u32 %v9290_v26, %v6915_v16  ;;  %v1178_v9 = vor.u32 %v9293_v23, %v9291_v7  ;;  %v1187_v38 = vor.u32 %v9294_v58, %v7205_v2  ;;  %v9295_v26 = vld [vmem:[#allocation53_spill] sm:$0xff]  ;;  %1749 = vst [vmem:[#allocation3 + $0x54] sm:$0xf] %v1693_v61  ;;  %v9298_v51 = vsel %vm7616_vm15, 4294967295, %v9297_v51  ;;  %1509 = vst [vmem:[#allocation3 + $0x8] sm:$0xf] %v1430_v25 }
 0x1e8   : > { %v1460_v35 = vsel %vm8848_vm7, %v1455_v33, %v9295_v26  ;;  %vm9300_vm5 = vnez %v9299_v41  ;;  %v4717_v55 = vld [vmem:[#allocation3 + $0x4c] ss:$36 sps:$4 sm:$0xff]   ;;  %v4142_v30 = vcombine.low %v7593_v19, %v7578_v37  ;;  %v1171_v63 = vrot.slane %v6859_v20, 4  ;;  %vm9315_vm15 = vmand %vm9289_vm8, %vm7294_vm11  ;;  %4391 = vmatprep.subr.bf16.mxu1 %v4725_v13 }
 0x1e9   : > { %v1702_v29 = vsel %vm9253_vm0, %v1694_v52, %v1701_v56  ;;  %v1440_v52 = vsel %vm8848_vm7, %v1435_v42, %v1439_v53  ;;  %1512 = vst [vmem:[#allocation3 + $0x74] sm:$0xf] %v1460_v35  ;;  %v1180_v33 = vrot.slane %v9291_v7, 4  ;;  %v9302_v56 = vmov 0  ;;  %v9305_v53 = vld [vmem:[#allocation38_spill] sm:$0xff]  ;;  %v9309_v42 = vld [vmem:[#allocation59_spill] sm:$0xff]  ;;  %3421 = vmatprep.mubr.bf16.mxu1 %v4717_v55  ;;  %4392 = vmatpush3.bf16.msra.mxu1 %v4727_v46 }
 0x1ea   : > { %1750 = vst [vmem:[#allocation3 + $0x78] sm:$0xf] %v1702_v29  ;;  %v9303_v56 = vsel %vm7636_vm13, 4294967295, %v9302_v56  ;;  %vm9304_vm14 = vnez %v9229_v36  ;;  %vm9306_vm4 = vnez %v9305_v53  ;;  %1510 = vst [vmem:[#allocation3 + $0x2c] sm:$0xf] %v1440_v52  ;;  %v1450_v20 = vsel %vm8848_vm7, %v1445_v57, %v6877_v34  ;;  %v9310_v7 = vld [vmem:[#allocation45_spill] sm:$0xff] }
 0x1eb   : > { %vm9307_vm12 = vnez %v9263_v62  ;;  %vm9308_vm9 = vnez %v9266_v21  ;;  %v1464_v61 = vor.u32 %v9309_v42, %v9295_v26  ;;  %vm9311_vm6 = vnez %v9310_v7  ;;  %1511 = vst [vmem:[#allocation3 + $0x50] sm:$0xf] %v1450_v20  ;;  %v4729_v31 = vld [vmem:[#allocation10 + $0x168] sm:$0xff]   ;;  %vm7680_vm13 = vmpackc.low %vm9315_vm15, %vm9315_vm15  ;;  %v9333_v29 = vld [vmem:[#allocation68_spill] sm:$0xff] }
 0x1ec   : > { %v1267_v8 = vsel %vm9307_vm12, %v1227_v10, 0  ;;  %v1268_v22 = vsel %vm9308_vm9, %v1228_v39, 0  ;;  %v1179_v34 = vsel %vm9253_vm0, %v1171_v63, %v1178_v9  ;;  %v1188_v62 = vsel %vm9253_vm0, %v1180_v33, %v1187_v38  ;;  %vm9312_vm12 = vmand %vm9286_vm3, %vm9273_vm1  ;;  %v1229_v38 = vld [vmem:[#allocation2 + $0x1c] sm:$0xf]  ;;  %v1230_v39 = vld [vmem:[#allocation2 + $0x20] sm:$0xf]  ;;  %4393 = vmatprep.subr.bf16.mxu1 %v4729_v31  ;;  %3422 = vmatmul.mubr.bf16.gmra.mxu1 %v4142_v30 }
 0x1ed   : > { %1275 = vst [vmem:[#allocation3 + $0x94] sm:$0xf] %v1267_v8  ;;  %1276 = vst [vmem:[#allocation3 + $0xb8] sm:$0xf] %v1268_v22  ;;  %v1474_v21 = vor.u32 %v7220_v15, %v7213_v44  ;;  %v1703_v10 = vrot.slane %v6915_v16, 4  ;;  %v9316_v15 = vmov 0  ;;  %vm9328_vm15 = vnez %v9242_v49 }
 0x1ee   : > { %vm7670_vm9 = vmpackc.low %vm9312_vm12, %vm9312_vm12  ;;  %v9317_v15 = vsel %vm7680_vm13, 4294967295, %v9316_v15  ;;  %v9319_v16 = vmov 0  ;;  %vm9322_vm12 = vnez %v9321_v5  ;;  %1219 = vst [vmem:[#allocation3 + $0x90] sm:$0xf] %v1179_v34  ;;  %v1465_v14 = vrot.slane %v1464_v61, 4  ;;  %v4731_v13 = vld [vmem:[#allocation10 + $0x128] sm:$0xff]  }
 0x1ef   : > { %vm9318_vm3 = vmand %vm9300_vm5, %vm7386_vm10  ;;  %1220 = vst [vmem:[#allocation3 + $0xb4] sm:$0xf] %v1188_v62  ;;  %v9323_v0 = vshll.u32 %v7209_v48, 16  ;;  %v1712_v23 = vrot.slane %v7231_v27, 4  ;;  %v9324_v9 = vshll.u32 %v7217_v12, 16  ;;  %v9326_v25 = vmov 0  ;;  %4394 = vmatpush3.bf16.msra.mxu1 %v4731_v13 }
 0x1f0   : > { %vm7690_vm1 = vmpackc.low %vm9318_vm3, %vm9318_vm3  ;;  %v9329_v48 = vld [vmem:[#allocation39_spill] sm:$0xff]  ;;  %v1189_v12 = vrot.slane %v7205_v2, 4  ;;  %v9331_v57 = vshll.u32 %v7176_v6, 16  ;;  %v1198_v35 = vrot.slane %v7211_v43, 4  ;;  %v1470_v41 = vsel %vm8848_vm7, %v1465_v14, %v7213_v44  ;;  %v9339_v44 = vld [vmem:[#allocation78_spill] sm:$0xff] }
 0x1f1   : > { %v9320_v16 = vsel %vm7690_vm1, 4294967295, %v9319_v16  ;;  %v1710_v24 = vor.u32 %v9323_v0, %v7231_v27  ;;  %v1719_v58 = vor.u32 %v9324_v9, %v7272_v59  ;;  %vm9325_vm5 = vmand %vm9306_vm4, %vm9304_vm14  ;;  %vm9330_vm3 = vnez %v9329_v48  ;;  %v7752_v63 = vld [vmem:[#allocation10 + $0x1b8] sm:$0xff]   ;;  %1513 = vst [vmem:[#allocation3 + $0x98] sm:$0xf] %v1470_v41  ;;  %v4728_v36 = vld [vmem:[#allocation10 + $0x1f0] sm:$0xff]  }
 0x1f2   : > { %vm7711_vm8 = vmpackc.low %vm9325_vm5, %vm9325_vm5  ;;  %v1475_v27 = vrot.slane %v1474_v21, 4  ;;  %v1196_v26 = vor.u32 %v9331_v57, %v7211_v43  ;;  %vm9332_vm4 = vnez %v9245_v3  ;;  %vm9334_vm5 = vnez %v9333_v29  ;;  %v1755_v20 = vld [vmem:[#allocation2 + $0x8] sm:$0xf]  ;;  %v1756_v34 = vld [vmem:[#allocation2 + $0xc] sm:$0xf] }
 0x1f3   : > { %v9327_v25 = vsel %vm7711_vm8, 4294967295, %v9326_v25  ;;  %v1711_v55 = vsel %vm9253_vm0, %v1703_v10, %v1710_v24  ;;  %v1720_v2 = vsel %vm9253_vm0, %v1712_v23, %v1719_v58  ;;  %v9335_v6 = vshll.u32 %v7036_v40, 16  ;;  %vm9336_vm1 = vmand %vm9311_vm6, %vm7386_vm10  ;;  %v9350_v61 = vld [vmem:[#allocation35_spill] sm:$0xff]  ;;  %v4719_v62 = vld [vmem:[#allocation3 + $0x8] ss:$36 sps:$4 sm:$0xff]  }
 0x1f4   : > { %vm7744_vm11 = vmpackc.low %vm9336_vm1, %vm9336_vm1  ;;  %vm9340_vm8 = vnez %v9339_v44  ;;  %v1480_v40 = vsel %vm8848_vm7, %v1475_v27, %v7222_v4  ;;  %1751 = vst [vmem:[#allocation3 + $0x9c] sm:$0xf] %v1711_v55  ;;  %v1197_v28 = vsel %vm9253_vm0, %v1189_v12, %v1196_v26  ;;  %v1269_v33 = vsel %vm7560_vm2, %v1229_v38, 0  ;;  %v4721_v21 = vld [vmem:[#allocation3 + $0xc] ss:$36 sps:$4 sm:$0xff]   ;;  %v4740_v10 = vld [vmem:[#allocation10 + $0x120] sm:$0xff]  }
 0x1f5   : > { %v1205_v43 = vor.u32 %v9335_v6, %v7088_v18  ;;  %1752 = vst [vmem:[#allocation3 + $0xc0] sm:$0xf] %v1720_v2  ;;  %v4738_v18 = vld [vmem:[#allocation10 + $0x160] sm:$0xff]   ;;  %vm9341_vm10 = vnez %v9284_v1  ;;  %vm9342_vm6 = vmand %vm9322_vm12, %vm9304_vm14  ;;  %v1484_v42 = vor.u32 %v7224_v60, %v7222_v4  ;;  %v1494_v7 = vor.u32 %v9350_v61, %v7090_v11  ;;  %v9355_v60 = vld [vmem:[#allocation87_spill] sm:$0xff]  ;;  %3478 = vmatprep.mubr.bf16.mxu0 %v4721_v21 }
 0x1f6   : > { %v1270_v53 = vsel %vm9341_vm10, %v1230_v39, 0  ;;  %vm7769_vm1 = vmpackc.low %vm9342_vm6, %vm9342_vm6  ;;  %v9348_v1 = vld [vmem:[#allocation72_spill] sm:$0xff]  ;;  %1514 = vst [vmem:[#allocation3 + $0xbc] sm:$0xf] %v1480_v40  ;;  %v1721_v46 = vrot.slane %v7272_v59, 4  ;;  %v9356_v5 = vshll.u32 %v9355_v60, 16  ;;  %3479 = vmatmul.mubr.bf16.vlgmr.msra.gmra.mxu0 %v4719_v62  ;;  %4395 = vmatprep.subr.bf16.mxu1 %v4738_v18 }
 0x1f7   : > { %vm9345_vm13 = vmand %vm9330_vm3, %vm9328_vm15  ;;  %vm9349_vm10 = vnez %v9348_v1  ;;  %v1206_v22 = vsel %vm9253_vm0, %v1198_v35, %v1205_v43  ;;  %1221 = vst [vmem:[#allocation3 + $0xd8] sm:$0xf] %v1197_v28  ;;  %v9354_v4 = vld [vmem:[#allocation80_spill] sm:$0xff]  ;;  %v9357_v0 = vld [vmem:[#allocation97_spill] sm:$0xff]  ;;  %v1485_v12 = vrot.slane %v1484_v42, 4  ;;  %v1495_v30 = vrot.slane %v1494_v7, 4  ;;  %4430 = vmatpush3.bf16.msra.mxu0 %v7752_v63  ;;  %4396 = vmatpush3.bf16.msra.mxu1 %v4740_v10 }
 0x1f8   : > { %vm7779_vm2 = vmpackc.low %vm9345_vm13, %vm9345_vm13  ;;  %1277 = vst [vmem:[#allocation3 + $0xdc] sm:$0xf] %v1269_v33  ;;  %v1728_v14 = vor.u32 %v9356_v5, %v9354_v4  ;;  %v1730_v59 = vrot.slane %v9354_v4, 4  ;;  %v9358_v24 = vld [vmem:[#allocation94_spill] sm:$0xff]  ;;  %v9360_v58 = vld [vmem:[#allocation88_spill] sm:$0xff]  ;;  %vm9370_vm3 = vnez %v9298_v51  ;;  %4431 = vmatprep.subr.bf16.mxu0 %v4728_v36 }
 0x1f9   : > { %vm2300_vm14 = vmand %vm9349_vm10, %vm9332_vm4  ;;  %1278 = vst [vmem:[#allocation3 + $0x100] sm:$0xf] %v1270_v53  ;;  %v9359_v23 = vshll.u32 %v9358_v24, 16  ;;  %v9361_v38 = vld [vmem:[#allocation82_spill] sm:$0xff]  ;;  %v2287_v48 = vld [vmem:[#allocation2 + $0xc] sm:$0xf]  ;;  %v1490_v5 = vsel %vm8848_vm7, %v1485_v12, %v7090_v11  ;;  %vm9382_vm10 = vnez %v9256_v32 }
 0x1fa   : > { %vm9351_vm13 = vmand %vm9334_vm5, %vm9332_vm4  ;;  %1222 = vst [vmem:[#allocation3 + $0xfc] sm:$0xf] %v1206_v22  ;;  %v1956_v39 = vor.u32 %v9361_v38, %v9360_v58  ;;  %v4742_v27 = vld [vmem:[#allocation10 + $0x158] sm:$0xff]   ;;  %v9362_v57 = vld [vmem:[#allocation86_spill] sm:$0xff]  ;;  %v1729_v42 = vsel %vm9253_vm0, %v1721_v46, %v1728_v14  ;;  %v1795_v60 = vsel %vm9370_vm3, %v1755_v20, 0  ;;  %vm9371_vm5 = vnez %v9303_v56 }
 0x1fb   : > { %vm7800_vm12 = vmpackc.low %vm9351_vm13, %vm9351_vm13  ;;  %v1737_v9 = vor.u32 %v9359_v23, %v9357_v0  ;;  %v9363_v26 = vld [vmem:[#allocation84_spill] sm:$0xff]  ;;  %v9364_v29 = vld [vmem:[#allocation91_spill] sm:$0xff]  ;;  %1753 = vst [vmem:[#allocation3 + $0xe4] sm:$0xf] %v1729_v42  ;;  %v1796_v7 = vsel %vm9371_vm5, %v1756_v34, 0  ;;  %v2327_v24 = vsel %vm7670_vm9, %v2287_v48, 0  ;;  %vm9381_vm4 = vnez %v9320_v16  ;;  %4397 = vmatprep.subr.bf16.mxu1 %v4742_v27 }
 0x1fc   : > { %v1966_v35 = vor.u32 %v9363_v26, %v9362_v57  ;;  %v9365_v41 = vld [vmem:[#allocation83_spill] sm:$0xff]  ;;  %v9367_v6 = vld [vmem:[#allocation76_spill] sm:$0xff]  ;;  %v7824_v61 = vld [vmem:[#allocation10 + $0x1b0] sm:$0xff]   ;;  %1803 = vst [vmem:[#allocation3 + $0x10] sm:$0xf] %v1795_v60  ;;  %v1957_v46 = vrot.slane %v1956_v39, 4  ;;  %vm9386_vm9 = vnez %v9327_v25  ;;  %vm9396_vm5 = vnez %v9261_v17 }
 0x1fd   : > { %v9366_v55 = vshll.u32 %v9365_v41, 16  ;;  %v9368_v43 = vld [vmem:[#allocation60_spill] sm:$0xff]  ;;  %v4723_v22 = vld [vmem:[#allocation3 + $0x54] ss:$36 sps:$4 sm:$0xff]   ;;  %v1738_v4 = vsel %vm9253_vm0, %v1730_v59, %v1737_v9  ;;  %vm9372_vm6 = vmand %vm9340_vm8, %vm9328_vm15  ;;  %1515 = vst [vmem:[#allocation3 + $0xe0] sm:$0xf] %v1490_v5  ;;  %vm9380_vm15 = vnez %v9317_v15  ;;  %4432 = vmatpush3.bf16.msra.mxu0 %v7824_v61 }
 0x1fe   : > { %v9369_v40 = vshll.u32 %v9368_v43, 16  ;;  %v2288_v33 = vld [vmem:[#allocation2 + $0x10] sm:$0xf]  ;;  %v7826_v37 = vld [vmem:[#allocation3 + $0x90] sm:$0xff]  ;;  %1754 = vst [vmem:[#allocation3 + $0x108] sm:$0xf] %v1738_v4  ;;  %vm7849_vm13 = vmpackc.low %vm9372_vm6, %vm9372_vm6  ;;  %3486 = vmatprep.mubr.bf16.mxu0 %v4723_v22  ;;  %v1962_v0 = vsel %vm8848_vm7, %v1957_v46, %v9362_v57 }
 0x1ff   : > { %v2206_v2 = vor.u32 %v9366_v55, %v9364_v29  ;;  %v1757_v53 = vld [vmem:[#allocation2 + $0x10] sm:$0xf]  ;;  %v7828_v19 = vld [vmem:[#allocation3 + $0xb4] sm:$0xff]  ;;  %v1758_v14 = vld [vmem:[#allocation2 + $0x14] sm:$0xf]  ;;  %v1967_v44 = vrot.slane %v1966_v35, 4 }
 0x200   : > { %v2215_v28 = vor.u32 %v9369_v40, %v9367_v6  ;;  %v4732_v21 = vld [vmem:[#allocation3 + $0x94] ss:$36 sps:$4 sm:$0xff]   ;;  %v4151_v13 = vcombine.low %v7826_v37, %v7828_v19  ;;  %v4735_v11 = vld [vmem:[#allocation10 + $0x1e8] sm:$0xff]   ;;  %1804 = vst [vmem:[#allocation3 + $0x34] sm:$0xf] %v1796_v7  ;;  %v2208_v59 = vrot.slane %v9364_v29, 4  ;;  %vm7868_vm8 = vmpackc.low %vm2300_vm14, %vm2300_vm14 }
 0x201   : > { %v4744_v18 = vld [vmem:[#allocation10 + $0x118] sm:$0xff]   ;;  %v9375_v56 = vld [vmem:[#allocation90_spill] sm:$0xff]  ;;  %v9377_v49 = vld [vmem:[#allocation89_spill] sm:$0xff]  ;;  %3429 = vmatprep.mubr.bf16.mxu1 %v4732_v21  ;;  %v2328_v3 = vsel %vm9380_vm15, %v2288_v33, 0  ;;  %v1797_v1 = vsel %vm9381_vm4, %v1757_v53, 0  ;;  %v1798_v16 = vsel %vm9386_vm9, %v1758_v14, 0  ;;  %4433 = vmatprep.subr.bf16.mxu0 %v4735_v11 }
 0x202   : > { %v9376_v20 = vrot.slane %v9375_v56, 5  ;;  %v2207_v62 = vsel %vm9253_vm0, %v9377_v49, %v2206_v2  ;;  %v2289_v23 = vld [vmem:[#allocation2 + $0x14] sm:$0xf]  ;;  %v9383_v36 = vld [vmem:[#allocation65_spill] sm:$0xff]  ;;  %v9385_v58 = vld [vmem:[#allocation54_spill] sm:$0xff]  ;;  %v2216_v15 = vsel %vm9253_vm0, %v2208_v59, %v2215_v28  ;;  %v2217_v41 = vrot.slane %v9367_v6, 4  ;;  %3430 = vmatmul.mubr.bf16.gmra.mxu1 %v4151_v13 }
 0x203   : > { %2279 = vst [vmem:[#allocation3 + $0x18] sm:$0xf] %v2207_v62  ;;  %vm9384_vm14 = vnez %v9383_v36  ;;  %v7885_v9 = vld [vmem:[#allocation10 + $0x1a8] sm:$0xff]   ;;  %v1972_v47 = vsel %vm8848_vm7, %v1967_v44, %v9385_v58  ;;  %2041 = vst [vmem:[#allocation3 + $0x14] sm:$0xf] %v1962_v0  ;;  %v9387_v38 = vld [vmem:[#allocation58_spill] sm:$0xff]  ;;  %4398 = vmatpush3.bf16.msra.mxu1 %v4744_v18 }
 0x204   : > { %v1500_v34 = vsel %vm8848_vm7, %v1495_v30, %v9376_v20  ;;  %vm1769_vm3 = vmand %vm9384_vm14, %vm9382_vm10  ;;  %2335 = vst [vmem:[#allocation3 + $0x1c] sm:$0xf] %v2327_v24  ;;  %v1976_v39 = vor.u32 %v9387_v38, %v9385_v58  ;;  %v2290_v48 = vld [vmem:[#allocation2 + $0x18] sm:$0xf]  ;;  %v7896_v10 = vld [vmem:[#allocation10 + $0x1e0] sm:$0xff]   ;;  %v2329_v46 = vsel %vm7744_vm11, %v2289_v23, 0  ;;  %4434 = vmatpush3.bf16.msra.mxu0 %v7885_v9 }
 0x205   : > { %1516 = vst [vmem:[#allocation3 + $0x104] sm:$0xf] %v1500_v34  ;;  %2336 = vst [vmem:[#allocation3 + $0x40] sm:$0xf] %v2328_v3  ;;  %v1759_v12 = vld [vmem:[#allocation2 + $0x18] sm:$0xf]  ;;  %4435 = vmatprep.subr.bf16.mxu0 %v7896_v10 }
 0x206   : > { %1805 = vst [vmem:[#allocation3 + $0x58] sm:$0xf] %v1797_v1  ;;  %v4751_v57 = vld [vmem:[#allocation10 + $0x150] sm:$0xff]   ;;  %2042 = vst [vmem:[#allocation3 + $0x38] sm:$0xf] %v1972_v47  ;;  %v9389_v35 = vld [vmem:[#allocation56_spill] sm:$0xff] }
 0x207   : > { %2280 = vst [vmem:[#allocation3 + $0x3c] sm:$0xf] %v2216_v15  ;;  %1806 = vst [vmem:[#allocation3 + $0x7c] sm:$0xf] %v1798_v16  ;;  %v9388_v26 = vld [vmem:[#allocation62_spill] sm:$0xff]  ;;  %v9390_v25 = vld [vmem:[#allocation77_spill] sm:$0xff]  ;;  %4399 = vmatprep.subr.bf16.mxu1 %v4751_v57 }
 0x208   : > { %v1986_v29 = vor.u32 %v9389_v35, %v9388_v26  ;;  %v9391_v55 = vld [vmem:[#allocation57_spill] sm:$0xff]  ;;  %v9393_v40 = vld [vmem:[#allocation110_spill] sm:$0xff]  ;;  %v9394_v28 = vld [vmem:[#allocation44_spill] sm:$0xff]  ;;  %v1977_v5 = vrot.slane %v1976_v39, 4  ;;  %v2226_v7 = vrot.slane %v9390_v25, 4  ;;  %v2330_v44 = vsel %vm7769_vm1, %v2290_v48, 0 }
 0x209   : > { %v9392_v2 = vshll.u32 %v9391_v55, 16  ;;  %v9395_v33 = vshll.u32 %v9394_v28, 16  ;;  %v1760_v22 = vld [vmem:[#allocation2 + $0x1c] sm:$0xf]  ;;  %v9397_v27 = vld [vmem:[#allocation66_spill] sm:$0xff]  ;;  %v9400_v42 = vld [vmem:[#allocation48_spill] sm:$0xff] }
 0x20a   : > { %vm9398_vm6 = vnez %v9397_v27  ;;  %v9399_v30 = vld [vmem:[#allocation25_spill] sm:$0xff]  ;;  %v4745_v6 = vld [vmem:[#allocation3 + $0xdc] ss:$36 sps:$4 sm:$0xff]   ;;  %v4753_v21 = vld [vmem:[#allocation10 + $0x110] sm:$0xff]   ;;  %v1987_v52 = vrot.slane %v1986_v29, 4  ;;  %v1799_v49 = vsel %vm7779_vm2, %v1759_v12, 0  ;;  %v1982_v19 = vsel %vm8848_vm7, %v1977_v5, %v9388_v26 }
 0x20b   : > { %v2224_v43 = vor.u32 %v9392_v2, %v9390_v25  ;;  %v2233_v53 = vor.u32 %v9395_v33, %v9393_v40  ;;  %vm1770_vm15 = vmand %vm9398_vm6, %vm9396_vm5  ;;  %v9401_v4 = vor.u32 %v9399_v30, %v9400_v42  ;;  %v2291_v14 = vld [vmem:[#allocation2 + $0x1c] sm:$0xf]  ;;  %v4734_v61 = vld [vmem:[#allocation3 + $0x50] ss:$36 sps:$4 sm:$0xff]   ;;  %2337 = vst [vmem:[#allocation3 + $0x64] sm:$0xf] %v2329_v46  ;;  %3437 = vmatprep.mubr.bf16.mxu1 %v4745_v6 }
 0x20c   : > { %vm7926_vm4 = vmpackc.low %vm1769_vm3, %vm1769_vm3  ;;  %v4755_v20 = vld [vmem:[#allocation10 + $0x148] sm:$0xff]   ;;  %v9404_v62 = vld [vmem:[#allocation74_spill] sm:$0xff]  ;;  %2338 = vst [vmem:[#allocation3 + $0x88] sm:$0xf] %v2330_v44  ;;  %v1800_v50 = vsel %vm7800_vm12, %v1760_v22, 0  ;;  %3487 = vmatmul.mubr.bf16.gmra.mxu0 %v4734_v61  ;;  %v2235_v15 = vrot.slane %v9393_v40, 4  ;;  %4400 = vmatpush3.bf16.msra.mxu1 %v4753_v21 }
 0x20d   : > { %v7914_v60 = vrot.slane %v9401_v4, 4  ;;  %v2225_v34 = vsel %vm9253_vm0, %v2217_v41, %v2224_v43  ;;  %vm9405_vm11 = vnez %v9404_v62  ;;  %v4736_v11 = vld [vmem:[#allocation3 + $0x9c] ss:$36 sps:$4 sm:$0xff]   ;;  %v2234_v8 = vsel %vm9253_vm0, %v2226_v7, %v2233_v53  ;;  %1807 = vst [vmem:[#allocation3 + $0xa0] sm:$0xf] %v1799_v49  ;;  %v9411_v58 = vld [vmem:[#allocation109_spill] sm:$0xff]  ;;  %vm7985_vm12 = vmpackc.low %vm1770_vm15, %vm1770_vm15  ;;  %4401 = vmatprep.subr.bf16.mxu1 %v4755_v20 }
 0x20e   : > { %vm2301_vm14 = vmand %vm9405_vm11, %vm9382_vm10  ;;  %v4743_v37 = vld [vmem:[#allocation10 + $0x1a0] sm:$0xff]   ;;  %2281 = vst [vmem:[#allocation3 + $0x60] sm:$0xf] %v2225_v34  ;;  %v9406_v13 = vld [vmem:[#allocation27_spill] sm:$0xff]  ;;  %3494 = vmatprep.mubr.bf16.mxu0 %v4736_v11  ;;  %v2331_v6 = vsel %vm7849_vm13, %v2291_v14, 0 }
 0x20f   : > { %v9407_v59 = vld [vmem:[#allocation24_spill] sm:$0xff]  ;;  %v2292_v24 = vld [vmem:[#allocation2 + $0x20] sm:$0xf]  ;;  %v9408_v18 = vld [vmem:[#allocation75_spill] sm:$0xff]  ;;  %v1992_v31 = vsel %vm8848_vm7, %v1987_v52, %v9406_v13  ;;  %2043 = vst [vmem:[#allocation3 + $0x5c] sm:$0xf] %v1982_v19  ;;  %4436 = vmatpush3.bf16.msra.mxu0 %v4743_v37 }
 0x210   : > { %v1996_v0 = vor.u32 %v9407_v59, %v9406_v13  ;;  %vm9409_vm1 = vnez %v9408_v18  ;;  %v2611_v3 = vld [vmem:[#allocation3 + $0xd8] sm:$0xff]  ;;  %2282 = vst [vmem:[#allocation3 + $0x84] sm:$0xf] %v2234_v8  ;;  %1808 = vst [vmem:[#allocation3 + $0xc4] sm:$0xf] %v1800_v50  ;;  %v9410_v36 = vld [vmem:[#allocation108_spill] sm:$0xff] }
 0x211   : > { %vm2302_vm2 = vmand %vm9409_vm1, %vm9396_vm5  ;;  %v2616_v1 = vld [vmem:[#allocation3 + $0xfc] sm:$0xff]  ;;  %v2006_v47 = vor.u32 %v9411_v58, %v9410_v36  ;;  %v9412_v16 = vld [vmem:[#allocation70_spill] sm:$0xff]  ;;  %2044 = vst [vmem:[#allocation3 + $0x80] sm:$0xf] %v1992_v31  ;;  %v2332_v51 = vsel %vm7868_vm8, %v2292_v24, 0 }
 0x212   : > { %v4748_v23 = vld [vmem:[#allocation10 + $0x1d8] sm:$0xff]   ;;  %v4757_v12 = vld [vmem:[#allocation10 + $0x108] sm:$0xff]   ;;  %v1997_v57 = vrot.slane %v1996_v0, 4  ;;  %v1761_v25 = vld [vmem:[#allocation2 + $0x20] sm:$0xf]  ;;  %v2244_v4 = vrot.slane %v9412_v16, 4  ;;  %v4160_v7 = vcombine.low %v2611_v3, %v2616_v1 }
 0x213   : > { %v9413_v38 = vld [vmem:[#allocation107_spill] sm:$0xff]  ;;  %v9416_v35 = vld [vmem:[#allocation37_spill] sm:$0xff]  ;;  %v1762_v55 = vld [vmem:[#allocation2 + $0x24] sm:$0xf]  ;;  %v2007_v30 = vrot.slane %v2006_v47, 4  ;;  %v1801_v49 = vsel %vm7926_vm4, %v1761_v25, 0  ;;  %4437 = vmatprep.subr.bf16.mxu0 %v4748_v23  ;;  %4402 = vmatpush3.bf16.msra.mxu1 %v4757_v12 }
 0x214   : > { %v9414_v39 = vshll.u32 %v9413_v38, 16  ;;  %v9415_v26 = vld [vmem:[#allocation103_spill] sm:$0xff]  ;;  %v9417_v29 = vshll.u32 %v9416_v35, 16  ;;  %v9419_v43 = vld [vmem:[#allocation100_spill] sm:$0xff]  ;;  %v9420_v40 = vld [vmem:[#allocation93_spill] sm:$0xff]  ;;  %v2002_v46 = vsel %vm8848_vm7, %v1997_v57, %v9410_v36  ;;  %v1802_v56 = vsel %vm7985_vm12, %v1762_v55, 0  ;;  %3438 = vmatmul.mubr.bf16.gmra.mxu1 %v4160_v7 }
 0x215   : > { %v9418_v2 = vld [vmem:[#allocation99_spill] sm:$0xff]  ;;  %v4763_v22 = vld [vmem:[#allocation10 + $0x140] sm:$0xff]   ;;  %2339 = vst [vmem:[#allocation3 + $0xac] sm:$0xf] %v2331_v6  ;;  %v9424_v14 = vld [vmem:[#allocation101_spill] sm:$0xff]  ;;  %v2253_v58 = vrot.slane %v9415_v26, 4 }
 0x216   : > { %v2242_v48 = vor.u32 %v9414_v39, %v9412_v16  ;;  %v2251_v41 = vor.u32 %v9417_v29, %v9415_v26  ;;  %v2016_v28 = vor.u32 %v9419_v43, %v9418_v2  ;;  %v9421_v33 = vld [vmem:[#allocation95_spill] sm:$0xff]  ;;  %v9425_v61 = vld [vmem:[#allocation40_spill] sm:$0xff]  ;;  %v2293_v34 = vld [vmem:[#allocation2 + $0x24] sm:$0xf]  ;;  %v2012_v63 = vsel %vm8848_vm7, %v2007_v30, %v9418_v2  ;;  %2045 = vst [vmem:[#allocation3 + $0xa4] sm:$0xf] %v2002_v46 }
 0x217   : > { %v2175_v53 = vor.u32 %v9421_v33, %v9420_v40  ;;  %v4752_v10 = vld [vmem:[#allocation10 + $0x198] sm:$0xff]   ;;  %v2026_v52 = vor.u32 %v9425_v61, %v9424_v14  ;;  %vm8002_vm13 = vmpackc.low %vm2301_vm14, %vm2301_vm14  ;;  %2340 = vst [vmem:[#allocation3 + $0xd0] sm:$0xf] %v2332_v51  ;;  %v9429_v62 = vld [vmem:[#allocation98_spill] sm:$0xff]  ;;  %4403 = vmatprep.subr.bf16.mxu1 %v4763_v22 }
 0x218   : > { %v2243_v9 = vsel %vm9253_vm0, %v2235_v15, %v2242_v48  ;;  %v1819_v27 = vld [vmem:[#allocation2 + $0x28] sm:$0x1]  ;;  %v2252_v44 = vsel %vm9253_vm0, %v2244_v4, %v2251_v41  ;;  %v9430_v11 = vshll.u32 %v9429_v62, 16  ;;  %vm8022_vm8 = vmpackc.low %vm2302_vm2, %vm2302_vm2  ;;  %v4754_v50 = vld [vmem:[#allocation10 + $0x1d0] sm:$0xff]   ;;  %2046 = vst [vmem:[#allocation3 + $0xc8] sm:$0xf] %v2012_v63  ;;  %4438 = vmatpush3.bf16.msra.mxu0 %v4752_v10 }
 0x219   : > { %2283 = vst [vmem:[#allocation3 + $0xa8] sm:$0xf] %v2243_v9  ;;  %v9428_v32 = vld [vmem:[#allocation31_spill] sm:$0xff]  ;;  %2284 = vst [vmem:[#allocation3 + $0xcc] sm:$0xf] %v2252_v44  ;;  %v9433_v59 = vld [vmem:[#allocation85_spill] sm:$0xff]  ;;  %4439 = vmatprep.subr.bf16.mxu0 %v4754_v50 }
 0x21a   : > { %v2260_v19 = vor.u32 %v9430_v11, %v9428_v32  ;;  %v2294_v8 = vld [vmem:[#allocation2 + $0x28] sm:$0xf]  ;;  %1809 = vst [vmem:[#allocation3 + $0xe8] sm:$0xf] %v1801_v49  ;;  %v1930_v0 = vrot.slane %v9433_v59, 4  ;;  %v2017_v24 = vrot.slane %v2016_v28, 4 }
 0x21b   : > { %v4760_v13 = vld [vmem:[#allocation3 + $0x14] ss:$36 sps:$4 sm:$0xff]   ;;  %v9434_v17 = vld [vmem:[#allocation92_spill] sm:$0xff]  ;;  %v9435_v1 = vld [vmem:[#allocation33_spill] sm:$0xff]  ;;  %1810 = vst [vmem:[#allocation3 + $0x10c] sm:$0xf] %v1802_v56 }
 0x21c   : > { %v2057_v3 = vld [vmem:[#allocation2 + $0x28] sm:$0xf]  ;;  %v2488_v31 = vor.u32 %v9435_v1, %v9434_v17  ;;  %v2176_v37 = vrot.slane %v2175_v53, 4  ;;  %v2333_v47 = vsel %vm8002_vm13, %v2293_v34, 0  ;;  %v9438_v39 = vld [vmem:[#allocation69_spill] sm:$0xff]  ;;  %3543 = vmatprep.mubr.bf16.mxu1 %v4760_v13  ;;  %v4768_v23 = vld [vmem:[#allocation10 + $0x100] sm:$0xff]   ;;  %v2022_v26 = vsel %vm8848_vm7, %v2017_v24, %v9424_v14 }
 0x21d   : > { %v4747_v36 = vld [vmem:[#allocation3 + $0x98] ss:$36 sps:$4 sm:$0xff]   ;;  %vm9439_vm10 = vnez %v9438_v39  ;;  %v4749_v48 = vld [vmem:[#allocation3 + $0xe4] ss:$36 sps:$4 sm:$0xff]   ;;  %vm8040_vm9 = vcmp.ne.s16.totalorder %v1930_v0, 0  ;;  %v2334_v35 = vsel %vm8022_vm8, %v2294_v8, 0  ;;  %v2261_v55 = vsel %vm9253_vm0, %v2253_v58, %v2260_v19  ;;  %4404 = vmatpush3.bf16.msra.mxu1 %v4768_v23 }
 0x21e   : > { %v9436_v15 = vld [vmem:[#allocation71_spill] sm:$0xff]  ;;  %vm2359_vm3 = vmand %vm9409_vm1, %vm9439_vm10  ;;  %2341 = vst [vmem:[#allocation3 + $0xf4] sm:$0xf] %v2333_v47  ;;  %v9442_v29 = vld [vmem:[#allocation73_spill] sm:$0xff]  ;;  %3495 = vmatmul.mubr.bf16.gmra.mxu0 %v4747_v36  ;;  %v1948_v25 = vsel %vm8040_vm9, %v1819_v27, 0  ;;  %v2027_v33 = vrot.slane %v2026_v52, 4 }
 0x21f   : > { %v9437_v16 = vld [vmem:[#allocation79_spill] sm:$0xff]  ;;  %v2514_v41 = vsel %vm8848_vm7, %v9442_v29, %v9400_v42  ;;  %2047 = vst [vmem:[#allocation3 + $0xec] sm:$0xf] %v2022_v26  ;;  %2342 = vst [vmem:[#allocation3 + $0x118] sm:$0xf] %v2334_v35  ;;  %v9443_v2 = vld [vmem:[#allocation42_spill] sm:$0xff]  ;;  %3502 = vmatprep.mubr.bf16.mxu0 %v4749_v48 }
 0x220   : > { %v2498_v38 = vor.u32 %v9437_v16, %v9436_v15  ;;  %v4771_v12 = vld [vmem:[#allocation10 + $0x238] sm:$0xff]   ;;  %v2524_v43 = vsel %vm8848_vm7, %v7914_v60, %v9443_v2  ;;  %2575 = vst [vmem:[#allocation3 + $0x68] sm:$0xf] %v2514_v41  ;;  %v9444_v28 = vld [vmem:[#allocation26_spill] sm:$0xff]  ;;  %v2029_v53 = vshll.u32 %v1948_v25, 16  ;;  %vm2185_vm5 = vcmp.ne.s16.totalorder %v2176_v37, 0  ;;  %vm8069_vm6 = vmpackc.low %vm2359_vm3, %vm2359_vm3 }
 0x221   : > { %v2528_v42 = vor.u32 %v9444_v28, %v9443_v2  ;;  %v4756_v40 = vld [vmem:[#allocation10 + $0x190] sm:$0xff]   ;;  %2285 = vst [vmem:[#allocation3 + $0xf0] sm:$0xf] %v2261_v55  ;;  %v2489_v22 = vrot.slane %v2488_v31, 4  ;;  %2576 = vst [vmem:[#allocation3 + $0x8c] sm:$0xf] %v2524_v43  ;;  %4517 = vmatprep.subr.bf16.mxu1 %v4771_v12 }
 0x222   : > { %v4762_v30 = vld [vmem:[#allocation10 + $0x1c8] sm:$0xff]   ;;  %v2194_v9 = vsel %vm2185_vm5, %v2057_v3, 0  ;;  %v2499_v4 = vrot.slane %v2498_v38, 4  ;;  %v9447_v5 = vld [vmem:[#allocation104_spill] sm:$0xff]  ;;  %v2031_v46 = vrot.slane %v2029_v53, 5  ;;  %v4777_v61 = vld [vmem:[#allocation10 + $0x230] sm:$0xff]   ;;  %4440 = vmatpush3.bf16.msra.mxu0 %v4756_v40 }
 0x223   : > { %v2529_v6 = vrot.slane %v2528_v42, 4  ;;  %v9448_v10 = vld [vmem:[#allocation105_spill] sm:$0xff]  ;;  %v2264_v51 = vshrl.u32 %v2194_v9, 16  ;;  %v2267_v18 = vshll.u32 %v2194_v9, 16  ;;  %v2494_v27 = vsel %vm8848_vm7, %v2489_v22, %v9436_v15  ;;  %v4758_v14 = vld [vmem:[#allocation3 + $0x10] ss:$36 sps:$4 sm:$0xff]   ;;  %4441 = vmatprep.subr.bf16.mxu0 %v4762_v30 }
 0x224   : > { %v2538_v7 = vor.u32 %v9448_v10, %v9447_v5  ;;  %v9449_v52 = vld [vmem:[#allocation61_spill] sm:$0xff]  ;;  %2573 = vst [vmem:[#allocation3 + $0x20] sm:$0xf] %v2494_v27  ;;  %v9450_v44 = vmov 0   ;;  %v4772_v11 = vld [vmem:[#allocation3 + $0x5c] ss:$36 sps:$4 sm:$0xff]   ;;  %v2032_v19 = vsel %vm8848_vm7, %v2027_v33, %v2031_v46  ;;  %3544 = vmatmul.mubr.bf16.vlgmr.msra.gmra.mxu1 %v4758_v14 }
 0x225   : > { %v2504_v34 = vsel %vm8848_vm7, %v2499_v4, %v9449_v52  ;;  %v2534_v21 = vsel %vm8848_vm7, %v2529_v6, %v9447_v5  ;;  %v2391_v49 = vsel %vm8069_vm6, 65537, %v9450_v44  ;;  %v4764_v62 = vld [vmem:[#allocation10 + $0x188] sm:$0xff]   ;;  %v2262_v8 = vrot.slane %v9428_v32, 4  ;;  %v4761_v50 = vld [vmem:[#allocation3 + $0xe0] ss:$36 sps:$4 sm:$0xff]   ;;  %v9451_v56 = vld [vmem:[#allocation106_spill] sm:$0xff]  ;;  %4518 = vmatpush3.bf16.msra.mxu1 %v4771_v12  ;;  %3551 = vmatprep.mubr.bf16.mxu1 %v4772_v11 }
 0x226   : > { %v2539_v63 = vrot.slane %v2538_v7, 4  ;;  %v2266_v20 = vrot.slane %v2264_v51, 7  ;;  %2574 = vst [vmem:[#allocation3 + $0x44] sm:$0xf] %v2504_v34  ;;  %2577 = vst [vmem:[#allocation3 + $0xb0] sm:$0xf] %v2534_v21  ;;  %3503 = vmatmul.mubr.bf16.gmra.mxu0 %v4761_v50  ;;  %4519 = vmatprep.subr.bf16.mxu1 %v4777_v61 }
 0x227   : > { %v4769_v13 = vld [vmem:[#allocation10 + $0x1c0] sm:$0xff]   ;;  %2048 = vst [vmem:[#allocation3 + $0x110] sm:$0xf] %v2032_v19  ;;  %v2455_v0 = vshrl.u32 %v2391_v49, 16  ;;  %v2458_v24 = vshll.u32 %v2391_v49, 16  ;;  %v9452_v3 = vld [vmem:[#allocation102_spill] sm:$0xff]  ;;  %4442 = vmatpush3.bf16.msra.mxu0 %v4764_v62 }
 0x228   : > { %v2544_v59 = vsel %vm8848_vm7, %v2539_v63, %v9451_v56  ;;  %v9453_v17 = vshrl.u32 %v9452_v3, 16  ;;  %v4767_v31 = vld [vmem:[#allocation3 + $0x1c] ss:$36 sps:$4 sm:$0xff]   ;;  %v2269_v32 = vor.u32 %v2267_v18, %v2266_v20  ;;  %v4779_v36 = vld [vmem:[#allocation10 + $0x228] sm:$0xff]   ;;  %4443 = vmatprep.subr.bf16.mxu0 %v4769_v13  ;;  %v2350_v48 = vld [vmem:[#allocation2 + $0x28] sm:$0xf] }
 0x229   : > { %2578 = vst [vmem:[#allocation3 + $0xd4] sm:$0xf] %v2544_v59  ;;  %v9454_v37 = vld [vmem:[#allocation96_spill] sm:$0xff]  ;;  %v2457_v47 = vrot.slane %v2455_v0, 7  ;;  %3608 = vmatprep.mubr.bf16.mxu0 %v4767_v31  ;;  %v8098_v39 = vld [vmem:[#allocation12 + $0x38] sm:$0xff]   ;;  %4520 = vmatpush3.bf16.msra.mxu1 %v4777_v61  ;;  %v8103_v55 = vld [vmem:[#allocation12 + $0x30] sm:$0xff]  }
 0x22a   : > { %v2547_v1 = vrot.slane %v9453_v17, 4  ;;  %v2453_v58 = vrot.slane %v9454_v37, 4  ;;  %v4770_v15 = vld [vmem:[#allocation10 + $0x180] sm:$0xff]   ;;  %v2270_v38 = vsel %vm9253_vm0, %v2262_v8, %v2269_v32  ;;  %v2593_v26 = vld [vmem:[#allocation3 + $0x58] sm:$0xff]  ;;  %4521 = vmatprep.subr.bf16.mxu1 %v4779_v36  ;;  %v8108_v6 = vld [vmem:[#allocation12 + $0x28] sm:$0xff]  }
 0x22b   : > { %v2598_v16 = vld [vmem:[#allocation3 + $0x7c] sm:$0xff]  ;;  %2286 = vst [vmem:[#allocation3 + $0x114] sm:$0xf] %v2270_v38  ;;  %v2460_v23 = vor.u32 %v2458_v24, %v2457_v47  ;;  %v2462_v57 = vrot.slane %v2457_v47, 4  ;;  %4444 = vmatpush3.bf16.msra.mxu0 %v4770_v15  ;;  %v4780_v2 = vld [vmem:[#allocation3 + $0xa4] ss:$36 sps:$4 sm:$0xff]  }
 0x22c   : > { %v2351_v35 = vld [vmem:[#allocation2 + $0x2c] sm:$0x1]  ;;  %v2548_v29 = vor.u32 %v2547_v1, %v9451_v56  ;;  %v4146_v41 = vcombine.low %v2593_v26, %v2598_v16  ;;  %v4786_v12 = vld [vmem:[#allocation10 + $0x220] sm:$0xff]   ;;  %4541 = vmatprep.subr.bf16.mxu0 %v8098_v39  ;;  %v4795_v46 = vld [vmem:[#allocation10 + $0x210] sm:$0xff]  }
 0x22d   : > { %v2461_v25 = vsel %vm9253_vm0, %v2453_v58, %v2460_v23  ;;  %vm2471_vm4 = vcmp.ne.s16.totalorder %v2462_v57, 0  ;;  %v4765_v43 = vld [vmem:[#allocation3 + $0x18] ss:$36 sps:$4 sm:$0xff]   ;;  %v4775_v40 = vld [vmem:[#allocation3 + $0x64] ss:$36 sps:$4 sm:$0xff]   ;;  %4522 = vmatpush3.bf16.msra.mxu1 %v4779_v36  ;;  %v4808_v17 = vld [vmem:[%s5294_s15 + $0x10] sm:$0xff]  }
 0x22e   : > { %vm2470_vm15 = vcmp.ne.s16.totalorder %v2461_v25, 0  ;;  %3552 = vmatmul.mubr.bf16.gmra.mxu1 %v4146_v41  ;;  %v2480_v42 = vsel %vm2471_vm4, %v2351_v35, 0  ;;  %v2549_v33 = vrot.slane %v2548_v29, 4  ;;  %3609 = vmatmul.mubr.bf16.vlgmr.msra.gmra.mxu0 %v4765_v43  ;;  %v2603_v30 = vld [vmem:[#allocation3 + $0xa0] sm:$0xff]  ;;  %v4789_v27 = vld [vmem:[#allocation3 + $0xec] ss:$36 sps:$4 sm:$0xff]  }
 0x22f   : > { %v2479_v28 = vsel %vm2470_vm15, %v2350_v48, 0  ;;  %3559 = vmatprep.mubr.bf16.mxu1 %v4780_v2  ;;  %4523 = vmatprep.subr.bf16.mxu1 %v4786_v12  ;;  %v2561_v60 = vshll.u32 %v2480_v42, 16  ;;  %v2608_v9 = vld [vmem:[#allocation3 + $0xc4] sm:$0xff]  ;;  %v4784_v34 = vld [vmem:[#allocation3 + $0xac] ss:$36 sps:$4 sm:$0xff]   ;;  %v4792_v62 = vld [vmem:[#allocation12 + $0x18] sm:$0xff]  }
 0x230   : > { %v2551_v53 = vshll.u32 %v2479_v28, 16  ;;  %v2555_v22 = vshrl.u32 %v2479_v28, 16  ;;  %3616 = vmatprep.mubr.bf16.mxu0 %v4775_v40  ;;  %4542 = vmatpush3.bf16.msra.mxu0 %v8098_v39  ;;  %v4155_v7 = vcombine.low %v2603_v30, %v2608_v9  ;;  %v4782_v14 = vld [vmem:[#allocation3 + $0x60] ss:$36 sps:$4 sm:$0xff]   ;;  %v4797_v21 = vld [vmem:[#allocation10 + $0x208] sm:$0xff]   ;;  %v4809_v32 = vld [vmem:[%s5294_s15 + $0x18] sm:$0xff]  }
 0x231   : > { %4543 = vmatprep.subr.bf16.mxu0 %v8103_v55  ;;  %4524 = vmatpush3.bf16.msra.mxu1 %v4786_v12  ;;  %v2563_v18 = vrot.slane %v2561_v60, 5  ;;  %v8114_v61 = vld [vmem:[#allocation12 + $0x20] sm:$0xff]   ;;  %v2613_v44 = vld [vmem:[#allocation3 + $0xe8] sm:$0xff]  ;;  %v4793_v50 = vld [vmem:[#allocation3 + $0xf4] ss:$36 sps:$4 sm:$0xff]  }
 0x232   : > { %v2553_v4 = vrot.slane %v2551_v53, 5  ;;  %v2557_v5 = vrot.slane %v2555_v22, 4  ;;  %4525 = vmatprep.subr.bf16.mxu1 %v4788_v45  ;;  %v2618_v49 = vld [vmem:[#allocation3 + $0x10c] sm:$0xff]  ;;  %v4801_v19 = vld [vmem:[#allocation10 + $0x200] sm:$0xff]  }
 0x233   : > { %v4164_v11 = vcombine.low %v2613_v44, %v2618_v49  ;;  %v4798_v8 = vld [vmem:[#allocation3 + $0x20] ss:$36 sps:$4 sm:$0xff]   ;;  %v4791_v20 = vld [vmem:[#allocation3 + $0xa8] ss:$36 sps:$4 sm:$0xff]   ;;  %v4804_v59 = vld [vmem:[#allocation3 + $0xb0] ss:$36 sps:$4 sm:$0xff]  }
 0x234   : > { %v2554_v10 = vsel %vm8848_vm7, %v2549_v33, %v2553_v4  ;;  %v2558_v51 = vor.u32 %v2557_v5, %v2553_v4  ;;  %4544 = vmatpush3.bf16.msra.mxu0 %v8103_v55  ;;  %v4800_v13 = vld [vmem:[#allocation12 + $0x8] sm:$0xff]   ;;  %v4805_v0 = vld [vmem:[%s5294_s15] sm:$0xff]   ;;  %v4799_v24 = vld [vmem:[#allocation3 + $0xf0] ss:$36 sps:$4 sm:$0xff]  }
 0x235   : > { %2579 = vst [vmem:[#allocation3 + $0xf8] sm:$0xf] %v2554_v10  ;;  %4545 = vmatprep.subr.bf16.mxu0 %v8108_v6  ;;  %4526 = vmatpush3.bf16.msra.mxu1 %v4788_v45  ;;  %v4803_v56 = vld [vmem:[#allocation3 + $0x68] ss:$36 sps:$4 sm:$0xff]   ;;  %v4802_v3 = vld [vmem:[#allocation12] sm:$0xff]  }
 0x236   : > { %3560 = vmatmul.mubr.bf16.gmra.mxu1 %v4155_v7  ;;  %v2559_v52 = vrot.slane %v2558_v51, 4  ;;  %3617 = vmatmul.mubr.bf16.gmra.mxu0 %v4782_v14  ;;  %v4806_v1 = vld [vmem:[%s5294_s15 + $0x8] sm:$0xff]   ;;  %s9461_s15 = sld [smem:[#allocation115_spill]] }
 0x237   : > { %3567 = vmatprep.mubr.bf16.mxu1 %v4789_v27  ;;  %4527 = vmatprep.subr.bf16.mxu1 %v4795_v46 }
 0x238   : > { %v2564_v63 = vsel %vm8848_vm7, %v2559_v52, %v2563_v18  ;;  %3624 = vmatprep.mubr.bf16.mxu0 %v4784_v34  ;;  %4546 = vmatpush3.bf16.msra.mxu0 %v8108_v6 }
 0x239   : > { %2580 = vst [vmem:[#allocation3 + $0x11c] sm:$0xf] %v2564_v63  ;;  %4547 = vmatprep.subr.bf16.mxu0 %v8114_v61  ;;  %4528 = vmatpush3.bf16.msra.mxu1 %v4795_v46 }
 0x23a   : > { %4529 = vmatprep.subr.bf16.mxu1 %v4797_v21 }
 0x23c   : > { %4548 = vmatpush3.bf16.msra.mxu0 %v8114_v61  ;;  %s8292_s23 = scalar_lea.hbm %s9461_s15, %s4272_s30 }
 0x23d   : > { %4549 = vmatprep.subr.bf16.mxu0 %v4792_v62  ;;  %4530 = vmatpush3.bf16.msra.mxu1 %v4797_v21 }
 0x23e   : > { %3568 = vmatmul.mubr.bf16.gmra.mxu1 %v4164_v11  ;;  %3625 = vmatmul.mubr.bf16.gmra.mxu0 %v4791_v20 }
 0x23f   : > { %4533 = vmatprep.mubr.bf16.mxu1 %v4798_v8  ;;  %4531 = vmatprep.subr.bf16.mxu1 %v4801_v19 }
 0x240   : > { %3632 = vmatprep.mubr.bf16.mxu0 %v4793_v50  ;;  %4550 = vmatpush3.bf16.msra.mxu0 %v4792_v62  ;;  %v4807_v31 = vld [vmem:[#allocation3 + $0xf8] ss:$36 sps:$4 sm:$0xff]  }
 0x241   : > { %4551 = vmatprep.subr.bf16.mxu0 %v4796_v54  ;;  %4532 = vmatpush3.bf16.msra.mxu1 %v4801_v19 }
 0x242   : > { %4565 = vmatprep.subr.bf16.mxu1 %v8098_v39 }
 0x244   : > { %4552 = vmatpush3.bf16.msra.mxu0 %v4796_v54 }
 0x245   : > { %4553 = vmatprep.subr.bf16.mxu0 %v4800_v13 }
 0x246   : > { %4534 = vmatmul.mubr.bf16.vlgmr.msra.gmra.mxu1 %v4803_v56  ;;  %3633 = vmatmul.mubr.bf16.gmra.mxu0 %v4799_v24 }
 0x247   : > { %4573 = vmatpush3.bf16.msra.mxu1 %v8098_v39  ;;  %4537 = vmatprep.mubr.bf16.mxu1 %v4804_v59 }
 0x248   : > { %4566 = vmatprep.subr.bf16.mxu1 %v8103_v55  ;;  %4554 = vmatpush3.bf16.msra.mxu0 %v4800_v13 }
 0x249   : > { %4557 = vmatprep.mubr.bf16.mxu0 %v4805_v0  ;;  %4555 = vmatprep.subr.bf16.mxu0 %v4802_v3 }
 0x24b   : > { %4574 = vmatpush3.bf16.msra.mxu1 %v8103_v55 }
 0x24c   : > { %4567 = vmatprep.subr.bf16.mxu1 %v8108_v6  ;;  %4556 = vmatpush3.bf16.msra.mxu0 %v4802_v3 }
 0x24e   : > { %4538 = vmatmul.mubr.bf16.gmra.mxu1 %v4807_v31 }
 0x24f   : > { %4575 = vmatpush3.bf16.msra.mxu1 %v8108_v6  ;;  %4561 = vmatprep.mubr.bf16.mxu1 %v4808_v17 }
 0x250   : > { %4558 = vmatmul.mubr.bf16.vlgmr.msra.gmra.mxu0 %v4806_v1  ;;  %4568 = vmatprep.subr.bf16.mxu1 %v8114_v61 }
 0x253   : > { %4576 = vmatpush3.bf16.msra.mxu1 %v8114_v61 }
 0x254   : > { %4569 = vmatprep.subr.bf16.mxu1 %v4792_v62 }
 0x257   : > { %4577 = vmatpush3.bf16.msra.mxu1 %v4792_v62 }
 0x258   : > { %4570 = vmatprep.subr.bf16.mxu1 %v4796_v54 }
 0x25b   : > { %4578 = vmatpush3.bf16.msra.mxu1 %v4796_v54 }
 0x25c   : > { %4571 = vmatprep.subr.bf16.mxu1 %v4800_v13 }
 0x25f   : > { %4579 = vmatpush3.bf16.msra.mxu1 %v4800_v13 }
 0x260   : > { %4572 = vmatprep.subr.bf16.mxu1 %v4802_v3 }
 0x263   : > { %4580 = vmatpush3.bf16.msra.mxu1 %v4802_v3 }
 0x266   : > { %4562 = vmatmul.mubr.bf16.vlgmr.msra.gmra.mxu1 %v4809_v32 }
 0x2a4   : > { %v4325_v36 = vpop.f32.mrf.mxu1 }
 0x2a6   : > { %v4326_v37 = vpop.f32.mrf.mxu1 }
 0x2a7   : > { %v4327_v0 = vadd.f32 %v4326_v37, %v4325_v36 }
 0x2a8   : > { %v8133_v58 = vpop.f32.mrf.mxu1 }
 0x2aa   : > { %v8135_v47 = vpop.f32.mrf.mxu1 }
 0x2ab   : > { %v4330_v36 = vadd.f32 %v8135_v47, %v8133_v58 }
 0x2ac   : > { %v4331_v15 = vpop.f32.mrf.mxu1 }
 0x2ae   : > { %v4332_v38 = vpop.f32.mrf.mxu1 }
 0x2af   : > { %v4333_v56 = vadd.f32 %v4332_v38, %v4331_v15 }
 0x2b0   : > { %v4334_v48 = vpop.f32.mrf.mxu1 }
 0x2b2   : > { %v4335_v57 = vpop.f32.mrf.mxu1 }
 0x2b6   : > { %v4365_v16 = vpop.f32.mrf.mxu0 }
 0x2b8   : > { %v4366_v39 = vpop.f32.mrf.mxu0 }
 0x2b9   : > { %v4367_v54 = vadd.f32 %v4366_v39, %v4365_v16  ;;  %v4336_v16 = vadd.f32 %v4335_v57, %v4334_v48 }
 0x2ba   : > { %v4368_v23 = vpop.f32.mrf.mxu0 }
 0x2bb   : > { %v3481_v32 = vadd.f32 %v4367_v54, %v4327_v0 }
 0x2bc   : > { %v4369_v26 = vpop.f32.mrf.mxu0 }
 0x2c2   : > { %v8137_v35 = vpop.f32.mrf.mxu1 }
 0x2c4   : > { %v8139_v41 = vpop.f32.mrf.mxu1 }
 0x2c6   : > { %v8141_v25 = vpop.f32.mrf.mxu1 }
 0x2c8   : > { %v8143_v2 = vpop.f32.mrf.mxu1 }
 0x2c9   : > { %9455 = vst [vmem:[#allocation51_spill] sm:$0xff] %v8143_v2 }
 0x2cc   : > { %v4371_v29 = vpop.f32.mrf.mxu0 }
 0x2ce   : > { %v4372_v12 = vpop.f32.mrf.mxu0 }
 0x2cf   : > { %v4373_v20 = vadd.f32 %v4372_v12, %v4371_v29 }
 0x2d0   : > { %v4374_v55 = vpop.f32.mrf.mxu0 }
 0x2d1   : > { %v3489_v17 = vadd.f32 %v4373_v20, %v4333_v56  ;;  %v8211_v56 = vld [vmem:[%s8348_s9] ss:$0 sm:$0xff] }
 0x2d2   : > { %v4375_v43 = vpop.f32.mrf.mxu0 }
 0x2d3   : > { %v4376_v1 = vadd.f32 %v4375_v43, %v4374_v55 }
 0x2d4   : > { %v8145_v28 = vpop.f32.mrf.mxu1 }
 0x2d5   : > { %v3492_v55 = vadd.f32 %v4376_v1, %v4336_v16  ;;  %v8217_v1 = vld [vmem:[%s8349_s10] ss:$0 sm:$0xff] }
 0x2d6   : > { %v8149_v40 = vpop.f32.mrf.mxu1 }
 0x2d8   : > { %v8153_v53 = vpop.f32.mrf.mxu1 }
 0x2da   : > { %v8157_v45 = vpop.f32.mrf.mxu1 }
 0x2de   : > { %v8147_v42 = vpop.f32.mrf.mxu0 }
 0x2e0   : > { %v8151_v33 = vpop.f32.mrf.mxu0 }
 0x2e2   : > { %v8155_v22 = vpop.f32.mrf.mxu0 }
 0x2e4   : > { %v8159_v60 = vpop.f32.mrf.mxu0  ;;  %v4405_v30 = vpop.f32.mrf.mxu1 }
 0x2e6   : > { %v8161_v9 = vpop.f32.mrf.mxu0  ;;  %v4406_v4 = vpop.f32.mrf.mxu1 }
 0x2e7   : > { %v4407_v31 = vadd.f32 %v4406_v4, %v4405_v30 }
 0x2e8   : > { %v8163_v6 = vpop.f32.mrf.mxu0  ;;  %v4408_v5 = vpop.f32.mrf.mxu1 }
 0x2e9   : > { %v3546_v43 = vadd.f32 %v4407_v31, %v3481_v32 }
 0x2ea   : > { %v8165_v10 = vpop.f32.mrf.mxu0  ;;  %v4409_v7 = vpop.f32.mrf.mxu1 }
 0x2eb   : > { %v4410_v37 = vadd.f32 %v4409_v7, %v4408_v5  ;;  %v8198_v7 = vld [vmem:[%s8345_s6] ss:$0 sm:$0xff] }
 0x2ec   : > { %v8167_v46 = vpop.f32.mrf.mxu0 }
 0x2ee   : > { %v4411_v51 = vpop.f32.mrf.mxu1  ;;  %v4445_v18 = vpop.f32.mrf.mxu0 }
 0x2f0   : > { %v4412_v27 = vpop.f32.mrf.mxu1  ;;  %v4446_v14 = vpop.f32.mrf.mxu0 }
 0x2f1   : > { %v4413_v59 = vadd.f32 %v4412_v27, %v4411_v51  ;;  %v4447_v30 = vadd.f32 %v4446_v14, %v4445_v18 }
 0x2f2   : > { %v4414_v61 = vpop.f32.mrf.mxu1  ;;  %v4448_v52 = vpop.f32.mrf.mxu0 }
 0x2f3   : > { %v3554_v39 = vadd.f32 %v4413_v59, %v3489_v17  ;;  %v3611_v47 = vadd.f32 %v4447_v30, %v3546_v43 }
 0x2f4   : > { %v4415_v34 = vpop.f32.mrf.mxu1  ;;  %v4449_v21 = vpop.f32.mrf.mxu0 }
 0x2f5   : > { %v4416_v12 = vadd.f32 %v4415_v34, %v4414_v61  ;;  %v4450_v61 = vadd.f32 %v4449_v21, %v4448_v52 }
 0x2f6   : > { %v8169_v63 = vpop.f32.mrf.mxu1  ;;  %v4451_v44 = vpop.f32.mrf.mxu0 }
 0x2f7   : > { %v3557_v51 = vadd.f32 %v4416_v12, %v3492_v55  ;;  %v4385_v55 = vadd.f32 %v8163_v6, %v8161_v9 }
 0x2f8   : > { %v8171_v49 = vpop.f32.mrf.mxu1  ;;  %v4452_v62 = vpop.f32.mrf.mxu0 }
 0x2f9   : > { %v4453_v29 = vadd.f32 %v4452_v62, %v4451_v44 }
 0x2fa   : > { %v8173_v11 = vpop.f32.mrf.mxu1  ;;  %v4454_v19 = vpop.f32.mrf.mxu0 }
 0x2fb   : > { %9456 = vst [vmem:[#allocation52_spill] sm:$0xff] %v8173_v11  ;;  %v4370_v11 = vadd.f32 %v4369_v26, %v4368_v23  ;;  %v3619_v57 = vadd.f32 %v4453_v29, %v3554_v39 }
 0x2fc   : > { %v8175_v8 = vpop.f32.mrf.mxu1  ;;  %v4455_v50 = vpop.f32.mrf.mxu0 }
 0x2fd   : > { %9457 = vst [vmem:[#allocation32_spill] sm:$0xff] %v8175_v8  ;;  %v3484_v23 = vadd.f32 %v4370_v11, %v4330_v36  ;;  %v4456_v48 = vadd.f32 %v4455_v50, %v4454_v19  ;;  %v8206_v50 = vld [vmem:[%s8346_s7] ss:$0 sm:$0xff] }
 0x2fe   : > { %v8177_v13 = vpop.f32.mrf.mxu1  ;;  %v8179_v24 = vpop.f32.mrf.mxu0 }
 0x2ff   : > { %v3549_v27 = vadd.f32 %v4410_v37, %v3484_v23  ;;  %v3622_v62 = vadd.f32 %v4456_v48, %v3557_v51  ;;  %v4379_v48 = vadd.f32 %v8151_v33, %v8147_v42  ;;  %v4388_v42 = vadd.f32 %v8167_v46, %v8165_v10 }
 0x300   : > { %v8181_v3 = vpop.f32.mrf.mxu1  ;;  %v8183_v2 = vpop.f32.mrf.mxu0 }
 0x301   : > { %v3614_v20 = vadd.f32 %v4450_v61, %v3549_v27  ;;  %v4425_v27 = vadd.f32 %v8181_v3, %v8177_v13 }
 0x302   : > { %v8185_v8 = vpop.f32.mrf.mxu1  ;;  %v8189_v15 = vpop.f32.mrf.mxu0 }
 0x304   : > { %v8191_v38 = vpop.f32.mrf.mxu1  ;;  %v8193_v26 = vpop.f32.mrf.mxu0 }
 0x305   : > { %v4428_v10 = vadd.f32 %v8191_v38, %v8185_v8 }
 0x306   : > { %v4535_v4 = vpop.f32.mrf.mxu1  ;;  %v4463_v34 = vpop.f32.mrf.mxu0 }
 0x307   : > { %v3684_v58 = vadd.f32 %v4535_v4, %v3619_v57  ;;  %v4345_v57 = vadd.f32 %v8149_v40, %v8145_v28  ;;  %v4419_v28 = vadd.f32 %v8171_v49, %v8169_v63 }
 0x308   : > { %v3675_v44 = vpop.f32.mrf.mxu1  ;;  %v4464_v5 = vpop.f32.mrf.mxu0 }
 0x309   : > { %v3676_v14 = vadd.f32 %v3675_v44, %v3611_v47  ;;  %v3715_v52 = vmul.f32 %v8198_v7, %v3684_v58  ;;  %v3505_v33 = vadd.f32 %v4385_v55, %v4345_v57  ;;  %v4465_v63 = vadd.f32 %v4464_v5, %v4463_v34 }
 0x30a   : > { %v4536_v18 = vpop.f32.mrf.mxu1  ;;  %v8200_v11 = vpop.f32.mrf.mxu0 }
 0x30b   : > { %v3687_v21 = vadd.f32 %v4536_v18, %v3622_v62  ;;  %v3713_v0 = vmul.f32 %v8198_v7, %v3676_v14  ;;  %v3730_v31 = vadd.f32 %v8206_v50, %v3715_v52  ;;  %v4339_v18 = vadd.f32 %v8139_v41, %v8137_v35 }
 0x30c   : > { %v3678_v19 = vpop.f32.mrf.mxu1  ;;  %v4467_v54 = vpop.f32.mrf.mxu0  ;;  %v4382_v35 = vadd.f32 %v8159_v60, %v8155_v22  ;;  %v4348_v41 = vadd.f32 %v8157_v45, %v8153_v53  ;;  %v3570_v46 = vadd.f32 %v4425_v27, %v3505_v33  ;;  %v9458_v22 = vld [vmem:[#allocation51_spill] sm:$0xff]  ;;  %v9460_v53 = vld [vmem:[#allocation32_spill] sm:$0xff] }
 0x30d   : > { %v3679_v59 = vadd.f32 %v3678_v19, %v3614_v20  ;;  %v3716_v16 = vmul.f32 %v8198_v7, %v3687_v21  ;;  %v3728_v12 = vadd.f32 %v8206_v50, %v3713_v0  ;;  %v3497_v62 = vadd.f32 %v4379_v48, %v4339_v18  ;;  %v9459_v0 = vld [vmem:[#allocation52_spill] sm:$0xff] }
 0x30e   : > { %v4539_v40 = vpop.f32.mrf.mxu1  ;;  %v3508_v19 = vadd.f32 %v4388_v42, %v4348_v41  ;;  %v4459_v21 = vadd.f32 %v8183_v2, %v8179_v24  ;;  %v4342_v60 = vadd.f32 %v9458_v22, %v8141_v25  ;;  %v4422_v45 = vadd.f32 %v9460_v53, %v9459_v0 }
 0x30f   : > { %v3714_v29 = vmul.f32 %v8198_v7, %v3679_v59  ;;  %v3731_v23 = vadd.f32 %v8206_v50, %v3716_v16  ;;  %v3562_v52 = vadd.f32 %v4419_v28, %v3497_v62  ;;  %v4468_v34 = vadd.f32 %v4467_v54, %v8200_v11 }
 0x310   : > { %v4559_v17 = vpop.f32.mrf.mxu0  ;;  %v3691_v59 = vpop.f32.mrf.mxu1  ;;  %v3573_v38 = vadd.f32 %v4428_v10, %v3508_v19  ;;  %v3500_v5 = vadd.f32 %v4382_v35, %v4342_v60  ;;  %v4462_v2 = vadd.f32 %v8193_v26, %v8189_v15 }
 0x311   : > { %v3906_v32 = vmul.f32 %v4559_v17, %v8211_v56  ;;  %v3729_v61 = vadd.f32 %v8206_v50, %v3714_v29  ;;  %v3635_v17 = vadd.f32 %v4465_v63, %v3570_v46 }
 0x312   : > { %v3866_v39 = vpop.f32.mrf.mxu0  ;;  %v3565_v16 = vadd.f32 %v4422_v45, %v3500_v5  ;;  %v3638_v25 = vadd.f32 %v4468_v34, %v3573_v38 }
 0x313   : > { %v3921_v36 = vadd.f32 %v8217_v1, %v3906_v32  ;;  %v3904_v37 = vmul.f32 %v8211_v56, %v3866_v39  ;;  %v4540_v32 = vpop.f32.mrf.mxu1  ;;  %v3700_v24 = vadd.f32 %v4539_v40, %v3635_v17 }
 0x314   : > { %v4560_v43 = vpop.f32.mrf.mxu0  ;;  %v3703_v29 = vadd.f32 %v4540_v32, %v3638_v25 }
 0x315   : > { %v3929_v30 = vadd.f32 %v3921_v36, %v3730_v31  ;;  %v3919_v4 = vadd.f32 %v8217_v1, %v3904_v37  ;;  %v3907_v51 = vmul.f32 %v4560_v43, %v8211_v56  ;;  %v3627_v31 = vadd.f32 %v4459_v21, %v3562_v52 }
 0x316   : > { %v3869_v9 = vpop.f32.mrf.mxu0  ;;  %v3719_v36 = vmul.f32 %v8198_v7, %v3700_v24  ;;  %v3630_v37 = vadd.f32 %v4462_v2, %v3565_v16 }
 0x317   : > { %v3937_v6 = vmax.f32 %v3929_v30, 0.0  ;;  %v3927_v44 = vadd.f32 %v3919_v4, %v3728_v12  ;;  %v3922_v58 = vadd.f32 %v8217_v1, %v3907_v51  ;;  %v3905_v47 = vmul.f32 %v8211_v56, %v3869_v9  ;;  %v3694_v12 = vpop.f32.mrf.mxu1 }
 0x318   : > { %v3692_v39 = vadd.f32 %v3691_v59, %v3627_v31  ;;  %v3695_v54 = vadd.f32 %v3694_v12, %v3630_v37  ;;  %v3720_v30 = vmul.f32 %v8198_v7, %v3703_v29  ;;  %v3734_v4 = vadd.f32 %v8206_v50, %v3719_v36 }
 0x319   : > { %3945 = vst [vmem:[%s8247_s11 + $0x10] sm:$0xff] %v3937_v6  ;;  %v3935_v13 = vmax.f32 %v3927_v44, 0.0  ;;  %v3930_v3 = vadd.f32 %v3922_v58, %v3731_v23  ;;  %v3920_v14 = vadd.f32 %v8217_v1, %v3905_v47 }
 0x31a   : > { %v3717_v55 = vmul.f32 %v8198_v7, %v3692_v39  ;;  %v3718_v57 = vmul.f32 %v8198_v7, %v3695_v54  ;;  %v3735_v6 = vadd.f32 %v8206_v50, %v3720_v30 }
 0x31b   : > { %3943 = vst [vmem:[%s8247_s11] sm:$0xff] %v3935_v13  ;;  %v3938_v49 = vmax.f32 %v3930_v3, 0.0  ;;  %v3928_v20 = vadd.f32 %v3920_v14, %v3729_v61 }
 0x31c   : > { %v3732_v51 = vadd.f32 %v8206_v50, %v3717_v55  ;;  %v3733_v7 = vadd.f32 %v8206_v50, %v3718_v57 }
 0x31d   : > { %3946 = vst [vmem:[%s8247_s11 + $0x18] sm:$0xff] %v3938_v49  ;;  %v3936_v8 = vmax.f32 %v3928_v20, 0.0 }
 0x31f   : > { %3944 = vst [vmem:[%s8247_s11 + $0x8] sm:$0xff] %v3936_v8 }
 0x326   : > { %v4563_v11 = vpop.f32.mrf.mxu1 }
 0x327   : > { %v3910_v43 = vmul.f32 %v4563_v11, %v8211_v56 }
 0x328   : > { %v3882_v23 = vpop.f32.mrf.mxu1 }
 0x329   : > { %v3925_v15 = vadd.f32 %v8217_v1, %v3910_v43  ;;  %v3908_v26 = vmul.f32 %v8211_v56, %v3882_v23 }
 0x32a   : > { %v4564_v48 = vpop.f32.mrf.mxu1 }
 0x32b   : > { %v3933_v27 = vadd.f32 %v3925_v15, %v3734_v4  ;;  %v3923_v61 = vadd.f32 %v8217_v1, %v3908_v26  ;;  %v3911_v9 = vmul.f32 %v4564_v48, %v8211_v56 }
 0x32c   : > { %v3885_v44 = vpop.f32.mrf.mxu1 }
 0x32d   : > { %v3941_v58 = vmax.f32 %v3933_v27, 0.0  ;;  %v3931_v47 = vadd.f32 %v3923_v61, %v3732_v51  ;;  %v3926_v18 = vadd.f32 %v8217_v1, %v3911_v9  ;;  %v3909_v42 = vmul.f32 %v8211_v56, %v3885_v44 }
 0x32f   : > { %3949 = vst [vmem:[%s8247_s11 + $0x30] sm:$0xff] %v3941_v58  ;;  %v3939_v28 = vmax.f32 %v3931_v47, 0.0  ;;  %v3934_v40 = vadd.f32 %v3926_v18, %v3735_v6  ;;  %v3924_v33 = vadd.f32 %v8217_v1, %v3909_v42 }
 0x331   : > { %3947 = vst [vmem:[%s8247_s11 + $0x20] sm:$0xff] %v3939_v28  ;;  %v3942_v13 = vmax.f32 %v3934_v40, 0.0  ;;  %v3932_v3 = vadd.f32 %v3924_v33, %v3733_v7 }
 0x333   : > { %3950 = vst [vmem:[%s8247_s11 + $0x38] sm:$0xff] %v3942_v13  ;;  %v3940_v50 = vmax.f32 %v3932_v3, 0.0 }
 0x335   : > { %3948 = vst [vmem:[%s8247_s11 + $0x28] sm:$0xff] %v3940_v50 }
 0x336   : > { %4957 = shalt.err (!%p4954_p6)
}
 0x337   : > { %s4958_s5 = scalar_lea.hbm %s8292_s23, 1024  ;;  %s4962_s27 = scalar_lea.hbm %s9461_s15, 2048 }
 0x338   : > { %p4959_p7 = scmp.ne.s32.totalorder %s8292_s23, %s4958_s5  ;;  %p4963_p11 = scmp.lt.s32.totalorder %s8292_s23, %s9461_s15 }
 0x339   : > { %p4964_p3 = scmp.lt.s32.totalorder %s4962_s27, %s4958_s5 }
 0x33a   : > { %p4960_p5 = pnand %p4959_p7, %p9462_p13 }
 0x33b   : > { %p4965_p12 = por %p4964_p3, %p4963_p11 }
 0x33c   : > { %p4961_p8 = pneg %p4960_p5 }
 0x33e   : > { %p4966_p9 = pnand %p4965_p12, %p4961_p8 }
 0x340   : > { %4969 = shalt.err (!%p4966_p9)
}
 0x341   : > { %s5031_s28 = smov 128   ;;  %s5032_s26 = smov 8  }
 0x342   : > { %4597 = dma.vmem_to_hbm [thread:$0]  (%p9462_p13), %s8294_s22, 1024, %s8292_s23, %s3952_s17, %s5031_s28, %s5031_s28, %s5032_s26  }
 0x343 PF: > { %s9463_s11 = sld [smem:[#allocation19_spill]]  ;;  %p9466_p2 = scmp.ge.s32.totalorder %s5020_s20, 2 }
 0x344   : > { %s9464_s30 = sld [smem:[#allocation21_spill]] }
 0x349   : > { %s3980_s2 = sand.u32 1, %s9463_s11  }
 0x34a   : > { %p9465_p0 = scmp.ne.s32.totalorder %s9464_s30, 0  ;;  %s3981_s25 = scalar_lea.sflag [#allocation6], %s3980_s2 }
 0x34c   : > { %p4617_p10 = pnand %p9466_p2, %p9465_p0 }
 0x34e   : > { %p4618_p1 = pneg %p4617_p10 }
 0x350   : > { %5003 = dma.done.wait (%p4618_p1), %s3981_s25, 1024  }
 0x351   : > { %5005 = vsyncadd (%p4618_p1), %s3981_s25, 4294966272  ;;  %s9467_s20 = sld [smem:[#allocation22_spill]]  ;;  %s9470_s17 = smov %s5012_s18 }
 0x352   : > { %s9468_s24 = sld [smem:[#allocation20_spill]] }
 0x353   : > { %s9469_s19 = sld [smem:[#allocation23_spill]] }
 0x357   : > { %p28_p4 = scmp.ge.s32.totalorder %s9467_s20, 4  }
 0x358   : > { %s9471_s18 = smov %s9468_s24 }
 0x359   :  { %30 = sbr.rel (!%p28_p4) target bundleno = 14 (0xe), region = 134 }
 0x35e   :  { %3986 = vsyncpa [#allocation5], 1 }
 0x35f   :  { %3988 = vsyncpa [#allocation5 + $0x1], 1 }
 0x360   :  { %3989 = vsyncpa [#allocation8], 1 }
 0x361   :  { %3991 = vsyncpa [#allocation8 + $0x1], 1 }
 0x362   :  { %3992 = vsyncpa [#allocation11], 1 }
 0x363   :  { %3993 = vsyncpa [#allocation6], 1 }
 0x364   :  { %3995 = vsyncpa [#allocation6 + $0x1], 1 }

</bundles_post_ra>
